<compile_context>
chip_gen: v7x
topology: tpu7x:2x2x1
jax: 0.10.0
libtpu: 0.0.40
codegen_flags: <defaults>
</compile_context>

<pallas_src>
import jax
import jax.numpy as jnp
from jax.experimental import pallas as pl
from jax.experimental.pallas import tpu as pltpu


def _mlp_kernel(xyz_ref, w1_ref, b1_ref, wh_ref, bh_ref, wo_ref, bo_ref, out_ref):
    # Layer 1 on the MXU: (size, 8) @ (8, TB).  K padded 3 -> 8 in the wrapper.
    z = jnp.dot(w1_ref[...], xyz_ref[...].astype(w1_ref.dtype),
                preferred_element_type=jnp.float32)
    g = jnp.tanh(z + b1_ref[...])                      # (size, TB), f32

    # Hidden layers 2..5 (statically unrolled serial chain of (size,size) dots).
    for i in range(wh_ref.shape[0]):
        w = wh_ref[i]                                  # (size, size)
        z = jnp.dot(w, g.astype(w.dtype), preferred_element_type=jnp.float32)
        g = jnp.tanh(z + bh_ref[i])                    # bias (size, 1) broadcasts

    # Output layer: (1, size) @ (size, TB) -> lane-dense (1, TB) store.
    z = jnp.dot(wo_ref[...], g.astype(wo_ref.dtype),
                preferred_element_type=jnp.float32)
    out_ref[...] = (z + bo_ref[...]).astype(out_ref.dtype)


def net_forward(x, y, t, params, tb=2048, use_bf16=False, core_parallel=False):
    """x, y, t: (N, 1) float32.  params: list of 6 (W, b) in PyTorch (out, in)
    layout.  Returns (N, 1) float32, matching the torch forward pass."""
    n = x.shape[0]
    size = params[0][0].shape[0]

    # Round tb to a lane-dense multiple of 128 and clamp to the padded batch.
    tb = max(128, ((int(tb) + 127) // 128) * 128)
    n_min = ((n + 127) // 128) * 128
    tb = min(tb, n_min)
    n_pad = pl.cdiv(n, tb) * tb
    pad = n_pad - n

    wdt = jnp.bfloat16 if use_bf16 else jnp.float32

    # Stack x, y, t into one lane-dense (8, N_pad) operand (K padded 3 -> 8).
    xyz = jnp.concatenate(
        [x.reshape(1, n), y.reshape(1, n), t.reshape(1, n)], axis=0
    ).astype(jnp.float32)
    xyz = jnp.pad(xyz, ((0, 5), (0, pad)))

    # --- Fold sigmoid affine constants into the parameters (exact in f32). ---
    # sigmoid(z) = 0.5 * tanh(0.5 * z) + 0.5, so with g_i = tanh(A_i h + c_i):
    #   A1 = 0.5*W1,  c1 = 0.5*b1
    #   A_i = 0.25*W_i,  c_i = 0.5*b_i + 0.25*W_i@1        (i = 2..5)
    #   Ao = 0.5*Wo,  co = bo + 0.5*Wo@1
    fp = [(w.astype(jnp.float32), b.astype(jnp.float32)) for (w, b) in params]
    (w1, b1), (w2, b2), (w3, b3), (w4, b4), (w5, b5), (wo, bo) = fp
    a1, c1 = 0.5 * w1, 0.5 * b1
    ah, ch = [], []
    for (w, b) in ((w2, b2), (w3, b3), (w4, b4), (w5, b5)):
        ah.append(0.25 * w)
        ch.append(0.5 * b + 0.25 * jnp.sum(w, axis=1))
    ao = 0.5 * wo
    co = bo + 0.5 * jnp.sum(wo, axis=1)

    w1p = jnp.pad(a1, ((0, 0), (0, 5))).astype(wdt)     # (size, 8)
    b1p = c1.reshape(size, 1)                            # (size, 1)  f32
    whp = jnp.stack(ah).astype(wdt)                      # (4, size, size)
    bhp = jnp.stack(ch).reshape(4, size, 1)              # (4, size, 1)  f32
    wop = ao.astype(wdt)                                 # (1, size)
    bop = co.reshape(1, 1)                               # (1, 1)  f32

    row_spec = pl.BlockSpec((8, tb), lambda i: (0, i))   # batch-tiled input

    def const(a):                                        # VMEM-resident params
        zeros = tuple(0 for _ in a.shape)
        return pl.BlockSpec(a.shape, lambda i, z=zeros: z)

    # v7x: core_parallel=True (with an even grid) shards steps over both TCs.
    sem = (pltpu.CORE_PARALLEL,) if core_parallel else ("parallel",)

    out = pl.pallas_call(
        _mlp_kernel,
        out_shape=jax.ShapeDtypeStruct((1, n_pad), jnp.float32),
        grid=(n_pad // tb,),
        in_specs=[row_spec] + [const(p) for p in (w1p, b1p, whp, bhp, wop, bop)],
        out_specs=pl.BlockSpec((1, tb), lambda i: (0, i)),
        compiler_params=pltpu.CompilerParams(
            dimension_semantics=sem,
            vmem_limit_bytes=32 * 1024 * 1024,           # plenty; fits v7x 64 MiB
        ),
    )(xyz, w1p, b1p, whp, bhp, wop, bop)

    return out[:, :n].reshape(n, 1)


def init_params(key, size):
    """nn.Linear-style init; PyTorch (out_features, in_features) layout."""
    dims = [(size, 3), (size, size), (size, size),
            (size, size), (size, size), (1, size)]
    params = []
    for (fan_out, fan_in) in dims:
        key, kw, kb = jax.random.split(key, 3)
        bound = 1.0 / jnp.sqrt(jnp.float32(fan_in))
        w = jax.random.uniform(kw, (fan_out, fan_in), jnp.float32, -bound, bound)
        b = jax.random.uniform(kb, (fan_out,), jnp.float32, -bound, bound)
        params.append((w, b))
    return params


def reference_forward(x, y, t, params):
    h = jnp.concatenate([x, y, t], axis=1)               # (N, 3)
    for i, (w, b) in enumerate(params):
        h = h @ w.T + b
        if i < len(params) - 1:
            h = jax.nn.sigmoid(h)
    return h


if __name__ == "__main__":
    size = 32     # hidden width
    n = 3000      # collocation points: non-multiple of 128, multi-step grid

    key = jax.random.PRNGKey(0)
    key, kx, ky, kt = jax.random.split(key, 4)
    x = jax.random.uniform(kx, (n, 1), jnp.float32)
    y = jax.random.uniform(ky, (n, 1), jnp.float32)
    t = jax.random.uniform(kt, (n, 1), jnp.float32)

    params = init_params(key, size)

    out = jax.block_until_ready(net_forward(x, y, t, params))
    ref = reference_forward(x, y, t, params)

    assert out.shape == (n, 1)
    assert jnp.allclose(out, ref, atol=1e-5, rtol=1e-4), float(
        jnp.max(jnp.abs(out - ref)))

    # TODO(synk): `predict()` needs d(out)/d(x,y,t); pallas_call has no
    # automatic VJP, so a custom_vjp (or fused fwd+grad kernel) is required
    # before using this inside jax.grad for PINN training.
    print("KERNEL_OK")
</pallas_src>

<mosaic_0001>
module attributes {stable_mosaic.version = 11 : i64} {
  func.func @_mlp_kernel(%arg0: i32, %arg1: memref<8x2048xf32, #tpu.memory_space<vmem>>, %arg2: memref<32x8xf32, #tpu.memory_space<vmem>>, %arg3: memref<32x1xf32, #tpu.memory_space<vmem>>, %arg4: memref<4x32x32xf32, #tpu.memory_space<vmem>>, %arg5: memref<4x32x1xf32, #tpu.memory_space<vmem>>, %arg6: memref<1x32xf32, #tpu.memory_space<vmem>>, %arg7: memref<1x1xf32, #tpu.memory_space<vmem>>, %arg8: memref<1x2048xf32, #tpu.memory_space<vmem>>) attributes {dimension_semantics = [#tpu.dimension_semantics<parallel>], iteration_bounds = array<i64: 2>, scalar_prefetch = 0 : i64, scratch_operands = 0 : i64, tpu.core_type = #tpu.core_type<tc>, window_params = [{transform_indices = @transform_0, window_bounds = array<i64: 8, 2048>}, {pipeline_mode = #tpu.pipeline_mode<synchronous>, transform_indices = @transform_1, window_bounds = array<i64: 32, 8>}, {pipeline_mode = #tpu.pipeline_mode<synchronous>, transform_indices = @transform_2, window_bounds = array<i64: 32, 1>}, {pipeline_mode = #tpu.pipeline_mode<synchronous>, transform_indices = @transform_3, window_bounds = array<i64: 4, 32, 32>}, {pipeline_mode = #tpu.pipeline_mode<synchronous>, transform_indices = @transform_4, window_bounds = array<i64: 4, 32, 1>}, {pipeline_mode = #tpu.pipeline_mode<synchronous>, transform_indices = @transform_5, window_bounds = array<i64: 1, 32>}, {pipeline_mode = #tpu.pipeline_mode<synchronous>, transform_indices = @transform_6, window_bounds = array<i64: 1, 1>}, {transform_indices = @transform_7, window_bounds = array<i64: 1, 2048>}]} {
    %c0 = arith.constant 0 : index
    %c0_0 = arith.constant 0 : index
    %0 = vector.load %arg2[%c0, %c0_0] : memref<32x8xf32, #tpu.memory_space<vmem>>, vector<32x8xf32>
    %c0_1 = arith.constant 0 : index
    %c0_2 = arith.constant 0 : index
    %1 = vector.load %arg1[%c0_1, %c0_2] : memref<8x2048xf32, #tpu.memory_space<vmem>>, vector<8x2048xf32>
    %cst = arith.constant dense<0.000000e+00> : vector<32x2048xf32>
    %2 = tpu.matmul %0, %1, %cst {dimension_numbers = #tpu.dot_dimension_numbers<[1], [0], [0], [1], [0, 0, 1, 1], [], []>} : vector<32x8xf32>, vector<8x2048xf32>, vector<32x2048xf32> -> vector<32x2048xf32>
    %c0_3 = arith.constant 0 : index
    %c0_4 = arith.constant 0 : index
    %3 = vector.load %arg3[%c0_3, %c0_4] : memref<32x1xf32, #tpu.memory_space<vmem>>, vector<32x1xf32>
    %4 = vector.broadcast %3 : vector<32x1xf32> to vector<32x2048xf32>
    %5 = arith.addf %2, %4 : vector<32x2048xf32>
    %6 = math.tanh %5 : vector<32x2048xf32>
    %c0_5 = arith.constant 0 : index
    %c0_6 = arith.constant 0 : index
    %c0_7 = arith.constant 0 : index
    %7 = vector.load %arg4[%c0_5, %c0_6, %c0_7] : memref<4x32x32xf32, #tpu.memory_space<vmem>>, vector<1x32x32xf32>
    %8 = vector.shape_cast %7 : vector<1x32x32xf32> to vector<32x32xf32>
    %cst_8 = arith.constant dense<0.000000e+00> : vector<32x2048xf32>
    %9 = tpu.matmul %8, %6, %cst_8 {dimension_numbers = #tpu.dot_dimension_numbers<[1], [0], [0], [1], [0, 0, 1, 1], [], []>} : vector<32x32xf32>, vector<32x2048xf32>, vector<32x2048xf32> -> vector<32x2048xf32>
    %c0_9 = arith.constant 0 : index
    %c0_10 = arith.constant 0 : index
    %c0_11 = arith.constant 0 : index
    %10 = vector.load %arg5[%c0_9, %c0_10, %c0_11] : memref<4x32x1xf32, #tpu.memory_space<vmem>>, vector<1x32x1xf32>
    %11 = vector.shape_cast %10 : vector<1x32x1xf32> to vector<32x1xf32>
    %12 = vector.broadcast %11 : vector<32x1xf32> to vector<32x2048xf32>
    %13 = arith.addf %9, %12 : vector<32x2048xf32>
    %14 = math.tanh %13 : vector<32x2048xf32>
    %c1 = arith.constant 1 : index
    %c0_12 = arith.constant 0 : index
    %c0_13 = arith.constant 0 : index
    %15 = vector.load %arg4[%c1, %c0_12, %c0_13] : memref<4x32x32xf32, #tpu.memory_space<vmem>>, vector<1x32x32xf32>
    %16 = vector.shape_cast %15 : vector<1x32x32xf32> to vector<32x32xf32>
    %cst_14 = arith.constant dense<0.000000e+00> : vector<32x2048xf32>
    %17 = tpu.matmul %16, %14, %cst_14 {dimension_numbers = #tpu.dot_dimension_numbers<[1], [0], [0], [1], [0, 0, 1, 1], [], []>} : vector<32x32xf32>, vector<32x2048xf32>, vector<32x2048xf32> -> vector<32x2048xf32>
    %c1_15 = arith.constant 1 : index
    %c0_16 = arith.constant 0 : index
    %c0_17 = arith.constant 0 : index
    %18 = vector.load %arg5[%c1_15, %c0_16, %c0_17] : memref<4x32x1xf32, #tpu.memory_space<vmem>>, vector<1x32x1xf32>
    %19 = vector.shape_cast %18 : vector<1x32x1xf32> to vector<32x1xf32>
    %20 = vector.broadcast %19 : vector<32x1xf32> to vector<32x2048xf32>
    %21 = arith.addf %17, %20 : vector<32x2048xf32>
    %22 = math.tanh %21 : vector<32x2048xf32>
    %c2 = arith.constant 2 : index
    %c0_18 = arith.constant 0 : index
    %c0_19 = arith.constant 0 : index
    %23 = vector.load %arg4[%c2, %c0_18, %c0_19] : memref<4x32x32xf32, #tpu.memory_space<vmem>>, vector<1x32x32xf32>
    %24 = vector.shape_cast %23 : vector<1x32x32xf32> to vector<32x32xf32>
    %cst_20 = arith.constant dense<0.000000e+00> : vector<32x2048xf32>
    %25 = tpu.matmul %24, %22, %cst_20 {dimension_numbers = #tpu.dot_dimension_numbers<[1], [0], [0], [1], [0, 0, 1, 1], [], []>} : vector<32x32xf32>, vector<32x2048xf32>, vector<32x2048xf32> -> vector<32x2048xf32>
    %c2_21 = arith.constant 2 : index
    %c0_22 = arith.constant 0 : index
    %c0_23 = arith.constant 0 : index
    %26 = vector.load %arg5[%c2_21, %c0_22, %c0_23] : memref<4x32x1xf32, #tpu.memory_space<vmem>>, vector<1x32x1xf32>
    %27 = vector.shape_cast %26 : vector<1x32x1xf32> to vector<32x1xf32>
    %28 = vector.broadcast %27 : vector<32x1xf32> to vector<32x2048xf32>
    %29 = arith.addf %25, %28 : vector<32x2048xf32>
    %30 = math.tanh %29 : vector<32x2048xf32>
    %c3 = arith.constant 3 : index
    %c0_24 = arith.constant 0 : index
    %c0_25 = arith.constant 0 : index
    %31 = vector.load %arg4[%c3, %c0_24, %c0_25] : memref<4x32x32xf32, #tpu.memory_space<vmem>>, vector<1x32x32xf32>
    %32 = vector.shape_cast %31 : vector<1x32x32xf32> to vector<32x32xf32>
    %cst_26 = arith.constant dense<0.000000e+00> : vector<32x2048xf32>
    %33 = tpu.matmul %32, %30, %cst_26 {dimension_numbers = #tpu.dot_dimension_numbers<[1], [0], [0], [1], [0, 0, 1, 1], [], []>} : vector<32x32xf32>, vector<32x2048xf32>, vector<32x2048xf32> -> vector<32x2048xf32>
    %c3_27 = arith.constant 3 : index
    %c0_28 = arith.constant 0 : index
    %c0_29 = arith.constant 0 : index
    %34 = vector.load %arg5[%c3_27, %c0_28, %c0_29] : memref<4x32x1xf32, #tpu.memory_space<vmem>>, vector<1x32x1xf32>
    %35 = vector.shape_cast %34 : vector<1x32x1xf32> to vector<32x1xf32>
    %36 = vector.broadcast %35 : vector<32x1xf32> to vector<32x2048xf32>
    %37 = arith.addf %33, %36 : vector<32x2048xf32>
    %38 = math.tanh %37 : vector<32x2048xf32>
    %c0_30 = arith.constant 0 : index
    %c0_31 = arith.constant 0 : index
    %39 = vector.load %arg6[%c0_30, %c0_31] : memref<1x32xf32, #tpu.memory_space<vmem>>, vector<1x32xf32>
    %cst_32 = arith.constant dense<0.000000e+00> : vector<1x2048xf32>
    %40 = tpu.matmul %39, %38, %cst_32 {dimension_numbers = #tpu.dot_dimension_numbers<[1], [0], [0], [1], [0, 0, 1, 1], [], []>} : vector<1x32xf32>, vector<32x2048xf32>, vector<1x2048xf32> -> vector<1x2048xf32>
    %c0_33 = arith.constant 0 : index
    %c0_34 = arith.constant 0 : index
    %41 = vector.load %arg7[%c0_33, %c0_34] : memref<1x1xf32, #tpu.memory_space<vmem>>, vector<1x1xf32>
    %42 = vector.broadcast %41 : vector<1x1xf32> to vector<1x2048xf32>
    %43 = arith.addf %40, %42 : vector<1x2048xf32>
    %c0_35 = arith.constant 0 : index
    %c0_36 = arith.constant 0 : index
    %44 = vector.load %arg8[%c0_35, %c0_36] : memref<1x2048xf32, #tpu.memory_space<vmem>>, vector<1x2048xf32>
    tpu.vector_store %arg8[%c0_35, %c0_36], %43 {strides = array<i32>} : memref<1x2048xf32, #tpu.memory_space<vmem>>, vector<1x2048xf32>,
    return
  }
  func.func @transform_0(%arg0: i32) -> (i32, i32) {
    %c0_i32 = arith.constant 0 : i32
    %c0_i32_0 = arith.constant 0 : i32
    return %c0_i32, %arg0 : i32, i32
  }
  func.func @transform_1(%arg0: i32) -> (i32, i32) {
    %c0_i32 = arith.constant 0 : i32
    %c0_i32_0 = arith.constant 0 : i32
    %c0_i32_1 = arith.constant 0 : i32
    return %c0_i32, %c0_i32_0 : i32, i32
  }
  func.func @transform_2(%arg0: i32) -> (i32, i32) {
    %c0_i32 = arith.constant 0 : i32
    %c0_i32_0 = arith.constant 0 : i32
    %c0_i32_1 = arith.constant 0 : i32
    return %c0_i32, %c0_i32_0 : i32, i32
  }
  func.func @transform_3(%arg0: i32) -> (i32, i32, i32) {
    %c0_i32 = arith.constant 0 : i32
    %c0_i32_0 = arith.constant 0 : i32
    %c0_i32_1 = arith.constant 0 : i32
    %c0_i32_2 = arith.constant 0 : i32
    return %c0_i32, %c0_i32_0, %c0_i32_1 : i32, i32, i32
  }
  func.func @transform_4(%arg0: i32) -> (i32, i32, i32) {
    %c0_i32 = arith.constant 0 : i32
    %c0_i32_0 = arith.constant 0 : i32
    %c0_i32_1 = arith.constant 0 : i32
    %c0_i32_2 = arith.constant 0 : i32
    return %c0_i32, %c0_i32_0, %c0_i32_1 : i32, i32, i32
  }
  func.func @transform_5(%arg0: i32) -> (i32, i32) {
    %c0_i32 = arith.constant 0 : i32
    %c0_i32_0 = arith.constant 0 : i32
    %c0_i32_1 = arith.constant 0 : i32
    return %c0_i32, %c0_i32_0 : i32, i32
  }
  func.func @transform_6(%arg0: i32) -> (i32, i32) {
    %c0_i32 = arith.constant 0 : i32
    %c0_i32_0 = arith.constant 0 : i32
    %c0_i32_1 = arith.constant 0 : i32
    return %c0_i32, %c0_i32_0 : i32, i32
  }
  func.func @transform_7(%arg0: i32) -> (i32, i32) {
    %c0_i32 = arith.constant 0 : i32
    %c0_i32_0 = arith.constant 0 : i32
    return %c0_i32, %arg0 : i32, i32
  }
}

</mosaic_0001>

<bundles_post_ra>
// kernel: tpu_custom_call.1
= control target key start
LH: loop header
LB: loop body
LE: loop exit
PB: predicated region body
PF: predicated region fallthrough
CT: control target
= control target key end

     0   :  { %s7836_s0 = inlined_call_operand.hbm [shape: f32[8,4096], index: 0, kind: input, shape index: {}]   ;;  %s7837_s1 = inlined_call_operand.vmem [shape: f32[32,8], index: 1, kind: input, shape index: {}]   ;;  %s7838_s2 = inlined_call_operand.vmem [shape: f32[32,1], index: 2, kind: input, shape index: {}]   ;;  %s7839_s3 = inlined_call_operand.vmem [shape: f32[4,32,32], index: 3, kind: input, shape index: {}]   ;;  %s7840_s4 = inlined_call_operand.vmem [shape: f32[4,32,1], index: 4, kind: input, shape index: {}]   ;;  %s7841_s5 = inlined_call_operand.vmem [shape: f32[1,32], index: 5, kind: input, shape index: {}]   ;;  %s7842_s6 = inlined_call_operand.<no memory space> [shape: f32[1,1], index: 6, kind: input, shape index: {}]   ;;  %s7843_s7 = inlined_call_operand.hbm [shape: f32[1,4096], index: 7, kind: output, shape index: {}]  }
   0x1   :  { %v12_v0 = vstv %s7842_s6 }
   0x2   :  { %13 = vst [vmem:[#allocation2] sm:$0x1] %v12_v0 }
   0x3   :  { %14 = vsyncpa [#allocation4], 0 }
   0x4   :  { %16 = vsyncpa [#allocation4 + $0x1], 0 }
   0x5   :  { %17 = vsyncpa [#allocation5], 0 }
   0x6   :  { %19 = vsyncpa [#allocation5 + $0x1], 0  ;;  %s6553_s26 = smov 0   ;;  %s6555_s27 = smov 0  }
   0x7   :  { %s6557_s28 = smov 0   ;;  %s6559_s29 = smov 0  }
   0x8 LB: > { %s6574_s6 = sadd.s32 4294967295, %s6503_s29   ;;  %s5188_s30 = sadd.s32 4294967294, %s6503_s29   ;;  %s6503_s29 = sphi %s6559_s29, %s7858_s29   ;;  %s6499_s28 = sphi %s6557_s28, %s7857_s28   ;;  %s6495_s27 = sphi %s6555_s27, %s7856_s27   ;;  %s6491_s26 = sphi %s6553_s26, %s7855_s26  }
   0x9   : > { %s6578_s8 = sadd.s32 1, %s6503_s29   ;;  %s32_s9 = sadd.s32 1, %s6499_s28 }
   0xa   : > { %s29_s10 = ssub.s32 %s6503_s29, %s6578_s8  ;;  %p39_p0 = scmp.ne.s32.totalorder %s6499_s28, %s6495_s27 }
   0xb   : > { %p30_p1 = scmp.eq.s32.totalorder %s29_s10, 0  ;;  %p40_p2 = scmp.eq.s32.totalorder %s6503_s29, 0 }
   0xc   : > { %p45_p3 = scmp.ne.s32.totalorder %s6495_s27, %s6491_s26  ;;  %p46_p4 = scmp.eq.s32.totalorder %s6574_s6, 0 }
   0xd   : > { %s6590_s11 = scalar_select %p30_p1, %s6499_s28, %s32_s9  }
   0xe   : > { %p6592_p5 = por %p40_p2, %p39_p0  ;;  %p6596_p6 = por %p46_p4, %p45_p3 }
   0xf   : > { %p195_p7 = scmp.eq.s32.totalorder %s6574_s6, 1  ;;  %p201_p8 = scmp.eq.s32.totalorder %s5188_s30, 1 }
  0x10   : > { %p5728_p10 = scmp.lt.s32.totalorder %s6503_s29, 2  ;;  %s239_s16 = sand.u32 1, %s6499_s28  }
  0x11   : > { %p6603_p11 = por %p195_p7, %p39_p0  ;;  %p6607_p12 = por %p201_p8, %p45_p3 }
  0x12   : > { %s5394_s17 = sshll.u32 %s6503_s29, 11  ;;  %s5191_s18 = sshll.u32 %s239_s16, 7 }
  0x13   : > { %s7847_s14 = scalar_select %p6603_p11, 1, 0 }
  0x14   : > { %s7848_s15 = scalar_select %p6607_p12, 1, 0 }
  0x15   : > { %s6616_s21 = scalar_lea.hbm %s7836_s0, %s5394_s17  ;;  %s243_s22 = scalar_lea.vmem [#allocation3], %s5191_s18 }
  0x16   : > { %s251_s23 = sshll.u32 %s243_s22, 4  ;;  %p6620_p13 = pnand %p5728_p10, %p6592_p5  ;;  %s6624_s23 = int_to_ptr.vmem [resolvable:$true] %s251_s23 }
  0x17   : > { %s240_s25 = scalar_lea.sflag [#allocation4], %s239_s16  ;;  %s6407_s30 = scalar_lea.hbm %s6616_s21, 2048 }
  0x18   : > { %p6408_p2 = scmp.ne.s32.totalorder %s6616_s21, %s6407_s30  ;;  %p6409_p3 = pneg %p6620_p13 }
  0x19   : > { %s6412_s12 = scalar_lea.hbm %s7836_s0, 4096  ;;  %p6413_p5 = scmp.lt.u32.totalorder %s6616_s21, %s7836_s0 }
  0x1a   : > { %p6410_p4 = pnand %p6409_p3, %p6408_p2  ;;  %p6414_p8 = scmp.lt.u32.totalorder %s6412_s12, %s6407_s30 }
  0x1b   : > { %p6416_p9 = scmp.lt.u32.totalorder %s6407_s30, %s6616_s21 }
  0x1c   : > { %p6411_p7 = pneg %p6410_p4  ;;  %p6415_p10 = por %p6414_p8, %p6413_p5 }
  0x1e   : > { %p6417_p0 = por %p6416_p9, %p6415_p10 }
  0x20   : > { %p6418_p1 = pnand %p6417_p0, %p6411_p7 }
  0x22   : > { %6421 = shalt.err (!%p6418_p1)
}
  0x23   : > { %s6422_s16 = scalar_lea.vmem %s6624_s23, 2048  ;;  %s6505_s19 = smov [#allocation3]  }
  0x24   : > { %p6423_p2 = scmp.ne.s32.totalorder %s6624_s23, %s6422_s16  ;;  %s6427_s20 = sshll.u32 %s6505_s19, 4  ;;  %s6428_s20 = int_to_ptr.vmem [resolvable:$false] %s6427_s20 }
  0x25   : > { %s6429_s22 = scalar_lea.vmem %s6428_s20, 4096  ;;  %p6430_p11 = scmp.lt.s32.totalorder %s6624_s23, %s6428_s20 }
  0x26   : > { %p6425_p4 = pnand %p6423_p2, %p6409_p3  ;;  %p6431_p5 = scmp.lt.s32.totalorder %s6429_s22, %s6422_s16 }
  0x28   : > { %p6426_p12 = pneg %p6425_p4  ;;  %p6432_p8 = por %p6431_p5, %p6430_p11 }
  0x2a   : > { %p6433_p9 = pnand %p6432_p8, %p6426_p12 }
  0x2c   : > { %6436 = shalt.err (!%p6433_p9)
}
  0x2d   : > { %5723 = dma.hbm_to_vmem [thread:$0]  (!%p6620_p13), %s6616_s21, 2048, %s6624_s23, %s240_s25  }
  0x2e   : > { %p7850_p0 = scmp.lt.s32.totalorder %s6503_s29, 3  ;;  %p7851_p1 = scmp.ge.s32.totalorder %s6503_s29, 1 }
  0x30   : > { %p257_p3 = pnand %p7851_p1, %p7850_p0 }
  0x31   : > { %s6658_s30 = sand.u32 (!%p257_p3), 1, %s6495_s27  }
  0x32   : > { %260 = sbr.rel (%p257_p3) target bundleno = 1583 (0x62f), region = 48  ;;  %s5195_s9 = sshll.u32 (!%p257_p3), %s6658_s30, 7 }
  0x33   : > { %s263_s10 = scalar_lea.sflag (!%p257_p3), [#allocation4], %s6658_s30  ;;  %s6662_s12 = scalar_lea.vmem (!%p257_p3), [#allocation3], %s5195_s9 }
  0x39   : > { %6482 = dma.done.wait (%p6596_p6), %s263_s10, 2048  }
  0x3a   : > { %6484 = vsyncadd (%p6596_p6), %s263_s10, 4294965248  ;;  %v6506_v1 = vmov 0.0   ;;  %v6507_v2 = vmov 0   ;;  %v304_v3 = vld [vmem:[%s6662_s12 + $0x8] sm:$0xff]  ;;  %v306_v4 = vld [vmem:[%s6662_s12 + $0x18] sm:$0xff]  ;;  %vm343_vm0 = vcmask 64512  }
  0x3b   : > { %420 = vmatprep.mubr.f32.mxu0 %v6506_v1  ;;  %509 = vmatprep.mubr.f32.mxu1 %v6506_v1  ;;  %v303_v5 = vld [vmem:[%s6662_s12] sm:$0xff]  ;;  %v305_v6 = vld [vmem:[%s6662_s12 + $0x10] sm:$0xff]  ;;  %v308_v8 = vld [vmem:[%s6662_s12 + $0x28] sm:$0xff]  ;;  %vm1160_vm1 = vcmask 261120   ;;  %s5196_s13 = sshll.u32 %s6658_s30, 4  ;;  %s5395_s23 = sshll.u32 %s6574_s6, 8 }
  0x3c   : > { %5765 = vset.pattern.permute.xlu0 %v6507_v2  ;;  %5766 = vset.pattern.permute.xlu1 %v6507_v2  ;;  %v6677_v7 = vld [vmem:[%s7837_s1] sm:$0xff]  ;;  %v309_v11 = vld [vmem:[%s6662_s12 + $0x30] sm:$0xff]  ;;  %v6692_v12 = vld [vmem:[%s7837_s1 + $0x8] sm:$0xff]  ;;  %s7783_s21 = scalar_lea.vmem [#allocation6], %s5196_s13  ;;  %s7791_s18 = scalar_lea.hbm %s7843_s7, %s5395_s23 }
  0x3d   : > { %356 = vmatprep.subr.mxu0 %v304_v3  ;;  %445 = vmatprep.subr.mxu1 %v306_v4  ;;  %v310_v9 = vld [vmem:[%s6662_s12 + $0x38] sm:$0xff]  ;;  %v307_v10 = vld [vmem:[%s6662_s12 + $0x20] sm:$0xff]  ;;  %v312_v13 = vld [vmem:[%s6662_s12 + $0x48] sm:$0xff]  ;;  %s5118_s24 = sshll.u32 %s7783_s21, 4  ;;  %s5104_s16 = scalar_lea.sflag [#allocation5], %s6658_s30  ;;  %s7793_s24 = int_to_ptr.vmem [resolvable:$true] %s5118_s24 }
  0x3e   : > { %357 = vmatpush1.msra.mxu0 %v303_v5  ;;  %446 = vmatpush1.msra.mxu1 %v305_v6  ;;  %v314_v14 = vld [vmem:[%s6662_s12 + $0x58] sm:$0xff]  ;;  %v321_v16 = vld [vmem:[%s7838_s2 + $0x10] sm:$0xff]  ;;  %v320_v18 = vld [vmem:[%s7838_s2 + $0x8] sm:$0xff]  ;;  %s6437_s19 = scalar_lea.vmem %s7793_s24, 256  ;;  %p7852_p11 = scmp.ne.s32.totalorder %s7847_s14, 0 }
  0x3f   : > { %5197 = vmatmul.mubr.msk.f32.vlgmr.msra.gmra.mrb[0].mxu0 %vm343_vm0, %v6677_v7  ;;  %5201 = vmatmul.mubr.msk.f32.vlgmr.msra.gmra.mrb[0].mxu1 %vm343_vm0, %v6677_v7  ;;  %v319_v15 = vld [vmem:[%s7838_s2] sm:$0xff]  ;;  %v6711_v17 = vld [vmem:[%s7837_s1 + $0x10] sm:$0xff]  ;;  %v322_v19 = vld [vmem:[%s7838_s2 + $0x18] sm:$0xff]  ;;  %p6438_p6 = scmp.ne.s32.totalorder %s7793_s24, %s6437_s19  ;;  %s6509_s6 = smov [#allocation6]  }
  0x40   : > { %426 = vmatprep.mubr.f32.mxu0 %v6506_v1  ;;  %515 = vmatprep.mubr.f32.mxu1 %v6506_v1  ;;  %v6728_v20 = vld [vmem:[%s7837_s1 + $0x18] sm:$0xff]  ;;  %v1136_v21 = vld [vmem:[%s7840_s4] sm:$0xff]  ;;  %v1137_v22 = vld [vmem:[%s7840_s4 + $0x8] sm:$0xff]  ;;  %s6441_s20 = sshll.u32 %s6509_s6, 4  ;;  %s6442_s20 = int_to_ptr.vmem [resolvable:$false] %s6441_s20 }
  0x41   : > { %534 = vmatprep.subr.mxu0 %v308_v8  ;;  %623 = vmatprep.subr.mxu1 %v310_v9  ;;  %v311_v23 = vld [vmem:[%s6662_s12 + $0x40] sm:$0xff]  ;;  %v313_v24 = vld [vmem:[%s6662_s12 + $0x50] sm:$0xff]  ;;  %v316_v25 = vld [vmem:[%s6662_s12 + $0x68] sm:$0xff]  ;;  %p6439_p12 = pnand %p6438_p6, %p7852_p11  ;;  %p6444_p7 = scmp.lt.s32.totalorder %s7793_s24, %s6442_s20 }
  0x42   : > { %535 = vmatpush1.msra.mxu0 %v307_v10  ;;  %624 = vmatpush1.msra.mxu1 %v309_v11  ;;  %v318_v26 = vld [vmem:[%s6662_s12 + $0x78] sm:$0xff]  ;;  %v1138_v27 = vld [vmem:[%s7840_s4 + $0x10] sm:$0xff]  ;;  %v5266_v30 = vld [vmem:[%s7840_s4 + $0x28] sm:$0xff] }
  0x43   : > { %5198 = vmatmul.mubr.msk.f32.gmra.mrb[2].mxu0 %vm343_vm0, %v6692_v12  ;;  %5202 = vmatmul.mubr.msk.f32.gmra.mrb[2].mxu1 %vm343_vm0, %v6692_v12  ;;  %v1139_v28 = vld [vmem:[%s7840_s4 + $0x18] sm:$0xff]  ;;  %v5265_v29 = vld [vmem:[%s7840_s4 + $0x20] sm:$0xff]  ;;  %v5267_v31 = vld [vmem:[%s7840_s4 + $0x30] sm:$0xff]  ;;  %p6440_p13 = pneg %p6439_p12 }
  0x44   : > { %432 = vmatprep.mubr.f32.mxu0 %v6506_v1  ;;  %521 = vmatprep.mubr.f32.mxu1 %v6506_v1  ;;  %v5268_v32 = vld [vmem:[%s7840_s4 + $0x38] sm:$0xff]  ;;  %v315_v33 = vld [vmem:[%s6662_s12 + $0x60] sm:$0xff]  ;;  %v5307_v37 = vld [vmem:[%s7840_s4 + $0x50] sm:$0xff] }
  0x45   : > { %712 = vmatprep.subr.mxu0 %v312_v13  ;;  %801 = vmatprep.subr.mxu1 %v314_v14  ;;  %v317_v34 = vld [vmem:[%s6662_s12 + $0x70] sm:$0xff]  ;;  %v5305_v35 = vld [vmem:[%s7840_s4 + $0x40] sm:$0xff]  ;;  %v5306_v36 = vld [vmem:[%s7840_s4 + $0x48] sm:$0xff]  ;;  %s6443_s12 = scalar_lea.vmem %s6442_s20, 512 }
  0x46   : > { %325 = vperm.xlu0 %5765, %v319_v15   ;;  %335 = vperm.xlu1 %5766, %v321_v16   ;;  %v5308_v38 = vld [vmem:[%s7840_s4 + $0x58] sm:$0xff]  ;;  %v5345_v39 = vld [vmem:[%s7840_s4 + $0x60] sm:$0xff]  ;;  %v5346_v40 = vld [vmem:[%s7840_s4 + $0x68] sm:$0xff]  ;;  %p6445_p10 = scmp.lt.s32.totalorder %s6443_s12, %s6437_s19 }
  0x47   : > { %5199 = vmatmul.mubr.msk.f32.gmra.mrb[4].mxu0 %vm343_vm0, %v6711_v17  ;;  %5203 = vmatmul.mubr.msk.f32.gmra.mrb[4].mxu1 %vm343_vm0, %v6711_v17  ;;  %v5347_v41 = vld [vmem:[%s7840_s4 + $0x70] sm:$0xff]  ;;  %v5348_v42 = vld [vmem:[%s7840_s4 + $0x78] sm:$0xff]  ;;  %v4404_v43 = vld [vmem:[#allocation2] sm:$0x1] }
  0x48   : > { %438 = vmatprep.mubr.f32.mxu0 %v6506_v1  ;;  %527 = vmatprep.mubr.f32.mxu1 %v6506_v1  ;;  %p6446_p2 = por %p6445_p10, %p6444_p7 }
  0x4a   : > { %330 = vperm.xlu0 %5765, %v320_v18   ;;  %340 = vperm.xlu1 %5766, %v322_v19   ;;  %p6447_p4 = pnand %p6446_p2, %p6440_p13 }
  0x4b   : > { %5200 = vmatmul.mubr.msk.f32.gmra.mrb[6].mxu0 %vm343_vm0, %v6728_v20  ;;  %5204 = vmatmul.mubr.msk.f32.gmra.mrb[6].mxu1 %vm343_vm0, %v6728_v20 }
  0x4c   : > { %598 = vmatprep.mubr.f32.mxu0 %v6506_v1  ;;  %687 = vmatprep.mubr.f32.mxu1 %v6506_v1 }
  0x4e   : > { %1142 = vperm.xlu0 %5765, %v1136_v21   ;;  %1147 = vperm.xlu1 %5766, %v1137_v22  }
  0x4f   : > { %5205 = vmatmul.mubr.msk.f32.vlgmr.msra.gmra.mrb[8].mxu0 %vm343_vm0, %v6677_v7  ;;  %5209 = vmatmul.mubr.msk.f32.vlgmr.msra.gmra.mrb[8].mxu1 %vm343_vm0, %v6677_v7 }
  0x50   : > { %604 = vmatprep.mubr.f32.mxu0 %v6506_v1  ;;  %693 = vmatprep.mubr.f32.mxu1 %v6506_v1 }
  0x51   : > { %713 = vmatpush1.msra.mxu0 %v311_v23  ;;  %802 = vmatpush1.msra.mxu1 %v313_v24 }
  0x52   : > { %890 = vmatprep.subr.mxu0 %v316_v25  ;;  %979 = vmatprep.subr.mxu1 %v318_v26 }
  0x53   : > { %5206 = vmatmul.mubr.msk.f32.gmra.mrb[10].mxu0 %vm343_vm0, %v6692_v12  ;;  %5210 = vmatmul.mubr.msk.f32.gmra.mrb[10].mxu1 %vm343_vm0, %v6692_v12 }
  0x54   : > { %610 = vmatprep.mubr.f32.mxu0 %v6506_v1  ;;  %699 = vmatprep.mubr.f32.mxu1 %v6506_v1 }
  0x55   : > { %1152 = vperm.xlu0 %5765, %v1138_v27   ;;  %1157 = vperm.xlu1 %5766, %v1139_v28  }
  0x57   : > { %5207 = vmatmul.mubr.msk.f32.gmra.mrb[12].mxu0 %vm343_vm0, %v6711_v17  ;;  %5211 = vmatmul.mubr.msk.f32.gmra.mrb[12].mxu1 %vm343_vm0, %v6711_v17 }
  0x58   : > { %616 = vmatprep.mubr.f32.mxu0 %v6506_v1  ;;  %705 = vmatprep.mubr.f32.mxu1 %v6506_v1 }
  0x59   : > { %1961 = vperm.xlu0 %5765, %v5265_v29   ;;  %1966 = vperm.xlu1 %5766, %v5266_v30  }
  0x5b   : > { %5208 = vmatmul.mubr.msk.f32.gmra.mrb[14].mxu0 %vm343_vm0, %v6728_v20  ;;  %5212 = vmatmul.mubr.msk.f32.gmra.mrb[14].mxu1 %vm343_vm0, %v6728_v20 }
  0x5c   : > { %776 = vmatprep.mubr.f32.mxu0 %v6506_v1  ;;  %865 = vmatprep.mubr.f32.mxu1 %v6506_v1 }
  0x5d   : > { %1971 = vperm.xlu0 %5765, %v5267_v31   ;;  %1976 = vperm.xlu1 %5766, %v5268_v32  }
  0x5f   : > { %5213 = vmatmul.mubr.msk.f32.vlgmr.msra.gmra.mrb[16].mxu0 %vm343_vm0, %v6677_v7  ;;  %5217 = vmatmul.mubr.msk.f32.vlgmr.msra.gmra.mrb[16].mxu1 %vm343_vm0, %v6677_v7 }
  0x60   : > { %782 = vmatprep.mubr.f32.mxu0 %v6506_v1  ;;  %871 = vmatprep.mubr.f32.mxu1 %v6506_v1 }
  0x61   : > { %891 = vmatpush1.msra.mxu0 %v315_v33  ;;  %980 = vmatpush1.msra.mxu1 %v317_v34 }
  0x62   : > { %2779 = vperm.xlu0 %5765, %v5305_v35   ;;  %2784 = vperm.xlu1 %5766, %v5306_v36  }
  0x63   : > { %5214 = vmatmul.mubr.msk.f32.gmra.mrb[18].mxu0 %vm343_vm0, %v6692_v12  ;;  %5218 = vmatmul.mubr.msk.f32.gmra.mrb[18].mxu1 %vm343_vm0, %v6692_v12 }
  0x64   : > { %788 = vmatprep.mubr.f32.mxu0 %v6506_v1  ;;  %877 = vmatprep.mubr.f32.mxu1 %v6506_v1 }
  0x66   : > { %2789 = vperm.xlu0 %5765, %v5307_v37   ;;  %2794 = vperm.xlu1 %5766, %v5308_v38  }
  0x67   : > { %5215 = vmatmul.mubr.msk.f32.gmra.mrb[20].mxu0 %vm343_vm0, %v6711_v17  ;;  %5219 = vmatmul.mubr.msk.f32.gmra.mrb[20].mxu1 %vm343_vm0, %v6711_v17 }
  0x68   : > { %794 = vmatprep.mubr.f32.mxu0 %v6506_v1  ;;  %883 = vmatprep.mubr.f32.mxu1 %v6506_v1 }
  0x6a   : > { %3597 = vperm.xlu0 %5765, %v5345_v39   ;;  %3602 = vperm.xlu1 %5766, %v5346_v40  }
  0x6b   : > { %5216 = vmatmul.mubr.msk.f32.gmra.mrb[22].mxu0 %vm343_vm0, %v6728_v20  ;;  %5220 = vmatmul.mubr.msk.f32.gmra.mrb[22].mxu1 %vm343_vm0, %v6728_v20 }
  0x6c   : > { %954 = vmatprep.mubr.f32.mxu0 %v6506_v1  ;;  %1043 = vmatprep.mubr.f32.mxu1 %v6506_v1 }
  0x6e   : > { %3607 = vperm.xlu0 %5765, %v5347_v41   ;;  %3612 = vperm.xlu1 %5766, %v5348_v42  }
  0x6f   : > { %5221 = vmatmul.mubr.msk.f32.vlgmr.msra.gmra.mrb[24].mxu0 %vm343_vm0, %v6677_v7  ;;  %5225 = vmatmul.mubr.msk.f32.vlgmr.msra.gmra.mrb[24].mxu1 %vm343_vm0, %v6677_v7 }
  0x70   : > { %960 = vmatprep.mubr.f32.mxu0 %v6506_v1  ;;  %1049 = vmatprep.mubr.f32.mxu1 %v6506_v1 }
  0x72   : > { %4407 = vperm.xlu0 %5765, %v4404_v43  }
  0x73   : > { %5222 = vmatmul.mubr.msk.f32.gmra.mrb[26].mxu0 %vm343_vm0, %v6692_v12  ;;  %5226 = vmatmul.mubr.msk.f32.gmra.mrb[26].mxu1 %vm343_vm0, %v6692_v12 }
  0x74   : > { %966 = vmatprep.mubr.f32.mxu0 %v6506_v1  ;;  %1055 = vmatprep.mubr.f32.mxu1 %v6506_v1 }
  0x77   : > { %5223 = vmatmul.mubr.msk.f32.gmra.mrb[28].mxu0 %vm343_vm0, %v6711_v17  ;;  %5227 = vmatmul.mubr.msk.f32.gmra.mrb[28].mxu1 %vm343_vm0, %v6711_v17 }
  0x78   : > { %972 = vmatprep.mubr.f32.mxu0 %v6506_v1  ;;  %1061 = vmatprep.mubr.f32.mxu1 %v6506_v1 }
  0x7b   : > { %5224 = vmatmul.mubr.msk.f32.gmra.mrb[30].mxu0 %vm343_vm0, %v6728_v20  ;;  %5228 = vmatmul.mubr.msk.f32.gmra.mrb[30].mxu1 %vm343_vm0, %v6728_v20 }
  0x7c   : > { %1237 = vmatprep.mubr.f32.mxu0 %v6506_v1  ;;  %1326 = vmatprep.mubr.f32.mxu1 %v6506_v1 }
  0xc5   : > { %v6862_v44 = vpop.permute.xlu0 %325  ;;  %v6870_v54 = vpop.permute.xlu1 %335 }
  0xc9   : > { %v6868_v53 = vpop.permute.xlu0 %330  ;;  %v6880_v8 = vpop.permute.xlu1 %340 }
 0x112   : > { %v422_v45 = vpop.f32.mrb[0].mxu0  ;;  %v511_v46 = vpop.f32.mrb[0].mxu1 }
 0x113   : > { %v423_v47 = vadd.f32 %v422_v45, %v6862_v44  ;;  %v512_v48 = vadd.f32 %v511_v46, %v6862_v44  ;;  %v424_v49 = vpop.f32.mrb[1].mxu0  ;;  %v513_v50 = vpop.f32.mrb[1].mxu1 }
 0x114   : > { %v425_v51 = vadd.f32 %v424_v49, %v6862_v44  ;;  %v514_v52 = vadd.f32 %v513_v50, %v6862_v44 }
 0x115   : > { %5767 = vtanh.f32 %v423_v47 }
 0x116   : > { %5769 = vtanh.f32 %v512_v48  ;;  %v428_v55 = vpop.f32.mrb[2].mxu0  ;;  %v517_v56 = vpop.f32.mrb[2].mxu1 }
 0x117   : > { %5771 = vtanh.f32 %v425_v51  ;;  %v429_v57 = vadd.f32 %v428_v55, %v6868_v53  ;;  %v518_v58 = vadd.f32 %v517_v56, %v6868_v53  ;;  %v430_v59 = vpop.f32.mrb[3].mxu0  ;;  %v519_v60 = vpop.f32.mrb[3].mxu1 }
 0x118   : > { %5773 = vtanh.f32 %v514_v52  ;;  %v431_v61 = vadd.f32 %v430_v59, %v6868_v53  ;;  %v520_v62 = vadd.f32 %v519_v60, %v6868_v53 }
 0x119   : > { %5775 = vtanh.f32 %v429_v57 }
 0x11a   : > { %5777 = vtanh.f32 %v518_v58  ;;  %v434_v63 = vpop.f32.mrb[4].mxu0  ;;  %v523_v0 = vpop.f32.mrb[4].mxu1 }
 0x11b   : > { %5779 = vtanh.f32 %v431_v61  ;;  %v435_v2 = vadd.f32 %v434_v63, %v6870_v54  ;;  %v524_v3 = vadd.f32 %v523_v0, %v6870_v54  ;;  %v436_v4 = vpop.f32.mrb[5].mxu0  ;;  %v525_v5 = vpop.f32.mrb[5].mxu1 }
 0x11c   : > { %5781 = vtanh.f32 %v520_v62  ;;  %v437_v6 = vadd.f32 %v436_v4, %v6870_v54  ;;  %v526_v7 = vadd.f32 %v525_v5, %v6870_v54 }
 0x11d   : > { %5783 = vtanh.f32 %v435_v2 }
 0x11e   : > { %5785 = vtanh.f32 %v524_v3  ;;  %v440_v9 = vpop.f32.mrb[6].mxu0  ;;  %v529_v10 = vpop.f32.mrb[6].mxu1 }
 0x11f   : > { %v5768_v11 = vpop.eup %5767  ;;  %5787 = vtanh.f32 %v437_v6  ;;  %v441_v12 = vadd.f32 %v440_v9, %v6880_v8  ;;  %v530_v13 = vadd.f32 %v529_v10, %v6880_v8  ;;  %v442_v14 = vpop.f32.mrb[7].mxu0 }
 0x120   : > { %v531_v15 = vpop.f32.mrb[7].mxu1  ;;  %v5770_v16 = vpop.eup %5769  ;;  %5789 = vtanh.f32 %v526_v7  ;;  %v443_v17 = vadd.f32 %v442_v14, %v6880_v8 }
 0x121   : > { %v532_v18 = vadd.f32 %v531_v15, %v6880_v8  ;;  %v5772_v19 = vpop.eup %5771  ;;  %5791 = vtanh.f32 %v441_v12 }
 0x122   : > { %v5774_v20 = vpop.eup %5773  ;;  %5793 = vtanh.f32 %v530_v13  ;;  %v600_v21 = vpop.f32.mrb[8].mxu0 }
 0x123   : > { %v689_v22 = vpop.f32.mrb[8].mxu1  ;;  %v5776_v23 = vpop.eup %5775  ;;  %5795 = vtanh.f32 %v443_v17  ;;  %v601_v24 = vadd.f32 %v600_v21, %v6862_v44  ;;  %v6907_v17 = vld [vmem:[%s7839_s3] sm:$0xff] }
 0x124   : > { %v690_v25 = vadd.f32 %v689_v22, %v6862_v44  ;;  %v602_v26 = vpop.f32.mrb[9].mxu0  ;;  %v691_v27 = vpop.f32.mrb[9].mxu1  ;;  %5797 = vtanh.f32 %v532_v18  ;;  %v5398_v31 = vpack.c.bf16 %v5776_v23, %v5768_v11 }
 0x125   : > { %v5778_v28 = vpop.eup %5777  ;;  %v603_v29 = vadd.f32 %v602_v26, %v6862_v44  ;;  %v692_v30 = vadd.f32 %v691_v27, %v6862_v44  ;;  %5799 = vtanh.f32 %v601_v24 }
 0x126   : > { %v5780_v32 = vpop.eup %5779  ;;  %v5406_v33 = vpack.c.bf16 %v5778_v28, %v5770_v16  ;;  %5801 = vtanh.f32 %v690_v25  ;;  %v606_v35 = vpop.f32.mrb[10].mxu0 }
 0x127   : > { %v5782_v34 = vpop.eup %5781  ;;  %v695_v36 = vpop.f32.mrb[10].mxu1  ;;  %v5396_v37 = vpack.c.bf16 %v5780_v32, %v5772_v19  ;;  %5803 = vtanh.f32 %v603_v29  ;;  %v607_v39 = vadd.f32 %v606_v35, %v6868_v53 }
 0x128   : > { %v5784_v38 = vpop.eup %5783  ;;  %v696_v40 = vadd.f32 %v695_v36, %v6868_v53  ;;  %v608_v41 = vpop.f32.mrb[11].mxu0  ;;  %v5404_v43 = vpack.c.bf16 %v5782_v34, %v5774_v20  ;;  %5805 = vtanh.f32 %v692_v30 }
 0x129   : > { %v697_v42 = vpop.f32.mrb[11].mxu1  ;;  %v5786_v45 = vpop.eup %5785  ;;  %v609_v46 = vadd.f32 %v608_v41, %v6868_v53  ;;  %5397 = vmatprep.subr.bf16.mxu0 %v5396_v37  ;;  %5807 = vtanh.f32 %v607_v39 }
 0x12a   : > { %v698_v47 = vadd.f32 %v697_v42, %v6868_v53  ;;  %v5788_v48 = vpop.eup %5787  ;;  %5405 = vmatprep.subr.bf16.mxu1 %v5404_v43  ;;  %5399 = vmatpush1.bf16.msra.mxu0 %v5398_v31  ;;  %5809 = vtanh.f32 %v696_v40  ;;  %v612_v50 = vpop.f32.mrb[12].mxu0  ;;  %v6922_v31 = vld [vmem:[%s7839_s3 + $0x8] sm:$0xff] }
 0x12b   : > { %v5790_v49 = vpop.eup %5789  ;;  %5407 = vmatpush1.bf16.msra.mxu1 %v5406_v33  ;;  %v701_v51 = vpop.f32.mrb[12].mxu1  ;;  %5811 = vtanh.f32 %v609_v46  ;;  %v613_v55 = vadd.f32 %v612_v50, %v6870_v54 }
 0x12c   : > { %v5792_v52 = vpop.eup %5791  ;;  %v702_v56 = vadd.f32 %v701_v51, %v6870_v54  ;;  %v614_v57 = vpop.f32.mrb[13].mxu0  ;;  %5813 = vtanh.f32 %v698_v47 }
 0x12d   : > { %v703_v58 = vpop.f32.mrb[13].mxu1  ;;  %v5794_v59 = vpop.eup %5793  ;;  %v615_v60 = vadd.f32 %v614_v57, %v6870_v54  ;;  %v5402_v62 = vpack.c.bf16 %v5792_v52, %v5784_v38  ;;  %5815 = vtanh.f32 %v613_v55 }
 0x12e   : > { %v704_v61 = vadd.f32 %v703_v58, %v6870_v54  ;;  %v5796_v63 = vpop.eup %5795  ;;  %v5410_v0 = vpack.c.bf16 %v5794_v59, %v5786_v45  ;;  %5817 = vtanh.f32 %v702_v56  ;;  %v618_v3 = vpop.f32.mrb[14].mxu0 }
 0x12f   : > { %v5798_v2 = vpop.eup %5797  ;;  %v707_v4 = vpop.f32.mrb[14].mxu1  ;;  %v5400_v5 = vpack.c.bf16 %v5796_v63, %v5788_v48  ;;  %5819 = vtanh.f32 %v615_v60  ;;  %v619_v7 = vadd.f32 %v618_v3, %v6880_v8  ;;  %v6940_v48 = vld [vmem:[%s7839_s3 + $0x10] sm:$0xff] }
 0x130   : > { %v6898_v6 = vpop.eup %5799  ;;  %v708_v9 = vadd.f32 %v707_v4, %v6880_v8  ;;  %v620_v10 = vpop.f32.mrb[15].mxu0  ;;  %v5408_v12 = vpack.c.bf16 %v5798_v2, %v5790_v49  ;;  %5821 = vtanh.f32 %v704_v61 }
 0x131   : > { %v709_v11 = vpop.f32.mrb[15].mxu1  ;;  %v5802_v13 = vpop.eup %5801  ;;  %v621_v14 = vadd.f32 %v620_v10, %v6880_v8  ;;  %5401 = vmatprep.subr.bf16.mxu0 %v5400_v5  ;;  %5823 = vtanh.f32 %v619_v7 }
 0x132   : > { %v710_v15 = vadd.f32 %v709_v11, %v6880_v8  ;;  %v5804_v16 = vpop.eup %5803  ;;  %5409 = vmatprep.subr.bf16.mxu1 %v5408_v12  ;;  %5403 = vmatpush1.bf16.msra.mxu0 %v5402_v62  ;;  %5825 = vtanh.f32 %v708_v9  ;;  %v778_v19 = vpop.f32.mrb[16].mxu0 }
 0x133   : > { %v5806_v18 = vpop.eup %5805  ;;  %5411 = vmatpush1.bf16.msra.mxu1 %v5410_v0  ;;  %v867_v20 = vpop.f32.mrb[16].mxu1  ;;  %5827 = vtanh.f32 %v621_v14  ;;  %v779_v22 = vadd.f32 %v778_v19, %v6862_v44  ;;  %v6957_v0 = vld [vmem:[%s7839_s3 + $0x18] sm:$0xff] }
 0x134   : > { %v5808_v21 = vpop.eup %5807  ;;  %v868_v23 = vadd.f32 %v867_v20, %v6862_v44  ;;  %v780_v24 = vpop.f32.mrb[17].mxu0  ;;  %5829 = vtanh.f32 %v710_v15 }
 0x135   : > { %v869_v25 = vpop.f32.mrb[17].mxu1  ;;  %v5810_v26 = vpop.eup %5809  ;;  %v781_v27 = vadd.f32 %v780_v24, %v6862_v44  ;;  %5229 = vmatmul.mubr.msk.f32.vlgmr.msra.gmra.mrb[32].mxu0 %vm1160_vm1, %v6907_v17  ;;  %v5414_v29 = vpack.c.bf16 %v5808_v21, %v6898_v6  ;;  %5831 = vtanh.f32 %v779_v22 }
 0x136   : > { %v870_v28 = vadd.f32 %v869_v25, %v6862_v44  ;;  %v5812_v30 = vpop.eup %5811  ;;  %5233 = vmatmul.mubr.msk.f32.vlgmr.msra.gmra.mrb[32].mxu1 %vm1160_vm1, %v6907_v17  ;;  %1243 = vmatprep.mubr.f32.mxu0 %v6506_v1  ;;  %v5422_v32 = vpack.c.bf16 %v5810_v26, %v5802_v13  ;;  %5833 = vtanh.f32 %v868_v23  ;;  %v784_v34 = vpop.f32.mrb[18].mxu0 }
 0x137   : > { %v5814_v33 = vpop.eup %5813  ;;  %v873_v35 = vpop.f32.mrb[18].mxu1  ;;  %1332 = vmatprep.mubr.f32.mxu1 %v6506_v1  ;;  %v5412_v36 = vpack.c.bf16 %v5812_v30, %v5804_v16  ;;  %5835 = vtanh.f32 %v781_v27  ;;  %v785_v38 = vadd.f32 %v784_v34, %v6868_v53 }
 0x138   : > { %v6925_v37 = vpop.eup %5815  ;;  %v874_v39 = vadd.f32 %v873_v35, %v6868_v53  ;;  %v786_v40 = vpop.f32.mrb[19].mxu0  ;;  %v5420_v42 = vpack.c.bf16 %v5814_v33, %v5806_v18  ;;  %5837 = vtanh.f32 %v870_v28 }
 0x139   : > { %v875_v41 = vpop.f32.mrb[19].mxu1  ;;  %v6929_v43 = vpop.eup %5817  ;;  %v787_v45 = vadd.f32 %v786_v40, %v6868_v53  ;;  %5230 = vmatmul.mubr.msk.f32.gmra.mrb[34].mxu0 %vm1160_vm1, %v6922_v31  ;;  %5413 = vmatprep.subr.bf16.mxu0 %v5412_v36  ;;  %5839 = vtanh.f32 %v785_v38 }
 0x13a   : > { %v876_v46 = vadd.f32 %v875_v41, %v6868_v53  ;;  %v5820_v47 = vpop.eup %5819  ;;  %5234 = vmatmul.mubr.msk.f32.gmra.mrb[34].mxu1 %vm1160_vm1, %v6922_v31  ;;  %5421 = vmatprep.subr.bf16.mxu1 %v5420_v42  ;;  %5841 = vtanh.f32 %v874_v39  ;;  %v790_v50 = vpop.f32.mrb[20].mxu0 }
 0x13b   : > { %v5822_v49 = vpop.eup %5821  ;;  %5415 = vmatpush1.bf16.msra.mxu0 %v5414_v29  ;;  %5423 = vmatpush1.bf16.msra.mxu1 %v5422_v32  ;;  %v879_v51 = vpop.f32.mrb[20].mxu1  ;;  %5843 = vtanh.f32 %v787_v45  ;;  %v791_v55 = vadd.f32 %v790_v50, %v6870_v54 }
 0x13c   : > { %v5824_v52 = vpop.eup %5823  ;;  %v880_v56 = vadd.f32 %v879_v51, %v6870_v54  ;;  %1249 = vmatprep.mubr.f32.mxu0 %v6506_v1  ;;  %1338 = vmatprep.mubr.f32.mxu1 %v6506_v1  ;;  %v792_v57 = vpop.f32.mrb[21].mxu0  ;;  %5845 = vtanh.f32 %v876_v46 }
 0x13d   : > { %v881_v58 = vpop.f32.mrb[21].mxu1  ;;  %v5826_v59 = vpop.eup %5825  ;;  %v793_v60 = vadd.f32 %v792_v57, %v6870_v54  ;;  %5231 = vmatmul.mubr.msk.f32.gmra.mrb[36].mxu0 %vm1160_vm1, %v6940_v48  ;;  %v5418_v62 = vpack.c.bf16 %v5824_v52, %v6925_v37  ;;  %5847 = vtanh.f32 %v791_v55 }
 0x13e   : > { %v882_v61 = vadd.f32 %v881_v58, %v6870_v54  ;;  %v5828_v63 = vpop.eup %5827  ;;  %5235 = vmatmul.mubr.msk.f32.gmra.mrb[36].mxu1 %vm1160_vm1, %v6940_v48  ;;  %1255 = vmatprep.mubr.f32.mxu0 %v6506_v1  ;;  %v5426_v2 = vpack.c.bf16 %v5826_v59, %v6929_v43  ;;  %5849 = vtanh.f32 %v880_v56  ;;  %v796_v4 = vpop.f32.mrb[22].mxu0 }
 0x13f   : > { %v5830_v3 = vpop.eup %5829  ;;  %v885_v5 = vpop.f32.mrb[22].mxu1  ;;  %1344 = vmatprep.mubr.f32.mxu1 %v6506_v1  ;;  %v5416_v6 = vpack.c.bf16 %v5828_v63, %v5820_v47  ;;  %5851 = vtanh.f32 %v793_v60  ;;  %v797_v9 = vadd.f32 %v796_v4, %v6880_v8 }
 0x140   : > { %v6961_v7 = vpop.eup %5831  ;;  %v886_v10 = vadd.f32 %v885_v5, %v6880_v8  ;;  %v798_v11 = vpop.f32.mrb[23].mxu0  ;;  %v5424_v13 = vpack.c.bf16 %v5830_v3, %v5822_v49  ;;  %5853 = vtanh.f32 %v882_v61 }
 0x141   : > { %v887_v12 = vpop.f32.mrb[23].mxu1  ;;  %v6965_v14 = vpop.eup %5833  ;;  %v799_v15 = vadd.f32 %v798_v11, %v6880_v8  ;;  %5232 = vmatmul.mubr.msk.f32.gmra.mrb[38].mxu0 %vm1160_vm1, %v6957_v0  ;;  %5417 = vmatprep.subr.bf16.mxu0 %v5416_v6  ;;  %5855 = vtanh.f32 %v797_v9 }
 0x142   : > { %v888_v16 = vadd.f32 %v887_v12, %v6880_v8  ;;  %v5836_v18 = vpop.eup %5835  ;;  %5236 = vmatmul.mubr.msk.f32.gmra.mrb[38].mxu1 %vm1160_vm1, %v6957_v0  ;;  %5425 = vmatprep.subr.bf16.mxu1 %v5424_v13  ;;  %5857 = vtanh.f32 %v886_v10  ;;  %v956_v20 = vpop.f32.mrb[24].mxu0 }
 0x143   : > { %v5838_v19 = vpop.eup %5837  ;;  %5419 = vmatpush1.bf16.msra.mxu0 %v5418_v62  ;;  %5427 = vmatpush1.bf16.msra.mxu1 %v5426_v2  ;;  %v1045_v21 = vpop.f32.mrb[24].mxu1  ;;  %5859 = vtanh.f32 %v799_v15  ;;  %v957_v23 = vadd.f32 %v956_v20, %v6862_v44 }
 0x144   : > { %v5840_v22 = vpop.eup %5839  ;;  %v1046_v24 = vadd.f32 %v1045_v21, %v6862_v44  ;;  %1415 = vmatprep.mubr.f32.mxu0 %v6506_v1  ;;  %1504 = vmatprep.mubr.f32.mxu1 %v6506_v1  ;;  %v958_v25 = vpop.f32.mrb[25].mxu0  ;;  %5861 = vtanh.f32 %v888_v16 }
 0x145   : > { %v1047_v26 = vpop.f32.mrb[25].mxu1  ;;  %v5842_v27 = vpop.eup %5841  ;;  %v959_v28 = vadd.f32 %v958_v25, %v6862_v44  ;;  %v5430_v30 = vpack.c.bf16 %v5840_v22, %v6961_v7  ;;  %5863 = vtanh.f32 %v957_v23 }
 0x146   : > { %v1048_v29 = vadd.f32 %v1047_v26, %v6862_v44  ;;  %v5844_v32 = vpop.eup %5843  ;;  %5237 = vmatmul.mubr.msk.f32.vlgmr.msra.gmra.mrb[40].mxu0 %vm1160_vm1, %v6907_v17  ;;  %5241 = vmatmul.mubr.msk.f32.vlgmr.msra.gmra.mrb[40].mxu1 %vm1160_vm1, %v6907_v17  ;;  %v5438_v33 = vpack.c.bf16 %v5842_v27, %v6965_v14  ;;  %5865 = vtanh.f32 %v1046_v24  ;;  %v962_v35 = vpop.f32.mrb[26].mxu0 }
 0x147   : > { %v5846_v34 = vpop.eup %5845  ;;  %v1051_v36 = vpop.f32.mrb[26].mxu1  ;;  %1421 = vmatprep.mubr.f32.mxu0 %v6506_v1  ;;  %1510 = vmatprep.mubr.f32.mxu1 %v6506_v1  ;;  %v5428_v44 = vpack.c.bf16 %v5844_v32, %v5836_v18  ;;  %5867 = vtanh.f32 %v959_v28  ;;  %v963_v38 = vadd.f32 %v962_v35, %v6868_v53 }
 0x148   : > { %v6987_v37 = vpop.eup %5847  ;;  %v1052_v39 = vadd.f32 %v1051_v36, %v6868_v53  ;;  %v964_v40 = vpop.f32.mrb[27].mxu0  ;;  %v5436_v42 = vpack.c.bf16 %v5846_v34, %v5838_v19  ;;  %5869 = vtanh.f32 %v1048_v29 }
 0x149   : > { %v1053_v41 = vpop.f32.mrb[27].mxu1  ;;  %v6991_v43 = vpop.eup %5849  ;;  %v965_v45 = vadd.f32 %v964_v40, %v6868_v53  ;;  %5429 = vmatprep.subr.bf16.mxu0 %v5428_v44  ;;  %5871 = vtanh.f32 %v963_v38 }
 0x14a   : > { %v1054_v46 = vadd.f32 %v1053_v41, %v6868_v53  ;;  %v5852_v47 = vpop.eup %5851  ;;  %5238 = vmatmul.mubr.msk.f32.gmra.mrb[42].mxu0 %vm1160_vm1, %v6922_v31  ;;  %5242 = vmatmul.mubr.msk.f32.gmra.mrb[42].mxu1 %vm1160_vm1, %v6922_v31  ;;  %5873 = vtanh.f32 %v1052_v39  ;;  %v968_v50 = vpop.f32.mrb[28].mxu0 }
 0x14b   : > { %v5854_v49 = vpop.eup %5853  ;;  %5437 = vmatprep.subr.bf16.mxu1 %v5436_v42  ;;  %5431 = vmatpush1.bf16.msra.mxu0 %v5430_v30  ;;  %v1057_v51 = vpop.f32.mrb[28].mxu1  ;;  %5875 = vtanh.f32 %v965_v45  ;;  %v969_v53 = vadd.f32 %v968_v50, %v6870_v54 }
 0x14c   : > { %v5856_v52 = vpop.eup %5855  ;;  %5439 = vmatpush1.bf16.msra.mxu1 %v5438_v33  ;;  %v1058_v55 = vadd.f32 %v1057_v51, %v6870_v54  ;;  %1427 = vmatprep.mubr.f32.mxu0 %v6506_v1  ;;  %v970_v56 = vpop.f32.mrb[29].mxu0  ;;  %5877 = vtanh.f32 %v1054_v46 }
 0x14d   : > { %v1059_v57 = vpop.f32.mrb[29].mxu1  ;;  %v5858_v58 = vpop.eup %5857  ;;  %1516 = vmatprep.mubr.f32.mxu1 %v6506_v1  ;;  %v971_v59 = vadd.f32 %v970_v56, %v6870_v54  ;;  %v5434_v61 = vpack.c.bf16 %v5856_v52, %v6987_v37  ;;  %5879 = vtanh.f32 %v969_v53 }
 0x14e   : > { %v1060_v60 = vadd.f32 %v1059_v57, %v6870_v54  ;;  %v5860_v62 = vpop.eup %5859  ;;  %5239 = vmatmul.mubr.msk.f32.gmra.mrb[44].mxu0 %vm1160_vm1, %v6940_v48  ;;  %5243 = vmatmul.mubr.msk.f32.gmra.mrb[44].mxu1 %vm1160_vm1, %v6940_v48  ;;  %v5442_v63 = vpack.c.bf16 %v5858_v58, %v6991_v43  ;;  %5881 = vtanh.f32 %v1058_v55  ;;  %v974_v3 = vpop.f32.mrb[30].mxu0 }
 0x14f   : > { %v5862_v2 = vpop.eup %5861  ;;  %v1063_v4 = vpop.f32.mrb[30].mxu1  ;;  %1433 = vmatprep.mubr.f32.mxu0 %v6506_v1  ;;  %1522 = vmatprep.mubr.f32.mxu1 %v6506_v1  ;;  %v5432_v54 = vpack.c.bf16 %v5860_v62, %v5852_v47  ;;  %5883 = vtanh.f32 %v971_v59  ;;  %v975_v6 = vadd.f32 %v974_v3, %v6880_v8 }
 0x150   : > { %v5864_v5 = vpop.eup %5863  ;;  %v1064_v7 = vadd.f32 %v1063_v4, %v6880_v8  ;;  %v976_v9 = vpop.f32.mrb[31].mxu0  ;;  %v5440_v11 = vpack.c.bf16 %v5862_v2, %v5854_v49  ;;  %5885 = vtanh.f32 %v1060_v60 }
 0x151   : > { %v1065_v10 = vpop.f32.mrb[31].mxu1  ;;  %v5866_v12 = vpop.eup %5865  ;;  %v977_v13 = vadd.f32 %v976_v9, %v6880_v8  ;;  %5433 = vmatprep.subr.bf16.mxu0 %v5432_v54  ;;  %5887 = vtanh.f32 %v975_v6 }
 0x152   : > { %v1066_v14 = vadd.f32 %v1065_v10, %v6880_v8  ;;  %v5868_v15 = vpop.eup %5867  ;;  %5240 = vmatmul.mubr.msk.f32.gmra.mrb[46].mxu0 %vm1160_vm1, %v6957_v0  ;;  %5244 = vmatmul.mubr.msk.f32.gmra.mrb[46].mxu1 %vm1160_vm1, %v6957_v0  ;;  %5889 = vtanh.f32 %v1064_v7 }
 0x153   : > { %v5870_v16 = vpop.eup %5869  ;;  %5441 = vmatprep.subr.bf16.mxu1 %v5440_v11  ;;  %5435 = vmatpush1.bf16.msra.mxu0 %v5434_v61  ;;  %5891 = vtanh.f32 %v977_v13 }
 0x154   : > { %v5872_v18 = vpop.eup %5871  ;;  %5443 = vmatpush1.bf16.msra.mxu1 %v5442_v63  ;;  %1593 = vmatprep.mubr.f32.mxu0 %v6506_v1  ;;  %5893 = vtanh.f32 %v1066_v14 }
 0x155   : > { %v5874_v19 = vpop.eup %5873  ;;  %1682 = vmatprep.mubr.f32.mxu1 %v6506_v1  ;;  %v5446_v8 = vpack.c.bf16 %v5872_v18, %v5864_v5 }
 0x156   : > { %v5876_v20 = vpop.eup %5875  ;;  %5245 = vmatmul.mubr.msk.f32.vlgmr.msra.gmra.mrb[48].mxu0 %vm1160_vm1, %v6907_v17  ;;  %v5454_v21 = vpack.c.bf16 %v5874_v19, %v5866_v12 }
 0x157   : > { %v5878_v22 = vpop.eup %5877  ;;  %5249 = vmatmul.mubr.msk.f32.vlgmr.msra.gmra.mrb[48].mxu1 %vm1160_vm1, %v6907_v17  ;;  %1599 = vmatprep.mubr.f32.mxu0 %v6506_v1  ;;  %v5444_v23 = vpack.c.bf16 %v5876_v20, %v5868_v15 }
 0x158   : > { %v5880_v24 = vpop.eup %5879  ;;  %1688 = vmatprep.mubr.f32.mxu1 %v6506_v1  ;;  %v5452_v25 = vpack.c.bf16 %v5878_v22, %v5870_v16 }
 0x159   : > { %v5882_v26 = vpop.eup %5881  ;;  %5445 = vmatprep.subr.bf16.mxu0 %v5444_v23 }
 0x15a   : > { %v5884_v27 = vpop.eup %5883  ;;  %5246 = vmatmul.mubr.msk.f32.gmra.mrb[50].mxu0 %vm1160_vm1, %v6922_v31  ;;  %5453 = vmatprep.subr.bf16.mxu1 %v5452_v25 }
 0x15b   : > { %v5886_v28 = vpop.eup %5885  ;;  %5250 = vmatmul.mubr.msk.f32.gmra.mrb[50].mxu1 %vm1160_vm1, %v6922_v31  ;;  %5447 = vmatpush1.bf16.msra.mxu0 %v5446_v8 }
 0x15c   : > { %v5888_v29 = vpop.eup %5887  ;;  %5455 = vmatpush1.bf16.msra.mxu1 %v5454_v21  ;;  %1605 = vmatprep.mubr.f32.mxu0 %v6506_v1 }
 0x15d   : > { %v5890_v30 = vpop.eup %5889  ;;  %1694 = vmatprep.mubr.f32.mxu1 %v6506_v1  ;;  %v5450_v32 = vpack.c.bf16 %v5888_v29, %v5880_v24 }
 0x15e   : > { %v5892_v33 = vpop.eup %5891  ;;  %5247 = vmatmul.mubr.msk.f32.gmra.mrb[52].mxu0 %vm1160_vm1, %v6940_v48  ;;  %v5458_v34 = vpack.c.bf16 %v5890_v30, %v5882_v26 }
 0x15f   : > { %v5894_v35 = vpop.eup %5893  ;;  %5251 = vmatmul.mubr.msk.f32.gmra.mrb[52].mxu1 %vm1160_vm1, %v6940_v48  ;;  %1611 = vmatprep.mubr.f32.mxu0 %v6506_v1  ;;  %v5448_v36 = vpack.c.bf16 %v5892_v33, %v5884_v27 }
 0x160   : > { %1700 = vmatprep.mubr.f32.mxu1 %v6506_v1  ;;  %v5456_v44 = vpack.c.bf16 %v5894_v35, %v5886_v28 }
 0x161   : > { %5449 = vmatprep.subr.bf16.mxu0 %v5448_v36 }
 0x162   : > { %5248 = vmatmul.mubr.msk.f32.gmra.mrb[54].mxu0 %vm1160_vm1, %v6957_v0  ;;  %5457 = vmatprep.subr.bf16.mxu1 %v5456_v44 }
 0x163   : > { %5252 = vmatmul.mubr.msk.f32.gmra.mrb[54].mxu1 %vm1160_vm1, %v6957_v0  ;;  %5451 = vmatpush1.bf16.msra.mxu0 %v5450_v32 }
 0x164   : > { %5459 = vmatpush1.bf16.msra.mxu1 %v5458_v34  ;;  %1771 = vmatprep.mubr.f32.mxu0 %v6506_v1 }
 0x165   : > { %1860 = vmatprep.mubr.f32.mxu1 %v6506_v1 }
 0x166   : > { %5253 = vmatmul.mubr.msk.f32.vlgmr.msra.gmra.mrb[56].mxu0 %vm1160_vm1, %v6907_v17 }
 0x167   : > { %5257 = vmatmul.mubr.msk.f32.vlgmr.msra.gmra.mrb[56].mxu1 %vm1160_vm1, %v6907_v17  ;;  %1777 = vmatprep.mubr.f32.mxu0 %v6506_v1  ;;  %v7071_v17 = vpop.permute.xlu0 %1142 }
 0x168   : > { %1866 = vmatprep.mubr.f32.mxu1 %v6506_v1 }
 0x16a   : > { %5254 = vmatmul.mubr.msk.f32.gmra.mrb[58].mxu0 %vm1160_vm1, %v6922_v31 }
 0x16b   : > { %5258 = vmatmul.mubr.msk.f32.gmra.mrb[58].mxu1 %vm1160_vm1, %v6922_v31  ;;  %1783 = vmatprep.mubr.f32.mxu0 %v6506_v1  ;;  %v7083_v53 = vpop.permute.xlu0 %1152 }
 0x16c   : > { %1872 = vmatprep.mubr.f32.mxu1 %v6506_v1 }
 0x16e   : > { %5255 = vmatmul.mubr.msk.f32.gmra.mrb[60].mxu0 %vm1160_vm1, %v6940_v48 }
 0x16f   : > { %5259 = vmatmul.mubr.msk.f32.gmra.mrb[60].mxu1 %vm1160_vm1, %v6940_v48  ;;  %1789 = vmatprep.mubr.f32.mxu0 %v6506_v1 }
 0x170   : > { %1878 = vmatprep.mubr.f32.mxu1 %v6506_v1 }
 0x172   : > { %5256 = vmatmul.mubr.msk.f32.gmra.mrb[62].mxu0 %vm1160_vm1, %v6957_v0 }
 0x173   : > { %5260 = vmatmul.mubr.msk.f32.gmra.mrb[62].mxu1 %vm1160_vm1, %v6957_v0  ;;  %2055 = vmatprep.mubr.f32.mxu0 %v6506_v1  ;;  %v7077_v0 = vpop.permute.xlu1 %1147 }
 0x174   : > { %2144 = vmatprep.mubr.f32.mxu1 %v6506_v1 }
 0x177   : > { %v7089_v63 = vpop.permute.xlu1 %1157 }
 0x208   : > { %v1239_v31 = vpop.f32.mrb[32].mxu0 }
 0x209   : > { %v1240_v37 = vadd.f32 %v1239_v31, %v7071_v17  ;;  %v1328_v48 = vpop.f32.mrb[32].mxu1  ;;  %v1241_v38 = vpop.f32.mrb[33].mxu0 }
 0x20a   : > { %v1329_v39 = vadd.f32 %v1328_v48, %v7071_v17  ;;  %v1242_v40 = vadd.f32 %v1241_v38, %v7071_v17  ;;  %v1330_v41 = vpop.f32.mrb[33].mxu1 }
 0x20b   : > { %5895 = vtanh.f32 %v1240_v37  ;;  %v1331_v42 = vadd.f32 %v1330_v41, %v7071_v17 }
 0x20c   : > { %5897 = vtanh.f32 %v1329_v39  ;;  %v1245_v43 = vpop.f32.mrb[34].mxu0 }
 0x20d   : > { %5899 = vtanh.f32 %v1242_v40  ;;  %v1246_v45 = vadd.f32 %v1245_v43, %v7077_v0  ;;  %v1334_v46 = vpop.f32.mrb[34].mxu1  ;;  %v1247_v47 = vpop.f32.mrb[35].mxu0 }
 0x20e   : > { %5901 = vtanh.f32 %v1331_v42  ;;  %v1335_v49 = vadd.f32 %v1334_v46, %v7077_v0  ;;  %v1248_v50 = vadd.f32 %v1247_v47, %v7077_v0  ;;  %v1336_v51 = vpop.f32.mrb[35].mxu1 }
 0x20f   : > { %5903 = vtanh.f32 %v1246_v45  ;;  %v1337_v52 = vadd.f32 %v1336_v51, %v7077_v0 }
 0x210   : > { %5905 = vtanh.f32 %v1335_v49  ;;  %v1251_v55 = vpop.f32.mrb[36].mxu0 }
 0x211   : > { %5907 = vtanh.f32 %v1248_v50  ;;  %v1252_v56 = vadd.f32 %v1251_v55, %v7083_v53  ;;  %v1340_v57 = vpop.f32.mrb[36].mxu1  ;;  %v1253_v58 = vpop.f32.mrb[37].mxu0 }
 0x212   : > { %5909 = vtanh.f32 %v1337_v52  ;;  %v1341_v59 = vadd.f32 %v1340_v57, %v7083_v53  ;;  %v1254_v60 = vadd.f32 %v1253_v58, %v7083_v53  ;;  %v1342_v61 = vpop.f32.mrb[37].mxu1 }
 0x213   : > { %5911 = vtanh.f32 %v1252_v56  ;;  %v1343_v62 = vadd.f32 %v1342_v61, %v7083_v53 }
 0x214   : > { %5913 = vtanh.f32 %v1341_v59  ;;  %v1257_v2 = vpop.f32.mrb[38].mxu0 }
 0x215   : > { %v5896_v3 = vpop.eup %5895  ;;  %5915 = vtanh.f32 %v1254_v60  ;;  %v1258_v4 = vadd.f32 %v1257_v2, %v7089_v63  ;;  %v1346_v54 = vpop.f32.mrb[38].mxu1 }
 0x216   : > { %v1259_v5 = vpop.f32.mrb[39].mxu0  ;;  %v5898_v6 = vpop.eup %5897  ;;  %5917 = vtanh.f32 %v1343_v62  ;;  %v1347_v7 = vadd.f32 %v1346_v54, %v7089_v63 }
 0x217   : > { %v1260_v9 = vadd.f32 %v1259_v5, %v7089_v63  ;;  %v1348_v10 = vpop.f32.mrb[39].mxu1  ;;  %v5900_v11 = vpop.eup %5899  ;;  %5919 = vtanh.f32 %v1258_v4 }
 0x218   : > { %v1349_v12 = vadd.f32 %v1348_v10, %v7089_v63  ;;  %v5902_v13 = vpop.eup %5901  ;;  %5921 = vtanh.f32 %v1347_v7 }
 0x219   : > { %v5904_v14 = vpop.eup %5903  ;;  %5923 = vtanh.f32 %v1260_v9  ;;  %v1417_v15 = vpop.f32.mrb[40].mxu0  ;;  %v7116_v9 = vld [vmem:[%s7839_s3 + $0x20] sm:$0xff] }
 0x21a   : > { %v1506_v16 = vpop.f32.mrb[40].mxu1  ;;  %v5906_v18 = vpop.eup %5905  ;;  %5925 = vtanh.f32 %v1349_v12  ;;  %v1418_v19 = vadd.f32 %v1417_v15, %v7071_v17  ;;  %v5462_v22 = vpack.c.bf16 %v5904_v14, %v5896_v3 }
 0x21b   : > { %v1507_v8 = vadd.f32 %v1506_v16, %v7071_v17  ;;  %v1419_v20 = vpop.f32.mrb[41].mxu0  ;;  %v1508_v21 = vpop.f32.mrb[41].mxu1  ;;  %v5470_v26 = vpack.c.bf16 %v5906_v18, %v5898_v6 }
 0x21c   : > { %v5908_v23 = vpop.eup %5907  ;;  %v1420_v24 = vadd.f32 %v1419_v20, %v7071_v17  ;;  %v1509_v25 = vadd.f32 %v1508_v21, %v7071_v17  ;;  %5927 = vtanh.f32 %v1418_v19  ;;  %v7129_v21 = vld [vmem:[%s7839_s3 + $0x28] sm:$0xff] }
 0x21d   : > { %v5910_v27 = vpop.eup %5909  ;;  %v5460_v28 = vpack.c.bf16 %v5908_v23, %v5900_v11  ;;  %5929 = vtanh.f32 %v1507_v8  ;;  %v1423_v30 = vpop.f32.mrb[42].mxu0 }
 0x21e   : > { %v5912_v29 = vpop.eup %5911  ;;  %v1512_v32 = vpop.f32.mrb[42].mxu1  ;;  %v5468_v33 = vpack.c.bf16 %v5910_v27, %v5902_v13  ;;  %5931 = vtanh.f32 %v1420_v24  ;;  %v1424_v35 = vadd.f32 %v1423_v30, %v7077_v0 }
 0x21f   : > { %v5914_v34 = vpop.eup %5913  ;;  %v1513_v36 = vadd.f32 %v1512_v32, %v7077_v0  ;;  %v1425_v44 = vpop.f32.mrb[43].mxu0  ;;  %5461 = vmatprep.subr.bf16.mxu0 %v5460_v28  ;;  %5933 = vtanh.f32 %v1509_v25 }
 0x220   : > { %v1514_v31 = vpop.f32.mrb[43].mxu1  ;;  %v5916_v37 = vpop.eup %5915  ;;  %v1426_v48 = vadd.f32 %v1425_v44, %v7077_v0  ;;  %5469 = vmatprep.subr.bf16.mxu1 %v5468_v33  ;;  %5463 = vmatpush1.bf16.msra.mxu0 %v5462_v22  ;;  %5935 = vtanh.f32 %v1424_v35 }
 0x221   : > { %v1515_v38 = vadd.f32 %v1514_v31, %v7077_v0  ;;  %v5918_v39 = vpop.eup %5917  ;;  %5471 = vmatpush1.bf16.msra.mxu1 %v5470_v26  ;;  %5937 = vtanh.f32 %v1513_v36  ;;  %v1429_v41 = vpop.f32.mrb[44].mxu0 }
 0x222   : > { %v5920_v40 = vpop.eup %5919  ;;  %v1518_v42 = vpop.f32.mrb[44].mxu1  ;;  %5939 = vtanh.f32 %v1426_v48  ;;  %v1430_v45 = vadd.f32 %v1429_v41, %v7083_v53 }
 0x223   : > { %v5922_v43 = vpop.eup %5921  ;;  %v1519_v46 = vadd.f32 %v1518_v42, %v7083_v53  ;;  %v1431_v47 = vpop.f32.mrb[45].mxu0  ;;  %v5466_v50 = vpack.c.bf16 %v5920_v40, %v5912_v29  ;;  %5941 = vtanh.f32 %v1515_v38 }
 0x224   : > { %v1520_v49 = vpop.f32.mrb[45].mxu1  ;;  %v5924_v51 = vpop.eup %5923  ;;  %v1432_v52 = vadd.f32 %v1431_v47, %v7083_v53  ;;  %v5474_v56 = vpack.c.bf16 %v5922_v43, %v5914_v34  ;;  %5943 = vtanh.f32 %v1430_v45 }
 0x225   : > { %v1521_v55 = vadd.f32 %v1520_v49, %v7083_v53  ;;  %v5926_v57 = vpop.eup %5925  ;;  %v5464_v58 = vpack.c.bf16 %v5924_v51, %v5916_v37  ;;  %5945 = vtanh.f32 %v1519_v46  ;;  %v1435_v59 = vpop.f32.mrb[46].mxu0  ;;  %v7148_v37 = vld [vmem:[%s7839_s3 + $0x30] sm:$0xff]  ;;  %v7164_v51 = vld [vmem:[%s7839_s3 + $0x38] sm:$0xff] }
 0x226   : > { %v1524_v60 = vpop.f32.mrb[46].mxu1  ;;  %v5472_v61 = vpack.c.bf16 %v5926_v57, %v5918_v39  ;;  %v7107_v62 = vpop.eup %5927  ;;  %5947 = vtanh.f32 %v1432_v52  ;;  %v1436_v2 = vadd.f32 %v1435_v59, %v7089_v63 }
 0x227   : > { %v1525_v3 = vadd.f32 %v1524_v60, %v7089_v63  ;;  %v1437_v4 = vpop.f32.mrb[47].mxu0  ;;  %v1526_v54 = vpop.f32.mrb[47].mxu1  ;;  %5465 = vmatprep.subr.bf16.mxu0 %v5464_v58  ;;  %5949 = vtanh.f32 %v1521_v55 }
 0x228   : > { %v5930_v5 = vpop.eup %5929  ;;  %v1438_v6 = vadd.f32 %v1437_v4, %v7089_v63  ;;  %v1527_v7 = vadd.f32 %v1526_v54, %v7089_v63  ;;  %5473 = vmatprep.subr.bf16.mxu1 %v5472_v61  ;;  %5467 = vmatpush1.bf16.msra.mxu0 %v5466_v50  ;;  %5951 = vtanh.f32 %v1436_v2 }
 0x229   : > { %v5932_v10 = vpop.eup %5931  ;;  %5475 = vmatpush1.bf16.msra.mxu1 %v5474_v56  ;;  %5953 = vtanh.f32 %v1525_v3  ;;  %v1595_v12 = vpop.f32.mrb[48].mxu0 }
 0x22a   : > { %v5934_v11 = vpop.eup %5933  ;;  %5955 = vtanh.f32 %v1438_v6  ;;  %v1596_v14 = vadd.f32 %v1595_v12, %v7071_v17  ;;  %v1684_v15 = vpop.f32.mrb[48].mxu1 }
 0x22b   : > { %v5936_v13 = vpop.eup %5935  ;;  %v1597_v16 = vpop.f32.mrb[49].mxu0  ;;  %5269 = vmatmul.mubr.msk.f32.vlgmr.msra.gmra.mrb[64].mxu0 %vm1160_vm1, %v7116_v9  ;;  %5957 = vtanh.f32 %v1527_v7  ;;  %v1685_v19 = vadd.f32 %v1684_v15, %v7071_v17 }
 0x22c   : > { %v5938_v18 = vpop.eup %5937  ;;  %v1598_v8 = vadd.f32 %v1597_v16, %v7071_v17  ;;  %v1686_v20 = vpop.f32.mrb[49].mxu1  ;;  %5273 = vmatmul.mubr.msk.f32.vlgmr.msra.gmra.mrb[64].mxu1 %vm1160_vm1, %v7116_v9  ;;  %2061 = vmatprep.mubr.f32.mxu0 %v6506_v1  ;;  %v5478_v22 = vpack.c.bf16 %v5936_v13, %v7107_v62  ;;  %5959 = vtanh.f32 %v1596_v14 }
 0x22d   : > { %v5940_v23 = vpop.eup %5939  ;;  %v1687_v24 = vadd.f32 %v1686_v20, %v7071_v17  ;;  %2150 = vmatprep.mubr.f32.mxu1 %v6506_v1  ;;  %v5486_v25 = vpack.c.bf16 %v5938_v18, %v5930_v5  ;;  %5961 = vtanh.f32 %v1685_v19  ;;  %v1601_v27 = vpop.f32.mrb[50].mxu0 }
 0x22e   : > { %v5942_v26 = vpop.eup %5941  ;;  %v5476_v28 = vpack.c.bf16 %v5940_v23, %v5932_v10  ;;  %5963 = vtanh.f32 %v1598_v8  ;;  %v1602_v30 = vadd.f32 %v1601_v27, %v7077_v0  ;;  %v1690_v32 = vpop.f32.mrb[50].mxu1 }
 0x22f   : > { %v7134_v29 = vpop.eup %5943  ;;  %v1603_v33 = vpop.f32.mrb[51].mxu0  ;;  %5270 = vmatmul.mubr.msk.f32.gmra.mrb[66].mxu0 %vm1160_vm1, %v7129_v21  ;;  %v5484_v34 = vpack.c.bf16 %v5942_v26, %v5934_v11  ;;  %5965 = vtanh.f32 %v1687_v24  ;;  %v1691_v36 = vadd.f32 %v1690_v32, %v7077_v0 }
 0x230   : > { %v7139_v35 = vpop.eup %5945  ;;  %v1604_v44 = vadd.f32 %v1603_v33, %v7077_v0  ;;  %v1692_v31 = vpop.f32.mrb[51].mxu1  ;;  %5274 = vmatmul.mubr.msk.f32.gmra.mrb[66].mxu1 %vm1160_vm1, %v7129_v21  ;;  %5477 = vmatprep.subr.bf16.mxu0 %v5476_v28  ;;  %5967 = vtanh.f32 %v1602_v30 }
 0x231   : > { %v5948_v48 = vpop.eup %5947  ;;  %v1693_v38 = vadd.f32 %v1692_v31, %v7077_v0  ;;  %5485 = vmatprep.subr.bf16.mxu1 %v5484_v34  ;;  %5479 = vmatpush1.bf16.msra.mxu0 %v5478_v22  ;;  %5969 = vtanh.f32 %v1691_v36  ;;  %v1607_v40 = vpop.f32.mrb[52].mxu0 }
 0x232   : > { %v5950_v39 = vpop.eup %5949  ;;  %5487 = vmatpush1.bf16.msra.mxu1 %v5486_v25  ;;  %2067 = vmatprep.mubr.f32.mxu0 %v6506_v1  ;;  %5971 = vtanh.f32 %v1604_v44  ;;  %v1608_v42 = vadd.f32 %v1607_v40, %v7083_v53  ;;  %v1696_v43 = vpop.f32.mrb[52].mxu1 }
 0x233   : > { %v5952_v41 = vpop.eup %5951  ;;  %2156 = vmatprep.mubr.f32.mxu1 %v6506_v1  ;;  %v1609_v45 = vpop.f32.mrb[53].mxu0  ;;  %5271 = vmatmul.mubr.msk.f32.gmra.mrb[68].mxu0 %vm1160_vm1, %v7148_v37  ;;  %5973 = vtanh.f32 %v1693_v38  ;;  %v1697_v47 = vadd.f32 %v1696_v43, %v7083_v53 }
 0x234   : > { %v5954_v46 = vpop.eup %5953  ;;  %v1610_v49 = vadd.f32 %v1609_v45, %v7083_v53  ;;  %v1698_v50 = vpop.f32.mrb[53].mxu1  ;;  %5275 = vmatmul.mubr.msk.f32.gmra.mrb[68].mxu1 %vm1160_vm1, %v7148_v37  ;;  %2073 = vmatprep.mubr.f32.mxu0 %v6506_v1  ;;  %v5482_v52 = vpack.c.bf16 %v5952_v41, %v7134_v29  ;;  %5975 = vtanh.f32 %v1608_v42 }
 0x235   : > { %v5956_v55 = vpop.eup %5955  ;;  %v1699_v56 = vadd.f32 %v1698_v50, %v7083_v53  ;;  %2162 = vmatprep.mubr.f32.mxu1 %v6506_v1  ;;  %v5490_v57 = vpack.c.bf16 %v5954_v46, %v7139_v35  ;;  %5977 = vtanh.f32 %v1697_v47  ;;  %v1613_v59 = vpop.f32.mrb[54].mxu0 }
 0x236   : > { %v5958_v58 = vpop.eup %5957  ;;  %v5480_v60 = vpack.c.bf16 %v5956_v55, %v5948_v48  ;;  %5979 = vtanh.f32 %v1610_v49  ;;  %v1614_v62 = vadd.f32 %v1613_v59, %v7089_v63  ;;  %v1702_v2 = vpop.f32.mrb[54].mxu1 }
 0x237   : > { %v7170_v61 = vpop.eup %5959  ;;  %v1615_v3 = vpop.f32.mrb[55].mxu0  ;;  %5272 = vmatmul.mubr.msk.f32.gmra.mrb[70].mxu0 %vm1160_vm1, %v7164_v51  ;;  %v5488_v4 = vpack.c.bf16 %v5958_v58, %v5950_v39  ;;  %5981 = vtanh.f32 %v1699_v56  ;;  %v1703_v5 = vadd.f32 %v1702_v2, %v7089_v63 }
 0x238   : > { %v5962_v54 = vpop.eup %5961  ;;  %v1616_v6 = vadd.f32 %v1615_v3, %v7089_v63  ;;  %v1704_v7 = vpop.f32.mrb[55].mxu1  ;;  %5276 = vmatmul.mubr.msk.f32.gmra.mrb[70].mxu1 %vm1160_vm1, %v7164_v51  ;;  %5481 = vmatprep.subr.bf16.mxu0 %v5480_v60  ;;  %5983 = vtanh.f32 %v1614_v62 }
 0x239   : > { %v5964_v10 = vpop.eup %5963  ;;  %v1705_v11 = vadd.f32 %v1704_v7, %v7089_v63  ;;  %5489 = vmatprep.subr.bf16.mxu1 %v5488_v4  ;;  %5483 = vmatpush1.bf16.msra.mxu0 %v5482_v52  ;;  %5985 = vtanh.f32 %v1703_v5  ;;  %v1773_v13 = vpop.f32.mrb[56].mxu0 }
 0x23a   : > { %v5966_v12 = vpop.eup %5965  ;;  %5491 = vmatpush1.bf16.msra.mxu1 %v5490_v57  ;;  %2233 = vmatprep.mubr.f32.mxu0 %v6506_v1  ;;  %5987 = vtanh.f32 %v1616_v6  ;;  %v1774_v15 = vadd.f32 %v1773_v13, %v7071_v17  ;;  %v1862_v16 = vpop.f32.mrb[56].mxu1 }
 0x23b   : > { %v5968_v14 = vpop.eup %5967  ;;  %2322 = vmatprep.mubr.f32.mxu1 %v6506_v1  ;;  %v1775_v18 = vpop.f32.mrb[57].mxu0  ;;  %5989 = vtanh.f32 %v1705_v11  ;;  %v1863_v8 = vadd.f32 %v1862_v16, %v7071_v17 }
 0x23c   : > { %v5970_v19 = vpop.eup %5969  ;;  %v1776_v20 = vadd.f32 %v1775_v18, %v7071_v17  ;;  %v1864_v22 = vpop.f32.mrb[57].mxu1  ;;  %5277 = vmatmul.mubr.msk.f32.vlgmr.msra.gmra.mrb[72].mxu0 %vm1160_vm1, %v7116_v9  ;;  %v5494_v23 = vpack.c.bf16 %v5968_v14, %v7170_v61  ;;  %5991 = vtanh.f32 %v1774_v15 }
 0x23d   : > { %v5972_v24 = vpop.eup %5971  ;;  %v1865_v25 = vadd.f32 %v1864_v22, %v7071_v17  ;;  %5281 = vmatmul.mubr.msk.f32.vlgmr.msra.gmra.mrb[72].mxu1 %vm1160_vm1, %v7116_v9  ;;  %2239 = vmatprep.mubr.f32.mxu0 %v6506_v1  ;;  %v5502_v26 = vpack.c.bf16 %v5970_v19, %v5962_v54  ;;  %5993 = vtanh.f32 %v1863_v8  ;;  %v1779_v28 = vpop.f32.mrb[58].mxu0 }
 0x23e   : > { %v5974_v27 = vpop.eup %5973  ;;  %2328 = vmatprep.mubr.f32.mxu1 %v6506_v1  ;;  %v5492_v29 = vpack.c.bf16 %v5972_v24, %v5964_v10  ;;  %5995 = vtanh.f32 %v1776_v20  ;;  %v1780_v32 = vadd.f32 %v1779_v28, %v7077_v0  ;;  %v1868_v33 = vpop.f32.mrb[58].mxu1 }
 0x23f   : > { %v7193_v30 = vpop.eup %5975  ;;  %v1781_v34 = vpop.f32.mrb[59].mxu0  ;;  %v5500_v17 = vpack.c.bf16 %v5974_v27, %v5966_v12  ;;  %5997 = vtanh.f32 %v1865_v25  ;;  %v1869_v36 = vadd.f32 %v1868_v33, %v7077_v0 }
 0x240   : > { %v7196_v35 = vpop.eup %5977  ;;  %v1782_v44 = vadd.f32 %v1781_v34, %v7077_v0  ;;  %v1870_v31 = vpop.f32.mrb[59].mxu1  ;;  %5278 = vmatmul.mubr.msk.f32.gmra.mrb[74].mxu0 %vm1160_vm1, %v7129_v21  ;;  %5493 = vmatprep.subr.bf16.mxu0 %v5492_v29  ;;  %5999 = vtanh.f32 %v1780_v32 }
 0x241   : > { %v5980_v48 = vpop.eup %5979  ;;  %v1871_v38 = vadd.f32 %v1870_v31, %v7077_v0  ;;  %5282 = vmatmul.mubr.msk.f32.gmra.mrb[74].mxu1 %vm1160_vm1, %v7129_v21  ;;  %5501 = vmatprep.subr.bf16.mxu1 %v5500_v17  ;;  %6001 = vtanh.f32 %v1869_v36  ;;  %v1785_v40 = vpop.f32.mrb[60].mxu0 }
 0x242   : > { %v5982_v39 = vpop.eup %5981  ;;  %5495 = vmatpush1.bf16.msra.mxu0 %v5494_v23  ;;  %5503 = vmatpush1.bf16.msra.mxu1 %v5502_v26  ;;  %6003 = vtanh.f32 %v1782_v44  ;;  %v1786_v42 = vadd.f32 %v1785_v40, %v7083_v53  ;;  %v1874_v43 = vpop.f32.mrb[60].mxu1 }
 0x243   : > { %v5984_v41 = vpop.eup %5983  ;;  %2245 = vmatprep.mubr.f32.mxu0 %v6506_v1  ;;  %2334 = vmatprep.mubr.f32.mxu1 %v6506_v1  ;;  %v1787_v45 = vpop.f32.mrb[61].mxu0  ;;  %6005 = vtanh.f32 %v1871_v38  ;;  %v1875_v46 = vadd.f32 %v1874_v43, %v7083_v53 }
 0x244   : > { %v5986_v0 = vpop.eup %5985  ;;  %v1788_v47 = vadd.f32 %v1787_v45, %v7083_v53  ;;  %v1876_v49 = vpop.f32.mrb[61].mxu1  ;;  %5279 = vmatmul.mubr.msk.f32.gmra.mrb[76].mxu0 %vm1160_vm1, %v7148_v37  ;;  %v5498_v50 = vpack.c.bf16 %v5984_v41, %v7193_v30  ;;  %6007 = vtanh.f32 %v1786_v42 }
 0x245   : > { %v5988_v52 = vpop.eup %5987  ;;  %v1877_v55 = vadd.f32 %v1876_v49, %v7083_v53  ;;  %5283 = vmatmul.mubr.msk.f32.gmra.mrb[76].mxu1 %vm1160_vm1, %v7148_v37  ;;  %2251 = vmatprep.mubr.f32.mxu0 %v6506_v1  ;;  %v5506_v56 = vpack.c.bf16 %v5986_v0, %v7196_v35  ;;  %6009 = vtanh.f32 %v1875_v46  ;;  %v1791_v58 = vpop.f32.mrb[62].mxu0 }
 0x246   : > { %v5990_v57 = vpop.eup %5989  ;;  %2340 = vmatprep.mubr.f32.mxu1 %v6506_v1  ;;  %v5496_v59 = vpack.c.bf16 %v5988_v52, %v5980_v48  ;;  %6011 = vtanh.f32 %v1788_v47  ;;  %v1792_v61 = vadd.f32 %v1791_v58, %v7089_v63  ;;  %v1880_v62 = vpop.f32.mrb[62].mxu1 }
 0x247   : > { %v5992_v60 = vpop.eup %5991  ;;  %v1793_v2 = vpop.f32.mrb[63].mxu0  ;;  %v5504_v53 = vpack.c.bf16 %v5990_v57, %v5982_v39  ;;  %6013 = vtanh.f32 %v1877_v55  ;;  %v1881_v4 = vadd.f32 %v1880_v62, %v7089_v63 }
 0x248   : > { %v5994_v3 = vpop.eup %5993  ;;  %v1794_v54 = vadd.f32 %v1793_v2, %v7089_v63  ;;  %v1882_v5 = vpop.f32.mrb[63].mxu1  ;;  %5280 = vmatmul.mubr.msk.f32.gmra.mrb[78].mxu0 %vm1160_vm1, %v7164_v51  ;;  %5497 = vmatprep.subr.bf16.mxu0 %v5496_v59  ;;  %6015 = vtanh.f32 %v1792_v61 }
 0x249   : > { %v5996_v6 = vpop.eup %5995  ;;  %v1883_v7 = vadd.f32 %v1882_v5, %v7089_v63  ;;  %5284 = vmatmul.mubr.msk.f32.gmra.mrb[78].mxu1 %vm1160_vm1, %v7164_v51  ;;  %5505 = vmatprep.subr.bf16.mxu1 %v5504_v53  ;;  %6017 = vtanh.f32 %v1881_v4 }
 0x24a   : > { %v5998_v10 = vpop.eup %5997  ;;  %5499 = vmatpush1.bf16.msra.mxu0 %v5498_v50  ;;  %5507 = vmatpush1.bf16.msra.mxu1 %v5506_v56  ;;  %6019 = vtanh.f32 %v1794_v54 }
 0x24b   : > { %v6000_v11 = vpop.eup %5999  ;;  %2411 = vmatprep.mubr.f32.mxu0 %v6506_v1  ;;  %2500 = vmatprep.mubr.f32.mxu1 %v6506_v1  ;;  %6021 = vtanh.f32 %v1883_v7 }
 0x24c   : > { %v6002_v12 = vpop.eup %6001  ;;  %v5510_v13 = vpack.c.bf16 %v6000_v11, %v5992_v60 }
 0x24d   : > { %v6004_v14 = vpop.eup %6003  ;;  %5285 = vmatmul.mubr.msk.f32.vlgmr.msra.gmra.mrb[80].mxu0 %vm1160_vm1, %v7116_v9  ;;  %5289 = vmatmul.mubr.msk.f32.vlgmr.msra.gmra.mrb[80].mxu1 %vm1160_vm1, %v7116_v9  ;;  %v5518_v63 = vpack.c.bf16 %v6002_v12, %v5994_v3 }
 0x24e   : > { %v6006_v15 = vpop.eup %6005  ;;  %2417 = vmatprep.mubr.f32.mxu0 %v6506_v1  ;;  %2506 = vmatprep.mubr.f32.mxu1 %v6506_v1  ;;  %v5508_v16 = vpack.c.bf16 %v6004_v14, %v5996_v6 }
 0x24f   : > { %v6008_v18 = vpop.eup %6007  ;;  %v5516_v19 = vpack.c.bf16 %v6006_v15, %v5998_v10 }
 0x250   : > { %v6010_v8 = vpop.eup %6009  ;;  %5509 = vmatprep.subr.bf16.mxu0 %v5508_v16 }
 0x251   : > { %v6012_v20 = vpop.eup %6011  ;;  %5286 = vmatmul.mubr.msk.f32.gmra.mrb[82].mxu0 %vm1160_vm1, %v7129_v21  ;;  %5290 = vmatmul.mubr.msk.f32.gmra.mrb[82].mxu1 %vm1160_vm1, %v7129_v21 }
 0x252   : > { %v6014_v22 = vpop.eup %6013  ;;  %5517 = vmatprep.subr.bf16.mxu1 %v5516_v19  ;;  %5511 = vmatpush1.bf16.msra.mxu0 %v5510_v13 }
 0x253   : > { %v6016_v23 = vpop.eup %6015  ;;  %5519 = vmatpush1.bf16.msra.mxu1 %v5518_v63  ;;  %2423 = vmatprep.mubr.f32.mxu0 %v6506_v1 }
 0x254   : > { %v6018_v24 = vpop.eup %6017  ;;  %2512 = vmatprep.mubr.f32.mxu1 %v6506_v1  ;;  %v5514_v25 = vpack.c.bf16 %v6016_v23, %v6008_v18 }
 0x255   : > { %v6020_v26 = vpop.eup %6019  ;;  %5287 = vmatmul.mubr.msk.f32.gmra.mrb[84].mxu0 %vm1160_vm1, %v7148_v37  ;;  %5291 = vmatmul.mubr.msk.f32.gmra.mrb[84].mxu1 %vm1160_vm1, %v7148_v37  ;;  %v5522_v27 = vpack.c.bf16 %v6018_v24, %v6010_v8 }
 0x256   : > { %v6022_v28 = vpop.eup %6021  ;;  %2429 = vmatprep.mubr.f32.mxu0 %v6506_v1  ;;  %2518 = vmatprep.mubr.f32.mxu1 %v6506_v1  ;;  %v5512_v29 = vpack.c.bf16 %v6020_v26, %v6012_v20 }
 0x257   : > { %v5520_v30 = vpack.c.bf16 %v6022_v28, %v6014_v22 }
 0x258   : > { %5513 = vmatprep.subr.bf16.mxu0 %v5512_v29 }
 0x259   : > { %5288 = vmatmul.mubr.msk.f32.gmra.mrb[86].mxu0 %vm1160_vm1, %v7164_v51  ;;  %5292 = vmatmul.mubr.msk.f32.gmra.mrb[86].mxu1 %vm1160_vm1, %v7164_v51 }
 0x25a   : > { %5521 = vmatprep.subr.bf16.mxu1 %v5520_v30  ;;  %5515 = vmatpush1.bf16.msra.mxu0 %v5514_v25 }
 0x25b   : > { %5523 = vmatpush1.bf16.msra.mxu1 %v5522_v27  ;;  %2589 = vmatprep.mubr.f32.mxu0 %v6506_v1 }
 0x25c   : > { %2678 = vmatprep.mubr.f32.mxu1 %v6506_v1 }
 0x25d   : > { %5293 = vmatmul.mubr.msk.f32.vlgmr.msra.gmra.mrb[88].mxu0 %vm1160_vm1, %v7116_v9 }
 0x25e   : > { %5297 = vmatmul.mubr.msk.f32.vlgmr.msra.gmra.mrb[88].mxu1 %vm1160_vm1, %v7116_v9  ;;  %2595 = vmatprep.mubr.f32.mxu0 %v6506_v1  ;;  %v7277_v9 = vpop.permute.xlu0 %1961 }
 0x25f   : > { %2684 = vmatprep.mubr.f32.mxu1 %v6506_v1 }
 0x261   : > { %5294 = vmatmul.mubr.msk.f32.gmra.mrb[90].mxu0 %vm1160_vm1, %v7129_v21 }
 0x262   : > { %5298 = vmatmul.mubr.msk.f32.gmra.mrb[90].mxu1 %vm1160_vm1, %v7129_v21  ;;  %2601 = vmatprep.mubr.f32.mxu0 %v6506_v1  ;;  %v7289_v43 = vpop.permute.xlu0 %1971 }
 0x263   : > { %2690 = vmatprep.mubr.f32.mxu1 %v6506_v1 }
 0x265   : > { %5295 = vmatmul.mubr.msk.f32.gmra.mrb[92].mxu0 %vm1160_vm1, %v7148_v37 }
 0x266   : > { %5299 = vmatmul.mubr.msk.f32.gmra.mrb[92].mxu1 %vm1160_vm1, %v7148_v37  ;;  %2607 = vmatprep.mubr.f32.mxu0 %v6506_v1 }
 0x267   : > { %2696 = vmatprep.mubr.f32.mxu1 %v6506_v1 }
 0x269   : > { %5296 = vmatmul.mubr.msk.f32.gmra.mrb[94].mxu0 %vm1160_vm1, %v7164_v51 }
 0x26a   : > { %5300 = vmatmul.mubr.msk.f32.gmra.mrb[94].mxu1 %vm1160_vm1, %v7164_v51  ;;  %2873 = vmatprep.mubr.f32.mxu0 %v6506_v1  ;;  %v7283_v51 = vpop.permute.xlu1 %1966 }
 0x26b   : > { %2962 = vmatprep.mubr.f32.mxu1 %v6506_v1 }
 0x26e   : > { %v7295_v56 = vpop.permute.xlu1 %1976 }
 0x2fe   : > { %v2057_v21 = vpop.f32.mrb[64].mxu0 }
 0x2ff   : > { %v2058_v32 = vadd.f32 %v2057_v21, %v7277_v9  ;;  %v2146_v37 = vpop.f32.mrb[64].mxu1  ;;  %v2059_v33 = vpop.f32.mrb[65].mxu0 }
 0x300   : > { %v2147_v34 = vadd.f32 %v2146_v37, %v7277_v9  ;;  %v2060_v17 = vadd.f32 %v2059_v33, %v7277_v9  ;;  %v2148_v35 = vpop.f32.mrb[65].mxu1 }
 0x301   : > { %6023 = vtanh.f32 %v2058_v32  ;;  %v2149_v36 = vadd.f32 %v2148_v35, %v7277_v9 }
 0x302   : > { %6025 = vtanh.f32 %v2147_v34  ;;  %v2063_v44 = vpop.f32.mrb[66].mxu0 }
 0x303   : > { %6027 = vtanh.f32 %v2060_v17  ;;  %v2064_v31 = vadd.f32 %v2063_v44, %v7283_v51  ;;  %v2152_v48 = vpop.f32.mrb[66].mxu1  ;;  %v2065_v38 = vpop.f32.mrb[67].mxu0 }
 0x304   : > { %6029 = vtanh.f32 %v2149_v36  ;;  %v2153_v39 = vadd.f32 %v2152_v48, %v7283_v51  ;;  %v2066_v40 = vadd.f32 %v2065_v38, %v7283_v51  ;;  %v2154_v41 = vpop.f32.mrb[67].mxu1 }
 0x305   : > { %6031 = vtanh.f32 %v2064_v31  ;;  %v2155_v42 = vadd.f32 %v2154_v41, %v7283_v51 }
 0x306   : > { %6033 = vtanh.f32 %v2153_v39  ;;  %v2069_v45 = vpop.f32.mrb[68].mxu0 }
 0x307   : > { %6035 = vtanh.f32 %v2066_v40  ;;  %v2070_v0 = vadd.f32 %v2069_v45, %v7289_v43  ;;  %v2158_v46 = vpop.f32.mrb[68].mxu1  ;;  %v2071_v47 = vpop.f32.mrb[69].mxu0 }
 0x308   : > { %6037 = vtanh.f32 %v2155_v42  ;;  %v2159_v49 = vadd.f32 %v2158_v46, %v7289_v43  ;;  %v2072_v50 = vadd.f32 %v2071_v47, %v7289_v43  ;;  %v2160_v52 = vpop.f32.mrb[69].mxu1 }
 0x309   : > { %6039 = vtanh.f32 %v2070_v0  ;;  %v2161_v55 = vadd.f32 %v2160_v52, %v7289_v43 }
 0x30a   : > { %6041 = vtanh.f32 %v2159_v49  ;;  %v2075_v57 = vpop.f32.mrb[70].mxu0 }
 0x30b   : > { %v6024_v58 = vpop.eup %6023  ;;  %6043 = vtanh.f32 %v2072_v50  ;;  %v2076_v59 = vadd.f32 %v2075_v57, %v7295_v56  ;;  %v2164_v60 = vpop.f32.mrb[70].mxu1 }
 0x30c   : > { %v2077_v61 = vpop.f32.mrb[71].mxu0  ;;  %v6026_v62 = vpop.eup %6025  ;;  %6045 = vtanh.f32 %v2161_v55  ;;  %v2165_v2 = vadd.f32 %v2164_v60, %v7295_v56 }
 0x30d   : > { %v2078_v53 = vadd.f32 %v2077_v61, %v7295_v56  ;;  %v2166_v3 = vpop.f32.mrb[71].mxu1  ;;  %v6028_v4 = vpop.eup %6027  ;;  %6047 = vtanh.f32 %v2076_v59 }
 0x30e   : > { %v2167_v54 = vadd.f32 %v2166_v3, %v7295_v56  ;;  %v6030_v5 = vpop.eup %6029  ;;  %6049 = vtanh.f32 %v2165_v2  ;;  %v7321_v2 = vld [vmem:[%s7839_s3 + $0x40] sm:$0xff] }
 0x30f   : > { %v6032_v6 = vpop.eup %6031  ;;  %6051 = vtanh.f32 %v2078_v53  ;;  %v2235_v7 = vpop.f32.mrb[72].mxu0 }
 0x310   : > { %v6034_v10 = vpop.eup %6033  ;;  %6053 = vtanh.f32 %v2167_v54  ;;  %v2236_v11 = vadd.f32 %v2235_v7, %v7277_v9  ;;  %v2324_v12 = vpop.f32.mrb[72].mxu1  ;;  %v5526_v14 = vpack.c.bf16 %v6032_v6, %v6024_v58 }
 0x311   : > { %v2237_v13 = vpop.f32.mrb[73].mxu0  ;;  %v6036_v63 = vpop.eup %6035  ;;  %v2325_v15 = vadd.f32 %v2324_v12, %v7277_v9  ;;  %v5534_v19 = vpack.c.bf16 %v6034_v10, %v6026_v62 }
 0x312   : > { %v2238_v16 = vadd.f32 %v2237_v13, %v7277_v9  ;;  %v2326_v18 = vpop.f32.mrb[73].mxu1  ;;  %v6038_v8 = vpop.eup %6037  ;;  %6055 = vtanh.f32 %v2236_v11  ;;  %v5524_v22 = vpack.c.bf16 %v6036_v63, %v6028_v4 }
 0x313   : > { %v2327_v20 = vadd.f32 %v2326_v18, %v7277_v9  ;;  %v6040_v23 = vpop.eup %6039  ;;  %6057 = vtanh.f32 %v2325_v15  ;;  %v2241_v24 = vpop.f32.mrb[74].mxu0  ;;  %v5532_v25 = vpack.c.bf16 %v6038_v8, %v6030_v5 }
 0x314   : > { %v6042_v26 = vpop.eup %6041  ;;  %6059 = vtanh.f32 %v2238_v16  ;;  %v2242_v27 = vadd.f32 %v2241_v24, %v7283_v51  ;;  %v2330_v28 = vpop.f32.mrb[74].mxu1  ;;  %5525 = vmatprep.subr.bf16.mxu0 %v5524_v22 }
 0x315   : > { %v2243_v29 = vpop.f32.mrb[75].mxu0  ;;  %v6044_v30 = vpop.eup %6043  ;;  %6061 = vtanh.f32 %v2327_v20  ;;  %v2331_v21 = vadd.f32 %v2330_v28, %v7283_v51  ;;  %5533 = vmatprep.subr.bf16.mxu1 %v5532_v25  ;;  %5527 = vmatpush1.bf16.msra.mxu0 %v5526_v14  ;;  %v7334_v14 = vld [vmem:[%s7839_s3 + $0x48] sm:$0xff] }
 0x316   : > { %v2244_v32 = vadd.f32 %v2243_v29, %v7283_v51  ;;  %v2332_v37 = vpop.f32.mrb[75].mxu1  ;;  %v6046_v33 = vpop.eup %6045  ;;  %6063 = vtanh.f32 %v2242_v27  ;;  %5535 = vmatpush1.bf16.msra.mxu1 %v5534_v19 }
 0x317   : > { %v2333_v34 = vadd.f32 %v2332_v37, %v7283_v51  ;;  %v6048_v17 = vpop.eup %6047  ;;  %6065 = vtanh.f32 %v2331_v21  ;;  %v2247_v35 = vpop.f32.mrb[76].mxu0  ;;  %v7353_v21 = vld [vmem:[%s7839_s3 + $0x50] sm:$0xff] }
 0x318   : > { %v6050_v36 = vpop.eup %6049  ;;  %6067 = vtanh.f32 %v2244_v32  ;;  %v2248_v44 = vadd.f32 %v2247_v35, %v7289_v43  ;;  %v2336_v31 = vpop.f32.mrb[76].mxu1  ;;  %v5530_v38 = vpack.c.bf16 %v6048_v17, %v6040_v23 }
 0x319   : > { %v2249_v48 = vpop.f32.mrb[77].mxu0  ;;  %v6052_v39 = vpop.eup %6051  ;;  %6069 = vtanh.f32 %v2333_v34  ;;  %v2337_v40 = vadd.f32 %v2336_v31, %v7289_v43  ;;  %v5538_v45 = vpack.c.bf16 %v6050_v36, %v6042_v26 }
 0x31a   : > { %v2250_v41 = vadd.f32 %v2249_v48, %v7289_v43  ;;  %v2338_v42 = vpop.f32.mrb[77].mxu1  ;;  %v6054_v0 = vpop.eup %6053  ;;  %6071 = vtanh.f32 %v2248_v44  ;;  %v5528_v47 = vpack.c.bf16 %v6052_v39, %v6044_v30 }
 0x31b   : > { %v2339_v46 = vadd.f32 %v2338_v42, %v7289_v43  ;;  %6073 = vtanh.f32 %v2337_v40  ;;  %v2253_v49 = vpop.f32.mrb[78].mxu0  ;;  %v5536_v50 = vpack.c.bf16 %v6054_v0, %v6046_v33  ;;  %v7369_v40 = vld [vmem:[%s7839_s3 + $0x58] sm:$0xff] }
 0x31c   : > { %v7313_v52 = vpop.eup %6055  ;;  %6075 = vtanh.f32 %v2250_v41  ;;  %v2254_v55 = vadd.f32 %v2253_v49, %v7295_v56  ;;  %v2342_v57 = vpop.f32.mrb[78].mxu1  ;;  %5529 = vmatprep.subr.bf16.mxu0 %v5528_v47 }
 0x31d   : > { %v2255_v58 = vpop.f32.mrb[79].mxu0  ;;  %v6058_v59 = vpop.eup %6057  ;;  %6077 = vtanh.f32 %v2339_v46  ;;  %v2343_v60 = vadd.f32 %v2342_v57, %v7295_v56  ;;  %5537 = vmatprep.subr.bf16.mxu1 %v5536_v50  ;;  %5531 = vmatpush1.bf16.msra.mxu0 %v5530_v38 }
 0x31e   : > { %v2256_v61 = vadd.f32 %v2255_v58, %v7295_v56  ;;  %v2344_v62 = vpop.f32.mrb[79].mxu1  ;;  %v6060_v53 = vpop.eup %6059  ;;  %6079 = vtanh.f32 %v2254_v55  ;;  %5539 = vmatpush1.bf16.msra.mxu1 %v5538_v45 }
 0x31f   : > { %v2345_v3 = vadd.f32 %v2344_v62, %v7295_v56  ;;  %v6062_v4 = vpop.eup %6061  ;;  %6081 = vtanh.f32 %v2343_v60 }
 0x320   : > { %v6064_v54 = vpop.eup %6063  ;;  %6083 = vtanh.f32 %v2256_v61  ;;  %v2413_v5 = vpop.f32.mrb[80].mxu0  ;;  %5309 = vmatmul.mubr.msk.f32.vlgmr.msra.gmra.mrb[96].mxu0 %vm1160_vm1, %v7321_v2 }
 0x321   : > { %v2502_v6 = vpop.f32.mrb[80].mxu1  ;;  %v6066_v7 = vpop.eup %6065  ;;  %6085 = vtanh.f32 %v2345_v3  ;;  %v2414_v10 = vadd.f32 %v2413_v5, %v7277_v9  ;;  %5313 = vmatmul.mubr.msk.f32.vlgmr.msra.gmra.mrb[96].mxu1 %vm1160_vm1, %v7321_v2  ;;  %2879 = vmatprep.mubr.f32.mxu0 %v6506_v1  ;;  %v5542_v63 = vpack.c.bf16 %v6064_v54, %v7313_v52 }
 0x322   : > { %v2503_v11 = vadd.f32 %v2502_v6, %v7277_v9  ;;  %v2415_v12 = vpop.f32.mrb[81].mxu0  ;;  %v2504_v13 = vpop.f32.mrb[81].mxu1  ;;  %2968 = vmatprep.mubr.f32.mxu1 %v6506_v1  ;;  %v5550_v19 = vpack.c.bf16 %v6066_v7, %v6058_v59 }
 0x323   : > { %v6068_v15 = vpop.eup %6067  ;;  %v2416_v16 = vadd.f32 %v2415_v12, %v7277_v9  ;;  %v2505_v18 = vadd.f32 %v2504_v13, %v7277_v9  ;;  %6087 = vtanh.f32 %v2414_v10 }
 0x324   : > { %v6070_v8 = vpop.eup %6069  ;;  %v5540_v20 = vpack.c.bf16 %v6068_v15, %v6060_v53  ;;  %6089 = vtanh.f32 %v2503_v11  ;;  %v2419_v23 = vpop.f32.mrb[82].mxu0  ;;  %5310 = vmatmul.mubr.msk.f32.gmra.mrb[98].mxu0 %vm1160_vm1, %v7334_v14 }
 0x325   : > { %v7340_v22 = vpop.eup %6071  ;;  %v2508_v24 = vpop.f32.mrb[82].mxu1  ;;  %v5548_v25 = vpack.c.bf16 %v6070_v8, %v6062_v4  ;;  %6091 = vtanh.f32 %v2416_v16  ;;  %v2420_v27 = vadd.f32 %v2419_v23, %v7283_v51  ;;  %5314 = vmatmul.mubr.msk.f32.gmra.mrb[98].mxu1 %vm1160_vm1, %v7334_v14  ;;  %2885 = vmatprep.mubr.f32.mxu0 %v6506_v1 }
 0x326   : > { %v7344_v26 = vpop.eup %6073  ;;  %v2509_v28 = vadd.f32 %v2508_v24, %v7283_v51  ;;  %v2421_v29 = vpop.f32.mrb[83].mxu0  ;;  %5541 = vmatprep.subr.bf16.mxu0 %v5540_v20  ;;  %6093 = vtanh.f32 %v2505_v18  ;;  %2974 = vmatprep.mubr.f32.mxu1 %v6506_v1 }
 0x327   : > { %v2510_v30 = vpop.f32.mrb[83].mxu1  ;;  %v6076_v32 = vpop.eup %6075  ;;  %v2422_v37 = vadd.f32 %v2421_v29, %v7283_v51  ;;  %5549 = vmatprep.subr.bf16.mxu1 %v5548_v25  ;;  %5543 = vmatpush1.bf16.msra.mxu0 %v5542_v63  ;;  %6095 = vtanh.f32 %v2420_v27 }
 0x328   : > { %v2511_v33 = vadd.f32 %v2510_v30, %v7283_v51  ;;  %v6078_v34 = vpop.eup %6077  ;;  %5551 = vmatpush1.bf16.msra.mxu1 %v5550_v19  ;;  %6097 = vtanh.f32 %v2509_v28  ;;  %v2425_v35 = vpop.f32.mrb[84].mxu0  ;;  %5311 = vmatmul.mubr.msk.f32.gmra.mrb[100].mxu0 %vm1160_vm1, %v7353_v21 }
 0x329   : > { %v6080_v17 = vpop.eup %6079  ;;  %v2514_v36 = vpop.f32.mrb[84].mxu1  ;;  %6099 = vtanh.f32 %v2422_v37  ;;  %v2426_v31 = vadd.f32 %v2425_v35, %v7289_v43  ;;  %5315 = vmatmul.mubr.msk.f32.gmra.mrb[100].mxu1 %vm1160_vm1, %v7353_v21  ;;  %2891 = vmatprep.mubr.f32.mxu0 %v6506_v1 }
 0x32a   : > { %v6082_v44 = vpop.eup %6081  ;;  %v2515_v48 = vadd.f32 %v2514_v36, %v7289_v43  ;;  %v2427_v38 = vpop.f32.mrb[85].mxu0  ;;  %v5546_v41 = vpack.c.bf16 %v6080_v17, %v7340_v22  ;;  %6101 = vtanh.f32 %v2511_v33  ;;  %2980 = vmatprep.mubr.f32.mxu1 %v6506_v1 }
 0x32b   : > { %v2516_v39 = vpop.f32.mrb[85].mxu1  ;;  %v6084_v42 = vpop.eup %6083  ;;  %v2428_v45 = vadd.f32 %v2427_v38, %v7289_v43  ;;  %v5554_v46 = vpack.c.bf16 %v6082_v44, %v7344_v26  ;;  %6103 = vtanh.f32 %v2426_v31 }
 0x32c   : > { %v2517_v0 = vadd.f32 %v2516_v39, %v7289_v43  ;;  %v6086_v47 = vpop.eup %6085  ;;  %v5544_v49 = vpack.c.bf16 %v6084_v42, %v6076_v32  ;;  %6105 = vtanh.f32 %v2515_v48  ;;  %v2431_v50 = vpop.f32.mrb[86].mxu0  ;;  %5312 = vmatmul.mubr.msk.f32.gmra.mrb[102].mxu0 %vm1160_vm1, %v7369_v40 }
 0x32d   : > { %v2520_v52 = vpop.f32.mrb[86].mxu1  ;;  %v5552_v55 = vpack.c.bf16 %v6086_v47, %v6078_v34  ;;  %v7378_v57 = vpop.eup %6087  ;;  %6107 = vtanh.f32 %v2428_v45  ;;  %v2432_v58 = vadd.f32 %v2431_v50, %v7295_v56  ;;  %5316 = vmatmul.mubr.msk.f32.gmra.mrb[102].mxu1 %vm1160_vm1, %v7369_v40  ;;  %3051 = vmatprep.mubr.f32.mxu0 %v6506_v1 }
 0x32e   : > { %v2521_v59 = vadd.f32 %v2520_v52, %v7295_v56  ;;  %v2433_v60 = vpop.f32.mrb[87].mxu0  ;;  %v2522_v61 = vpop.f32.mrb[87].mxu1  ;;  %5545 = vmatprep.subr.bf16.mxu0 %v5544_v49  ;;  %6109 = vtanh.f32 %v2517_v0  ;;  %3140 = vmatprep.mubr.f32.mxu1 %v6506_v1 }
 0x32f   : > { %v6090_v62 = vpop.eup %6089  ;;  %v2434_v53 = vadd.f32 %v2433_v60, %v7295_v56  ;;  %v2523_v3 = vadd.f32 %v2522_v61, %v7295_v56  ;;  %5553 = vmatprep.subr.bf16.mxu1 %v5552_v55  ;;  %5547 = vmatpush1.bf16.msra.mxu0 %v5546_v41  ;;  %6111 = vtanh.f32 %v2432_v58 }
 0x330   : > { %v6092_v4 = vpop.eup %6091  ;;  %5555 = vmatpush1.bf16.msra.mxu1 %v5554_v46  ;;  %6113 = vtanh.f32 %v2521_v59  ;;  %v2591_v5 = vpop.f32.mrb[88].mxu0 }
 0x331   : > { %v6094_v54 = vpop.eup %6093  ;;  %6115 = vtanh.f32 %v2434_v53  ;;  %v2592_v7 = vadd.f32 %v2591_v5, %v7277_v9  ;;  %v2680_v10 = vpop.f32.mrb[88].mxu1 }
 0x332   : > { %v6096_v6 = vpop.eup %6095  ;;  %v2593_v11 = vpop.f32.mrb[89].mxu0  ;;  %5317 = vmatmul.mubr.msk.f32.vlgmr.msra.gmra.mrb[104].mxu0 %vm1160_vm1, %v7321_v2  ;;  %6117 = vtanh.f32 %v2523_v3  ;;  %v2681_v13 = vadd.f32 %v2680_v10, %v7277_v9 }
 0x333   : > { %v6098_v12 = vpop.eup %6097  ;;  %v2594_v63 = vadd.f32 %v2593_v11, %v7277_v9  ;;  %v2682_v15 = vpop.f32.mrb[89].mxu1  ;;  %5321 = vmatmul.mubr.msk.f32.vlgmr.msra.gmra.mrb[104].mxu1 %vm1160_vm1, %v7321_v2  ;;  %3057 = vmatprep.mubr.f32.mxu0 %v6506_v1  ;;  %v5558_v16 = vpack.c.bf16 %v6096_v6, %v7378_v57  ;;  %6119 = vtanh.f32 %v2592_v7 }
 0x334   : > { %v6100_v18 = vpop.eup %6099  ;;  %v2683_v19 = vadd.f32 %v2682_v15, %v7277_v9  ;;  %3146 = vmatprep.mubr.f32.mxu1 %v6506_v1  ;;  %v5566_v8 = vpack.c.bf16 %v6098_v12, %v6090_v62  ;;  %6121 = vtanh.f32 %v2681_v13  ;;  %v2597_v22 = vpop.f32.mrb[90].mxu0 }
 0x335   : > { %v6102_v20 = vpop.eup %6101  ;;  %v5556_v23 = vpack.c.bf16 %v6100_v18, %v6092_v4  ;;  %6123 = vtanh.f32 %v2594_v63  ;;  %v2598_v25 = vadd.f32 %v2597_v22, %v7283_v51  ;;  %v2686_v26 = vpop.f32.mrb[90].mxu1 }
 0x336   : > { %v7399_v24 = vpop.eup %6103  ;;  %v2599_v27 = vpop.f32.mrb[91].mxu0  ;;  %5318 = vmatmul.mubr.msk.f32.gmra.mrb[106].mxu0 %vm1160_vm1, %v7334_v14  ;;  %v5564_v28 = vpack.c.bf16 %v6102_v20, %v6094_v54  ;;  %6125 = vtanh.f32 %v2683_v19  ;;  %v2687_v9 = vadd.f32 %v2686_v26, %v7283_v51 }
 0x337   : > { %v6106_v29 = vpop.eup %6105  ;;  %v2600_v30 = vadd.f32 %v2599_v27, %v7283_v51  ;;  %v2688_v32 = vpop.f32.mrb[91].mxu1  ;;  %5322 = vmatmul.mubr.msk.f32.gmra.mrb[106].mxu1 %vm1160_vm1, %v7334_v14  ;;  %5557 = vmatprep.subr.bf16.mxu0 %v5556_v23  ;;  %6127 = vtanh.f32 %v2598_v25 }
 0x338   : > { %v6108_v37 = vpop.eup %6107  ;;  %v2689_v33 = vadd.f32 %v2688_v32, %v7283_v51  ;;  %5565 = vmatprep.subr.bf16.mxu1 %v5564_v28  ;;  %5559 = vmatpush1.bf16.msra.mxu0 %v5558_v16  ;;  %6129 = vtanh.f32 %v2687_v9  ;;  %v2603_v17 = vpop.f32.mrb[92].mxu0 }
 0x339   : > { %v6110_v34 = vpop.eup %6109  ;;  %5567 = vmatpush1.bf16.msra.mxu1 %v5566_v8  ;;  %3063 = vmatprep.mubr.f32.mxu0 %v6506_v1  ;;  %6131 = vtanh.f32 %v2600_v30  ;;  %v2604_v36 = vadd.f32 %v2603_v17, %v7289_v43  ;;  %v2692_v44 = vpop.f32.mrb[92].mxu1 }
 0x33a   : > { %v6112_v35 = vpop.eup %6111  ;;  %3152 = vmatprep.mubr.f32.mxu1 %v6506_v1  ;;  %v2605_v31 = vpop.f32.mrb[93].mxu0  ;;  %5319 = vmatmul.mubr.msk.f32.gmra.mrb[108].mxu0 %vm1160_vm1, %v7353_v21  ;;  %6133 = vtanh.f32 %v2689_v33  ;;  %v2693_v48 = vadd.f32 %v2692_v44, %v7289_v43 }
 0x33b   : > { %v6114_v51 = vpop.eup %6113  ;;  %v2606_v38 = vadd.f32 %v2605_v31, %v7289_v43  ;;  %v2694_v39 = vpop.f32.mrb[93].mxu1  ;;  %5323 = vmatmul.mubr.msk.f32.gmra.mrb[108].mxu1 %vm1160_vm1, %v7353_v21  ;;  %3069 = vmatprep.mubr.f32.mxu0 %v6506_v1  ;;  %v5562_v41 = vpack.c.bf16 %v6112_v35, %v7399_v24  ;;  %6135 = vtanh.f32 %v2604_v36 }
 0x33c   : > { %v6116_v42 = vpop.eup %6115  ;;  %v2695_v45 = vadd.f32 %v2694_v39, %v7289_v43  ;;  %3158 = vmatprep.mubr.f32.mxu1 %v6506_v1  ;;  %v5570_v0 = vpack.c.bf16 %v6114_v51, %v6106_v29  ;;  %6137 = vtanh.f32 %v2693_v48  ;;  %v2609_v47 = vpop.f32.mrb[94].mxu0 }
 0x33d   : > { %v6118_v46 = vpop.eup %6117  ;;  %v5560_v49 = vpack.c.bf16 %v6116_v42, %v6108_v37  ;;  %6139 = vtanh.f32 %v2606_v38  ;;  %v2610_v52 = vadd.f32 %v2609_v47, %v7295_v56  ;;  %v2698_v55 = vpop.f32.mrb[94].mxu1 }
 0x33e   : > { %v6120_v50 = vpop.eup %6119  ;;  %v2611_v57 = vpop.f32.mrb[95].mxu0  ;;  %5320 = vmatmul.mubr.msk.f32.gmra.mrb[110].mxu0 %vm1160_vm1, %v7369_v40  ;;  %v5568_v58 = vpack.c.bf16 %v6118_v46, %v6110_v34  ;;  %6141 = vtanh.f32 %v2695_v45  ;;  %v2699_v43 = vadd.f32 %v2698_v55, %v7295_v56 }
 0x33f   : > { %v6122_v59 = vpop.eup %6121  ;;  %v2612_v60 = vadd.f32 %v2611_v57, %v7295_v56  ;;  %v2700_v61 = vpop.f32.mrb[95].mxu1  ;;  %5324 = vmatmul.mubr.msk.f32.gmra.mrb[110].mxu1 %vm1160_vm1, %v7369_v40  ;;  %5561 = vmatprep.subr.bf16.mxu0 %v5560_v49  ;;  %6143 = vtanh.f32 %v2610_v52 }
 0x340   : > { %v6124_v62 = vpop.eup %6123  ;;  %v2701_v53 = vadd.f32 %v2700_v61, %v7295_v56  ;;  %5569 = vmatprep.subr.bf16.mxu1 %v5568_v58  ;;  %5563 = vmatpush1.bf16.msra.mxu0 %v5562_v41  ;;  %6145 = vtanh.f32 %v2699_v43 }
 0x341   : > { %v6126_v3 = vpop.eup %6125  ;;  %5571 = vmatpush1.bf16.msra.mxu1 %v5570_v0  ;;  %3229 = vmatprep.mubr.f32.mxu0 %v6506_v1  ;;  %6147 = vtanh.f32 %v2612_v60 }
 0x342   : > { %v6128_v4 = vpop.eup %6127  ;;  %3318 = vmatprep.mubr.f32.mxu1 %v6506_v1  ;;  %6149 = vtanh.f32 %v2701_v53 }
 0x343   : > { %v6130_v54 = vpop.eup %6129  ;;  %5325 = vmatmul.mubr.msk.f32.vlgmr.msra.gmra.mrb[112].mxu0 %vm1160_vm1, %v7321_v2  ;;  %v5574_v5 = vpack.c.bf16 %v6128_v4, %v6120_v50 }
 0x344   : > { %v6132_v6 = vpop.eup %6131  ;;  %5329 = vmatmul.mubr.msk.f32.vlgmr.msra.gmra.mrb[112].mxu1 %vm1160_vm1, %v7321_v2  ;;  %3235 = vmatprep.mubr.f32.mxu0 %v6506_v1  ;;  %v5582_v56 = vpack.c.bf16 %v6130_v54, %v6122_v59 }
 0x345   : > { %v6134_v7 = vpop.eup %6133  ;;  %3324 = vmatprep.mubr.f32.mxu1 %v6506_v1  ;;  %v5572_v10 = vpack.c.bf16 %v6132_v6, %v6124_v62 }
 0x346   : > { %v6136_v11 = vpop.eup %6135  ;;  %v5580_v12 = vpack.c.bf16 %v6134_v7, %v6126_v3 }
 0x347   : > { %v6138_v13 = vpop.eup %6137  ;;  %5326 = vmatmul.mubr.msk.f32.gmra.mrb[114].mxu0 %vm1160_vm1, %v7334_v14  ;;  %5573 = vmatprep.subr.bf16.mxu0 %v5572_v10 }
 0x348   : > { %v6140_v63 = vpop.eup %6139  ;;  %5330 = vmatmul.mubr.msk.f32.gmra.mrb[114].mxu1 %vm1160_vm1, %v7334_v14  ;;  %5581 = vmatprep.subr.bf16.mxu1 %v5580_v12 }
 0x349   : > { %v6142_v15 = vpop.eup %6141  ;;  %5575 = vmatpush1.bf16.msra.mxu0 %v5574_v5  ;;  %5583 = vmatpush1.bf16.msra.mxu1 %v5582_v56 }
 0x34a   : > { %v6144_v16 = vpop.eup %6143  ;;  %3241 = vmatprep.mubr.f32.mxu0 %v6506_v1  ;;  %3330 = vmatprep.mubr.f32.mxu1 %v6506_v1 }
 0x34b   : > { %v6146_v18 = vpop.eup %6145  ;;  %5327 = vmatmul.mubr.msk.f32.gmra.mrb[116].mxu0 %vm1160_vm1, %v7353_v21  ;;  %v5578_v19 = vpack.c.bf16 %v6144_v16, %v6136_v11 }
 0x34c   : > { %v6148_v8 = vpop.eup %6147  ;;  %5331 = vmatmul.mubr.msk.f32.gmra.mrb[116].mxu1 %vm1160_vm1, %v7353_v21  ;;  %3247 = vmatprep.mubr.f32.mxu0 %v6506_v1  ;;  %v5586_v20 = vpack.c.bf16 %v6146_v18, %v6138_v13 }
 0x34d   : > { %v6150_v22 = vpop.eup %6149  ;;  %3336 = vmatprep.mubr.f32.mxu1 %v6506_v1  ;;  %v5576_v23 = vpack.c.bf16 %v6148_v8, %v6140_v63 }
 0x34e   : > { %v5584_v24 = vpack.c.bf16 %v6150_v22, %v6142_v15 }
 0x34f   : > { %5328 = vmatmul.mubr.msk.f32.gmra.mrb[118].mxu0 %vm1160_vm1, %v7369_v40  ;;  %5577 = vmatprep.subr.bf16.mxu0 %v5576_v23 }
 0x350   : > { %5332 = vmatmul.mubr.msk.f32.gmra.mrb[118].mxu1 %vm1160_vm1, %v7369_v40  ;;  %5585 = vmatprep.subr.bf16.mxu1 %v5584_v24 }
 0x351   : > { %5579 = vmatpush1.bf16.msra.mxu0 %v5578_v19  ;;  %5587 = vmatpush1.bf16.msra.mxu1 %v5586_v20 }
 0x352   : > { %3407 = vmatprep.mubr.f32.mxu0 %v6506_v1  ;;  %3496 = vmatprep.mubr.f32.mxu1 %v6506_v1 }
 0x354   : > { %5333 = vmatmul.mubr.msk.f32.vlgmr.msra.gmra.mrb[120].mxu0 %vm1160_vm1, %v7321_v2  ;;  %5337 = vmatmul.mubr.msk.f32.vlgmr.msra.gmra.mrb[120].mxu1 %vm1160_vm1, %v7321_v2  ;;  %v7480_v2 = vpop.permute.xlu0 %2779 }
 0x355   : > { %3413 = vmatprep.mubr.f32.mxu0 %v6506_v1  ;;  %3502 = vmatprep.mubr.f32.mxu1 %v6506_v1 }
 0x358   : > { %5334 = vmatmul.mubr.msk.f32.gmra.mrb[122].mxu0 %vm1160_vm1, %v7334_v14  ;;  %5338 = vmatmul.mubr.msk.f32.gmra.mrb[122].mxu1 %vm1160_vm1, %v7334_v14  ;;  %v7492_v44 = vpop.permute.xlu0 %2789 }
 0x359   : > { %3419 = vmatprep.mubr.f32.mxu0 %v6506_v1  ;;  %3508 = vmatprep.mubr.f32.mxu1 %v6506_v1 }
 0x35c   : > { %5335 = vmatmul.mubr.msk.f32.gmra.mrb[124].mxu0 %vm1160_vm1, %v7353_v21  ;;  %5339 = vmatmul.mubr.msk.f32.gmra.mrb[124].mxu1 %vm1160_vm1, %v7353_v21 }
 0x35d   : > { %3425 = vmatprep.mubr.f32.mxu0 %v6506_v1  ;;  %3514 = vmatprep.mubr.f32.mxu1 %v6506_v1 }
 0x360   : > { %5336 = vmatmul.mubr.msk.f32.gmra.mrb[126].mxu0 %vm1160_vm1, %v7369_v40  ;;  %5340 = vmatmul.mubr.msk.f32.gmra.mrb[126].mxu1 %vm1160_vm1, %v7369_v40  ;;  %v7486_v40 = vpop.permute.xlu1 %2784 }
 0x361   : > { %3691 = vmatprep.mubr.f32.mxu0 %v6506_v1  ;;  %3780 = vmatprep.mubr.f32.mxu1 %v6506_v1 }
 0x364   : > { %v7498_v0 = vpop.permute.xlu1 %2794 }
 0x3f3   : > { %v2875_v14 = vpop.f32.mrb[96].mxu0 }
 0x3f4   : > { %v2876_v25 = vadd.f32 %v2875_v14, %v7480_v2  ;;  %v2964_v21 = vpop.f32.mrb[96].mxu1  ;;  %v2877_v26 = vpop.f32.mrb[97].mxu0 }
 0x3f5   : > { %v2965_v27 = vadd.f32 %v2964_v21, %v7480_v2  ;;  %v2878_v28 = vadd.f32 %v2877_v26, %v7480_v2  ;;  %v2966_v29 = vpop.f32.mrb[97].mxu1 }
 0x3f6   : > { %6151 = vtanh.f32 %v2876_v25  ;;  %v2967_v9 = vadd.f32 %v2966_v29, %v7480_v2 }
 0x3f7   : > { %6153 = vtanh.f32 %v2965_v27  ;;  %v2881_v30 = vpop.f32.mrb[98].mxu0 }
 0x3f8   : > { %6155 = vtanh.f32 %v2878_v28  ;;  %v2882_v32 = vadd.f32 %v2881_v30, %v7486_v40  ;;  %v2970_v37 = vpop.f32.mrb[98].mxu1  ;;  %v2883_v33 = vpop.f32.mrb[99].mxu0 }
 0x3f9   : > { %6157 = vtanh.f32 %v2967_v9  ;;  %v2971_v34 = vadd.f32 %v2970_v37, %v7486_v40  ;;  %v2884_v17 = vadd.f32 %v2883_v33, %v7486_v40  ;;  %v2972_v35 = vpop.f32.mrb[99].mxu1 }
 0x3fa   : > { %6159 = vtanh.f32 %v2882_v32  ;;  %v2973_v36 = vadd.f32 %v2972_v35, %v7486_v40 }
 0x3fb   : > { %6161 = vtanh.f32 %v2971_v34  ;;  %v2887_v31 = vpop.f32.mrb[100].mxu0 }
 0x3fc   : > { %6163 = vtanh.f32 %v2884_v17  ;;  %v2888_v51 = vadd.f32 %v2887_v31, %v7492_v44  ;;  %v2976_v48 = vpop.f32.mrb[100].mxu1  ;;  %v2889_v38 = vpop.f32.mrb[101].mxu0 }
 0x3fd   : > { %6165 = vtanh.f32 %v2973_v36  ;;  %v2977_v39 = vadd.f32 %v2976_v48, %v7492_v44  ;;  %v2890_v41 = vadd.f32 %v2889_v38, %v7492_v44  ;;  %v2978_v42 = vpop.f32.mrb[101].mxu1 }
 0x3fe   : > { %6167 = vtanh.f32 %v2888_v51  ;;  %v2979_v45 = vadd.f32 %v2978_v42, %v7492_v44 }
 0x3ff   : > { %6169 = vtanh.f32 %v2977_v39  ;;  %v2893_v46 = vpop.f32.mrb[102].mxu0 }
 0x400   : > { %v6152_v47 = vpop.eup %6151  ;;  %6171 = vtanh.f32 %v2890_v41  ;;  %v2894_v49 = vadd.f32 %v2893_v46, %v7498_v0  ;;  %v2982_v50 = vpop.f32.mrb[102].mxu1 }
 0x401   : > { %v2895_v52 = vpop.f32.mrb[103].mxu0  ;;  %v6154_v55 = vpop.eup %6153  ;;  %6173 = vtanh.f32 %v2979_v45  ;;  %v2983_v57 = vadd.f32 %v2982_v50, %v7498_v0 }
 0x402   : > { %v2896_v58 = vadd.f32 %v2895_v52, %v7498_v0  ;;  %v2984_v59 = vpop.f32.mrb[103].mxu1  ;;  %v6156_v43 = vpop.eup %6155  ;;  %6175 = vtanh.f32 %v2894_v49 }
 0x403   : > { %v2985_v60 = vadd.f32 %v2984_v59, %v7498_v0  ;;  %v6158_v61 = vpop.eup %6157  ;;  %6177 = vtanh.f32 %v2983_v57  ;;  %v7522_v57 = vld [vmem:[%s7839_s3 + $0x60] sm:$0xff] }
 0x404   : > { %v6160_v62 = vpop.eup %6159  ;;  %6179 = vtanh.f32 %v2896_v58 }
 0x405   : > { %v3053_v53 = vpop.f32.mrb[104].mxu0  ;;  %v6162_v3 = vpop.eup %6161  ;;  %6181 = vtanh.f32 %v2985_v60  ;;  %v5590_v6 = vpack.c.bf16 %v6160_v62, %v6152_v47 }
 0x406   : > { %v3054_v4 = vadd.f32 %v3053_v53, %v7480_v2  ;;  %v3142_v54 = vpop.f32.mrb[104].mxu1  ;;  %v3055_v5 = vpop.f32.mrb[105].mxu0  ;;  %v5598_v12 = vpack.c.bf16 %v6162_v3, %v6154_v55 }
 0x407   : > { %v6164_v56 = vpop.eup %6163  ;;  %v3143_v7 = vadd.f32 %v3142_v54, %v7480_v2  ;;  %v3056_v10 = vadd.f32 %v3055_v5, %v7480_v2  ;;  %v3144_v11 = vpop.f32.mrb[105].mxu1  ;;  %v7534_v54 = vld [vmem:[%s7839_s3 + $0x68] sm:$0xff] }
 0x408   : > { %v6166_v13 = vpop.eup %6165  ;;  %6183 = vtanh.f32 %v3054_v4  ;;  %v3145_v63 = vadd.f32 %v3144_v11, %v7480_v2  ;;  %v5588_v15 = vpack.c.bf16 %v6164_v56, %v6156_v43 }
 0x409   : > { %v6168_v16 = vpop.eup %6167  ;;  %6185 = vtanh.f32 %v3143_v7  ;;  %v3059_v18 = vpop.f32.mrb[106].mxu0  ;;  %v5596_v19 = vpack.c.bf16 %v6166_v13, %v6158_v61 }
 0x40a   : > { %v6170_v8 = vpop.eup %6169  ;;  %6187 = vtanh.f32 %v3056_v10  ;;  %v3060_v20 = vadd.f32 %v3059_v18, %v7486_v40  ;;  %v3148_v22 = vpop.f32.mrb[106].mxu1  ;;  %5589 = vmatprep.subr.bf16.mxu0 %v5588_v15 }
 0x40b   : > { %v3061_v23 = vpop.f32.mrb[107].mxu0  ;;  %v6172_v24 = vpop.eup %6171  ;;  %6189 = vtanh.f32 %v3145_v63  ;;  %v3149_v14 = vadd.f32 %v3148_v22, %v7486_v40  ;;  %5597 = vmatprep.subr.bf16.mxu1 %v5596_v19  ;;  %5591 = vmatpush1.bf16.msra.mxu0 %v5590_v6 }
 0x40c   : > { %v3062_v25 = vadd.f32 %v3061_v23, %v7486_v40  ;;  %v3150_v21 = vpop.f32.mrb[107].mxu1  ;;  %v6174_v26 = vpop.eup %6173  ;;  %6191 = vtanh.f32 %v3060_v20  ;;  %5599 = vmatpush1.bf16.msra.mxu1 %v5598_v12  ;;  %v7552_v23 = vld [vmem:[%s7839_s3 + $0x70] sm:$0xff] }
 0x40d   : > { %v3151_v27 = vadd.f32 %v3150_v21, %v7486_v40  ;;  %v6176_v28 = vpop.eup %6175  ;;  %6193 = vtanh.f32 %v3149_v14  ;;  %v3065_v29 = vpop.f32.mrb[108].mxu0 }
 0x40e   : > { %v6178_v9 = vpop.eup %6177  ;;  %6195 = vtanh.f32 %v3062_v25  ;;  %v3066_v30 = vadd.f32 %v3065_v29, %v7492_v44  ;;  %v3154_v32 = vpop.f32.mrb[108].mxu1  ;;  %v5594_v33 = vpack.c.bf16 %v6176_v28, %v6168_v16 }
 0x40f   : > { %v3067_v37 = vpop.f32.mrb[109].mxu0  ;;  %v6180_v34 = vpop.eup %6179  ;;  %6197 = vtanh.f32 %v3151_v27  ;;  %v3155_v17 = vadd.f32 %v3154_v32, %v7492_v44  ;;  %v5602_v31 = vpack.c.bf16 %v6178_v9, %v6170_v8 }
 0x410   : > { %v3068_v35 = vadd.f32 %v3067_v37, %v7492_v44  ;;  %v3156_v36 = vpop.f32.mrb[109].mxu1  ;;  %v6182_v51 = vpop.eup %6181  ;;  %6199 = vtanh.f32 %v3066_v30  ;;  %v5592_v38 = vpack.c.bf16 %v6180_v34, %v6172_v24 }
 0x411   : > { %v3157_v48 = vadd.f32 %v3156_v36, %v7492_v44  ;;  %6201 = vtanh.f32 %v3155_v17  ;;  %v3071_v39 = vpop.f32.mrb[110].mxu0  ;;  %v5600_v41 = vpack.c.bf16 %v6182_v51, %v6174_v26 }
 0x412   : > { %v6184_v42 = vpop.eup %6183  ;;  %6203 = vtanh.f32 %v3068_v35  ;;  %v3072_v45 = vadd.f32 %v3071_v39, %v7498_v0  ;;  %v3160_v46 = vpop.f32.mrb[110].mxu1  ;;  %5593 = vmatprep.subr.bf16.mxu0 %v5592_v38 }
 0x413   : > { %v3073_v47 = vpop.f32.mrb[111].mxu0  ;;  %v6186_v49 = vpop.eup %6185  ;;  %6205 = vtanh.f32 %v3157_v48  ;;  %v3161_v50 = vadd.f32 %v3160_v46, %v7498_v0  ;;  %5601 = vmatprep.subr.bf16.mxu1 %v5600_v41  ;;  %5595 = vmatpush1.bf16.msra.mxu0 %v5594_v33  ;;  %v7568_v33 = vld [vmem:[%s7839_s3 + $0x78] sm:$0xff] }
 0x414   : > { %v3074_v52 = vadd.f32 %v3073_v47, %v7498_v0  ;;  %v3162_v55 = vpop.f32.mrb[111].mxu1  ;;  %v6188_v58 = vpop.eup %6187  ;;  %6207 = vtanh.f32 %v3072_v45  ;;  %5603 = vmatpush1.bf16.msra.mxu1 %v5602_v31 }
 0x415   : > { %v3163_v59 = vadd.f32 %v3162_v55, %v7498_v0  ;;  %v6190_v43 = vpop.eup %6189  ;;  %6209 = vtanh.f32 %v3161_v50 }
 0x416   : > { %v6192_v60 = vpop.eup %6191  ;;  %6211 = vtanh.f32 %v3074_v52  ;;  %v3231_v61 = vpop.f32.mrb[112].mxu0  ;;  %5349 = vmatmul.mubr.msk.f32.vlgmr.msra.gmra.mrb[128].mxu0 %vm1160_vm1, %v7522_v57 }
 0x417   : > { %v6194_v62 = vpop.eup %6193  ;;  %6213 = vtanh.f32 %v3163_v59  ;;  %v3232_v53 = vadd.f32 %v3231_v61, %v7480_v2  ;;  %v3320_v3 = vpop.f32.mrb[112].mxu1  ;;  %5353 = vmatmul.mubr.msk.f32.vlgmr.msra.gmra.mrb[128].mxu1 %vm1160_vm1, %v7522_v57  ;;  %3697 = vmatprep.mubr.f32.mxu0 %v6506_v1  ;;  %v5606_v5 = vpack.c.bf16 %v6192_v60, %v6184_v42 }
 0x418   : > { %v3233_v4 = vpop.f32.mrb[113].mxu0  ;;  %v6196_v6 = vpop.eup %6195  ;;  %v3321_v56 = vadd.f32 %v3320_v3, %v7480_v2  ;;  %3786 = vmatprep.mubr.f32.mxu1 %v6506_v1  ;;  %v5614_v11 = vpack.c.bf16 %v6194_v62, %v6186_v49 }
 0x419   : > { %v3234_v7 = vadd.f32 %v3233_v4, %v7480_v2  ;;  %v3322_v10 = vpop.f32.mrb[113].mxu1  ;;  %v6198_v12 = vpop.eup %6197  ;;  %6215 = vtanh.f32 %v3232_v53  ;;  %v5604_v63 = vpack.c.bf16 %v6196_v6, %v6188_v58 }
 0x41a   : > { %v3323_v13 = vadd.f32 %v3322_v10, %v7480_v2  ;;  %v7540_v15 = vpop.eup %6199  ;;  %6217 = vtanh.f32 %v3321_v56  ;;  %v3237_v16 = vpop.f32.mrb[114].mxu0  ;;  %5350 = vmatmul.mubr.msk.f32.gmra.mrb[130].mxu0 %vm1160_vm1, %v7534_v54  ;;  %v5612_v18 = vpack.c.bf16 %v6198_v12, %v6190_v43 }
 0x41b   : > { %v7544_v19 = vpop.eup %6201  ;;  %6219 = vtanh.f32 %v3234_v7  ;;  %v3238_v8 = vadd.f32 %v3237_v16, %v7486_v40  ;;  %v3326_v20 = vpop.f32.mrb[114].mxu1  ;;  %5354 = vmatmul.mubr.msk.f32.gmra.mrb[130].mxu1 %vm1160_vm1, %v7534_v54  ;;  %5605 = vmatprep.subr.bf16.mxu0 %v5604_v63 }
 0x41c   : > { %v3239_v22 = vpop.f32.mrb[115].mxu0  ;;  %v6204_v24 = vpop.eup %6203  ;;  %6221 = vtanh.f32 %v3323_v13  ;;  %v3327_v14 = vadd.f32 %v3326_v20, %v7486_v40  ;;  %5613 = vmatprep.subr.bf16.mxu1 %v5612_v18  ;;  %5607 = vmatpush1.bf16.msra.mxu0 %v5606_v5 }
 0x41d   : > { %v3240_v25 = vadd.f32 %v3239_v22, %v7486_v40  ;;  %v3328_v21 = vpop.f32.mrb[115].mxu1  ;;  %v6206_v26 = vpop.eup %6205  ;;  %6223 = vtanh.f32 %v3238_v8  ;;  %5615 = vmatpush1.bf16.msra.mxu1 %v5614_v11  ;;  %3703 = vmatprep.mubr.f32.mxu0 %v6506_v1 }
 0x41e   : > { %v3329_v27 = vadd.f32 %v3328_v21, %v7486_v40  ;;  %v6208_v28 = vpop.eup %6207  ;;  %6225 = vtanh.f32 %v3327_v14  ;;  %v3243_v29 = vpop.f32.mrb[116].mxu0  ;;  %3792 = vmatprep.mubr.f32.mxu1 %v6506_v1  ;;  %5351 = vmatmul.mubr.msk.f32.gmra.mrb[132].mxu0 %vm1160_vm1, %v7552_v23 }
 0x41f   : > { %v6210_v9 = vpop.eup %6209  ;;  %6227 = vtanh.f32 %v3240_v25  ;;  %v3244_v30 = vadd.f32 %v3243_v29, %v7492_v44  ;;  %v3332_v32 = vpop.f32.mrb[116].mxu1  ;;  %5355 = vmatmul.mubr.msk.f32.gmra.mrb[132].mxu1 %vm1160_vm1, %v7552_v23  ;;  %3709 = vmatprep.mubr.f32.mxu0 %v6506_v1  ;;  %v5610_v34 = vpack.c.bf16 %v6208_v28, %v7540_v15 }
 0x420   : > { %v3245_v37 = vpop.f32.mrb[117].mxu0  ;;  %v6212_v17 = vpop.eup %6211  ;;  %6229 = vtanh.f32 %v3329_v27  ;;  %v3333_v35 = vadd.f32 %v3332_v32, %v7492_v44  ;;  %3798 = vmatprep.mubr.f32.mxu1 %v6506_v1  ;;  %v5618_v51 = vpack.c.bf16 %v6210_v9, %v7544_v19 }
 0x421   : > { %v3246_v36 = vadd.f32 %v3245_v37, %v7492_v44  ;;  %v3334_v31 = vpop.f32.mrb[117].mxu1  ;;  %v6214_v48 = vpop.eup %6213  ;;  %6231 = vtanh.f32 %v3244_v30  ;;  %v5608_v39 = vpack.c.bf16 %v6212_v17, %v6204_v24 }
 0x422   : > { %v3335_v38 = vadd.f32 %v3334_v31, %v7492_v44  ;;  %6233 = vtanh.f32 %v3333_v35  ;;  %v3249_v41 = vpop.f32.mrb[118].mxu0  ;;  %5352 = vmatmul.mubr.msk.f32.gmra.mrb[134].mxu0 %vm1160_vm1, %v7568_v33  ;;  %v5616_v42 = vpack.c.bf16 %v6214_v48, %v6206_v26 }
 0x423   : > { %v7578_v45 = vpop.eup %6215  ;;  %6235 = vtanh.f32 %v3246_v36  ;;  %v3250_v46 = vadd.f32 %v3249_v41, %v7498_v0  ;;  %v3338_v47 = vpop.f32.mrb[118].mxu1  ;;  %5356 = vmatmul.mubr.msk.f32.gmra.mrb[134].mxu1 %vm1160_vm1, %v7568_v33  ;;  %5609 = vmatprep.subr.bf16.mxu0 %v5608_v39 }
 0x424   : > { %v3251_v49 = vpop.f32.mrb[119].mxu0  ;;  %v6218_v50 = vpop.eup %6217  ;;  %6237 = vtanh.f32 %v3335_v38  ;;  %v3339_v52 = vadd.f32 %v3338_v47, %v7498_v0  ;;  %5617 = vmatprep.subr.bf16.mxu1 %v5616_v42  ;;  %5611 = vmatpush1.bf16.msra.mxu0 %v5610_v34 }
 0x425   : > { %v3252_v55 = vadd.f32 %v3251_v49, %v7498_v0  ;;  %v3340_v58 = vpop.f32.mrb[119].mxu1  ;;  %v6220_v59 = vpop.eup %6219  ;;  %6239 = vtanh.f32 %v3250_v46  ;;  %5619 = vmatpush1.bf16.msra.mxu1 %v5618_v51  ;;  %3869 = vmatprep.mubr.f32.mxu0 %v6506_v1 }
 0x426   : > { %v3341_v43 = vadd.f32 %v3340_v58, %v7498_v0  ;;  %v6222_v60 = vpop.eup %6221  ;;  %6241 = vtanh.f32 %v3339_v52  ;;  %3958 = vmatprep.mubr.f32.mxu1 %v6506_v1 }
 0x427   : > { %v6224_v61 = vpop.eup %6223  ;;  %6243 = vtanh.f32 %v3252_v55  ;;  %v3409_v62 = vpop.f32.mrb[120].mxu0  ;;  %5357 = vmatmul.mubr.msk.f32.vlgmr.msra.gmra.mrb[136].mxu0 %vm1160_vm1, %v7522_v57 }
 0x428   : > { %v3498_v53 = vpop.f32.mrb[120].mxu1  ;;  %v6226_v3 = vpop.eup %6225  ;;  %6245 = vtanh.f32 %v3341_v43  ;;  %v3410_v4 = vadd.f32 %v3409_v62, %v7480_v2  ;;  %5361 = vmatmul.mubr.msk.f32.vlgmr.msra.gmra.mrb[136].mxu1 %vm1160_vm1, %v7522_v57  ;;  %3875 = vmatprep.mubr.f32.mxu0 %v6506_v1  ;;  %v5622_v7 = vpack.c.bf16 %v6224_v61, %v7578_v45 }
 0x429   : > { %v3499_v5 = vadd.f32 %v3498_v53, %v7480_v2  ;;  %v3411_v6 = vpop.f32.mrb[121].mxu0  ;;  %v3500_v56 = vpop.f32.mrb[121].mxu1  ;;  %3964 = vmatprep.mubr.f32.mxu1 %v6506_v1  ;;  %v5630_v13 = vpack.c.bf16 %v6226_v3, %v6218_v50 }
 0x42a   : > { %v6228_v10 = vpop.eup %6227  ;;  %v3412_v11 = vadd.f32 %v3411_v6, %v7480_v2  ;;  %v3501_v12 = vadd.f32 %v3500_v56, %v7480_v2  ;;  %6247 = vtanh.f32 %v3410_v4 }
 0x42b   : > { %v6230_v63 = vpop.eup %6229  ;;  %v5620_v15 = vpack.c.bf16 %v6228_v10, %v6220_v59  ;;  %6249 = vtanh.f32 %v3499_v5  ;;  %v3415_v18 = vpop.f32.mrb[122].mxu0  ;;  %5358 = vmatmul.mubr.msk.f32.gmra.mrb[138].mxu0 %vm1160_vm1, %v7534_v54 }
 0x42c   : > { %v7599_v16 = vpop.eup %6231  ;;  %v3504_v19 = vpop.f32.mrb[122].mxu1  ;;  %v5628_v8 = vpack.c.bf16 %v6230_v63, %v6222_v60  ;;  %6251 = vtanh.f32 %v3412_v11  ;;  %v3416_v2 = vadd.f32 %v3415_v18, %v7486_v40  ;;  %5362 = vmatmul.mubr.msk.f32.gmra.mrb[138].mxu1 %vm1160_vm1, %v7534_v54  ;;  %3881 = vmatprep.mubr.f32.mxu0 %v6506_v1 }
 0x42d   : > { %v7603_v20 = vpop.eup %6233  ;;  %v3505_v22 = vadd.f32 %v3504_v19, %v7486_v40  ;;  %v3417_v24 = vpop.f32.mrb[123].mxu0  ;;  %5621 = vmatprep.subr.bf16.mxu0 %v5620_v15  ;;  %6253 = vtanh.f32 %v3501_v12  ;;  %3970 = vmatprep.mubr.f32.mxu1 %v6506_v1 }
 0x42e   : > { %v3506_v14 = vpop.f32.mrb[123].mxu1  ;;  %v6236_v25 = vpop.eup %6235  ;;  %v3418_v21 = vadd.f32 %v3417_v24, %v7486_v40  ;;  %5629 = vmatprep.subr.bf16.mxu1 %v5628_v8  ;;  %5623 = vmatpush1.bf16.msra.mxu0 %v5622_v7  ;;  %6255 = vtanh.f32 %v3416_v2 }
 0x42f   : > { %v3507_v26 = vadd.f32 %v3506_v14, %v7486_v40  ;;  %v6238_v27 = vpop.eup %6237  ;;  %5631 = vmatpush1.bf16.msra.mxu1 %v5630_v13  ;;  %6257 = vtanh.f32 %v3505_v22  ;;  %v3421_v29 = vpop.f32.mrb[124].mxu0  ;;  %5359 = vmatmul.mubr.msk.f32.gmra.mrb[140].mxu0 %vm1160_vm1, %v7552_v23 }
 0x430   : > { %v6240_v28 = vpop.eup %6239  ;;  %v3510_v9 = vpop.f32.mrb[124].mxu1  ;;  %6259 = vtanh.f32 %v3418_v21  ;;  %v3422_v40 = vadd.f32 %v3421_v29, %v7492_v44  ;;  %5363 = vmatmul.mubr.msk.f32.gmra.mrb[140].mxu1 %vm1160_vm1, %v7552_v23  ;;  %3887 = vmatprep.mubr.f32.mxu0 %v6506_v1 }
 0x431   : > { %v6242_v30 = vpop.eup %6241  ;;  %v3511_v32 = vadd.f32 %v3510_v9, %v7492_v44  ;;  %v3423_v37 = vpop.f32.mrb[125].mxu0  ;;  %v5626_v17 = vpack.c.bf16 %v6240_v28, %v7599_v16  ;;  %6261 = vtanh.f32 %v3507_v26  ;;  %3976 = vmatprep.mubr.f32.mxu1 %v6506_v1 }
 0x432   : > { %v3512_v34 = vpop.f32.mrb[125].mxu1  ;;  %v6244_v35 = vpop.eup %6243  ;;  %v3424_v36 = vadd.f32 %v3423_v37, %v7492_v44  ;;  %v5634_v51 = vpack.c.bf16 %v6242_v30, %v7603_v20  ;;  %6263 = vtanh.f32 %v3422_v40 }
 0x433   : > { %v3513_v31 = vadd.f32 %v3512_v34, %v7492_v44  ;;  %v6246_v48 = vpop.eup %6245  ;;  %v5624_v38 = vpack.c.bf16 %v6244_v35, %v6236_v25  ;;  %6265 = vtanh.f32 %v3511_v32  ;;  %v3427_v39 = vpop.f32.mrb[126].mxu0  ;;  %5360 = vmatmul.mubr.msk.f32.gmra.mrb[142].mxu0 %vm1160_vm1, %v7568_v33 }
 0x434   : > { %v3516_v41 = vpop.f32.mrb[126].mxu1  ;;  %v5632_v42 = vpack.c.bf16 %v6246_v48, %v6238_v27  ;;  %v6248_v45 = vpop.eup %6247  ;;  %6267 = vtanh.f32 %v3424_v36  ;;  %v3428_v46 = vadd.f32 %v3427_v39, %v7498_v0  ;;  %5364 = vmatmul.mubr.msk.f32.gmra.mrb[142].mxu1 %vm1160_vm1, %v7568_v33  ;;  %4047 = vmatprep.mubr.f32.mxu0 %v6506_v1 }
 0x435   : > { %v3517_v44 = vadd.f32 %v3516_v41, %v7498_v0  ;;  %v3429_v47 = vpop.f32.mrb[127].mxu0  ;;  %v3518_v49 = vpop.f32.mrb[127].mxu1  ;;  %5625 = vmatprep.subr.bf16.mxu0 %v5624_v38  ;;  %6269 = vtanh.f32 %v3513_v31  ;;  %4136 = vmatprep.mubr.f32.mxu1 %v6506_v1 }
 0x436   : > { %v6250_v50 = vpop.eup %6249  ;;  %v3430_v52 = vadd.f32 %v3429_v47, %v7498_v0  ;;  %v3519_v55 = vadd.f32 %v3518_v49, %v7498_v0  ;;  %5633 = vmatprep.subr.bf16.mxu1 %v5632_v42  ;;  %5627 = vmatpush1.bf16.msra.mxu0 %v5626_v17  ;;  %6271 = vtanh.f32 %v3428_v46 }
 0x437   : > { %v6252_v58 = vpop.eup %6251  ;;  %5635 = vmatpush1.bf16.msra.mxu1 %v5634_v51  ;;  %6273 = vtanh.f32 %v3517_v44 }
 0x438   : > { %v6254_v59 = vpop.eup %6253  ;;  %6275 = vtanh.f32 %v3430_v52 }
 0x439   : > { %v6256_v43 = vpop.eup %6255  ;;  %5365 = vmatmul.mubr.msk.f32.vlgmr.msra.gmra.mrb[144].mxu0 %vm1160_vm1, %v7522_v57  ;;  %6277 = vtanh.f32 %v3519_v55 }
 0x43a   : > { %v6258_v60 = vpop.eup %6257  ;;  %5369 = vmatmul.mubr.msk.f32.vlgmr.msra.gmra.mrb[144].mxu1 %vm1160_vm1, %v7522_v57  ;;  %4053 = vmatprep.mubr.f32.mxu0 %v6506_v1  ;;  %v5638_v0 = vpack.c.bf16 %v6256_v43, %v6248_v45 }
 0x43b   : > { %v6260_v61 = vpop.eup %6259  ;;  %4142 = vmatprep.mubr.f32.mxu1 %v6506_v1  ;;  %v5646_v62 = vpack.c.bf16 %v6258_v60, %v6250_v50 }
 0x43c   : > { %v6262_v53 = vpop.eup %6261  ;;  %v5636_v3 = vpack.c.bf16 %v6260_v61, %v6252_v58 }
 0x43d   : > { %v6264_v4 = vpop.eup %6263  ;;  %5366 = vmatmul.mubr.msk.f32.gmra.mrb[146].mxu0 %vm1160_vm1, %v7534_v54  ;;  %v5644_v5 = vpack.c.bf16 %v6262_v53, %v6254_v59 }
 0x43e   : > { %v6266_v6 = vpop.eup %6265  ;;  %5370 = vmatmul.mubr.msk.f32.gmra.mrb[146].mxu1 %vm1160_vm1, %v7534_v54  ;;  %5637 = vmatprep.subr.bf16.mxu0 %v5636_v3 }
 0x43f   : > { %v6268_v56 = vpop.eup %6267  ;;  %5645 = vmatprep.subr.bf16.mxu1 %v5644_v5  ;;  %5639 = vmatpush1.bf16.msra.mxu0 %v5638_v0 }
 0x440   : > { %v6270_v7 = vpop.eup %6269  ;;  %5647 = vmatpush1.bf16.msra.mxu1 %v5646_v62  ;;  %4059 = vmatprep.mubr.f32.mxu0 %v6506_v1 }
 0x441   : > { %v6272_v10 = vpop.eup %6271  ;;  %4148 = vmatprep.mubr.f32.mxu1 %v6506_v1  ;;  %5367 = vmatmul.mubr.msk.f32.gmra.mrb[148].mxu0 %vm1160_vm1, %v7552_v23 }
 0x442   : > { %v6274_v11 = vpop.eup %6273  ;;  %5371 = vmatmul.mubr.msk.f32.gmra.mrb[148].mxu1 %vm1160_vm1, %v7552_v23  ;;  %4065 = vmatprep.mubr.f32.mxu0 %v6506_v1  ;;  %v5642_v12 = vpack.c.bf16 %v6272_v10, %v6264_v4 }
 0x443   : > { %v6276_v13 = vpop.eup %6275  ;;  %4154 = vmatprep.mubr.f32.mxu1 %v6506_v1  ;;  %v5650_v63 = vpack.c.bf16 %v6274_v11, %v6266_v6 }
 0x444   : > { %v6278_v15 = vpop.eup %6277  ;;  %v5640_v16 = vpack.c.bf16 %v6276_v13, %v6268_v56 }
 0x445   : > { %5368 = vmatmul.mubr.msk.f32.gmra.mrb[150].mxu0 %vm1160_vm1, %v7568_v33  ;;  %v5648_v18 = vpack.c.bf16 %v6278_v15, %v6270_v7 }
 0x446   : > { %5372 = vmatmul.mubr.msk.f32.gmra.mrb[150].mxu1 %vm1160_vm1, %v7568_v33  ;;  %5641 = vmatprep.subr.bf16.mxu0 %v5640_v16 }
 0x447   : > { %5649 = vmatprep.subr.bf16.mxu1 %v5648_v18  ;;  %5643 = vmatpush1.bf16.msra.mxu0 %v5642_v12 }
 0x448   : > { %5651 = vmatpush1.bf16.msra.mxu1 %v5650_v63  ;;  %4225 = vmatprep.mubr.f32.mxu0 %v6506_v1 }
 0x449   : > { %4314 = vmatprep.mubr.f32.mxu1 %v6506_v1 }
 0x44a   : > { %5373 = vmatmul.mubr.msk.f32.vlgmr.msra.gmra.mrb[152].mxu0 %vm1160_vm1, %v7522_v57 }
 0x44b   : > { %5377 = vmatmul.mubr.msk.f32.vlgmr.msra.gmra.mrb[152].mxu1 %vm1160_vm1, %v7522_v57  ;;  %4231 = vmatprep.mubr.f32.mxu0 %v6506_v1  ;;  %v7683_v57 = vpop.permute.xlu0 %3597 }
 0x44c   : > { %4320 = vmatprep.mubr.f32.mxu1 %v6506_v1 }
 0x44e   : > { %5374 = vmatmul.mubr.msk.f32.gmra.mrb[154].mxu0 %vm1160_vm1, %v7534_v54 }
 0x44f   : > { %5378 = vmatmul.mubr.msk.f32.gmra.mrb[154].mxu1 %vm1160_vm1, %v7534_v54  ;;  %4237 = vmatprep.mubr.f32.mxu0 %v6506_v1  ;;  %v7695_v30 = vpop.permute.xlu0 %3607 }
 0x450   : > { %4326 = vmatprep.mubr.f32.mxu1 %v6506_v1 }
 0x452   : > { %5375 = vmatmul.mubr.msk.f32.gmra.mrb[156].mxu0 %vm1160_vm1, %v7552_v23 }
 0x453   : > { %5379 = vmatmul.mubr.msk.f32.gmra.mrb[156].mxu1 %vm1160_vm1, %v7552_v23  ;;  %4243 = vmatprep.mubr.f32.mxu0 %v6506_v1 }
 0x454   : > { %4332 = vmatprep.mubr.f32.mxu1 %v6506_v1 }
 0x456   : > { %5376 = vmatmul.mubr.msk.f32.gmra.mrb[158].mxu0 %vm1160_vm1, %v7568_v33 }
 0x457   : > { %5380 = vmatmul.mubr.msk.f32.gmra.mrb[158].mxu1 %vm1160_vm1, %v7568_v33  ;;  %4481 = vmatprep.mubr.f32.mxu0 %v6506_v1  ;;  %v7689_v33 = vpop.permute.xlu1 %3602 }
 0x458   : > { %4552 = vmatprep.mubr.f32.mxu1 %v6506_v1 }
 0x45b   : > { %v7701_v51 = vpop.permute.xlu1 %3612 }
 0x4e9   : > { %v3693_v54 = vpop.f32.mrb[128].mxu0 }
 0x4ea   : > { %v3694_v19 = vadd.f32 %v3693_v54, %v7683_v57  ;;  %v3782_v23 = vpop.f32.mrb[128].mxu1  ;;  %v3695_v8 = vpop.f32.mrb[129].mxu0 }
 0x4eb   : > { %v3783_v20 = vadd.f32 %v3782_v23, %v7683_v57  ;;  %v3696_v2 = vadd.f32 %v3695_v8, %v7683_v57  ;;  %v3784_v22 = vpop.f32.mrb[129].mxu1 }
 0x4ec   : > { %6279 = vtanh.f32 %v3694_v19  ;;  %v3785_v24 = vadd.f32 %v3784_v22, %v7683_v57 }
 0x4ed   : > { %6281 = vtanh.f32 %v3783_v20  ;;  %v3699_v14 = vpop.f32.mrb[130].mxu0 }
 0x4ee   : > { %6283 = vtanh.f32 %v3696_v2  ;;  %v3700_v25 = vadd.f32 %v3699_v14, %v7689_v33  ;;  %v3788_v21 = vpop.f32.mrb[130].mxu1  ;;  %v3701_v26 = vpop.f32.mrb[131].mxu0 }
 0x4ef   : > { %6285 = vtanh.f32 %v3785_v24  ;;  %v3789_v27 = vadd.f32 %v3788_v21, %v7689_v33  ;;  %v3702_v28 = vadd.f32 %v3701_v26, %v7689_v33  ;;  %v3790_v29 = vpop.f32.mrb[131].mxu1 }
 0x4f0   : > { %6287 = vtanh.f32 %v3700_v25  ;;  %v3791_v9 = vadd.f32 %v3790_v29, %v7689_v33 }
 0x4f1   : > { %6289 = vtanh.f32 %v3789_v27  ;;  %v3705_v40 = vpop.f32.mrb[132].mxu0 }
 0x4f2   : > { %6291 = vtanh.f32 %v3702_v28  ;;  %v3706_v32 = vadd.f32 %v3705_v40, %v7695_v30  ;;  %v3794_v37 = vpop.f32.mrb[132].mxu1  ;;  %v3707_v34 = vpop.f32.mrb[133].mxu0 }
 0x4f3   : > { %6293 = vtanh.f32 %v3791_v9  ;;  %v3795_v17 = vadd.f32 %v3794_v37, %v7695_v30  ;;  %v3708_v35 = vadd.f32 %v3707_v34, %v7695_v30  ;;  %v3796_v36 = vpop.f32.mrb[133].mxu1 }
 0x4f4   : > { %6295 = vtanh.f32 %v3706_v32  ;;  %v3797_v31 = vadd.f32 %v3796_v36, %v7695_v30 }
 0x4f5   : > { %6297 = vtanh.f32 %v3795_v17  ;;  %v3711_v48 = vpop.f32.mrb[134].mxu0 }
 0x4f6   : > { %v6280_v38 = vpop.eup %6279  ;;  %6299 = vtanh.f32 %v3708_v35  ;;  %v3712_v39 = vadd.f32 %v3711_v48, %v7701_v51  ;;  %v3800_v41 = vpop.f32.mrb[134].mxu1 }
 0x4f7   : > { %v3713_v42 = vpop.f32.mrb[135].mxu0  ;;  %v6282_v45 = vpop.eup %6281  ;;  %6301 = vtanh.f32 %v3797_v31  ;;  %v3801_v46 = vadd.f32 %v3800_v41, %v7701_v51 }
 0x4f8   : > { %v3714_v44 = vadd.f32 %v3713_v42, %v7701_v51  ;;  %v3802_v47 = vpop.f32.mrb[135].mxu1  ;;  %v6284_v49 = vpop.eup %6283  ;;  %6303 = vtanh.f32 %v3712_v39 }
 0x4f9   : > { %v3803_v50 = vadd.f32 %v3802_v47, %v7701_v51  ;;  %v6286_v52 = vpop.eup %6285  ;;  %6305 = vtanh.f32 %v3801_v46  ;;  %v7725_v46 = vld [vmem:[%s7841_s5] sm:$0x1] }
 0x4fa   : > { %v6288_v55 = vpop.eup %6287  ;;  %6307 = vtanh.f32 %v3714_v44  ;;  %v3871_v58 = vpop.f32.mrb[136].mxu0 }
 0x4fb   : > { %v6290_v59 = vpop.eup %6289  ;;  %6309 = vtanh.f32 %v3803_v50  ;;  %v3872_v43 = vadd.f32 %v3871_v58, %v7683_v57  ;;  %v3960_v60 = vpop.f32.mrb[136].mxu1  ;;  %v5654_v61 = vpack.c.bf16 %v6288_v55, %v6280_v38 }
 0x4fc   : > { %v3873_v0 = vpop.f32.mrb[137].mxu0  ;;  %v6292_v62 = vpop.eup %6291  ;;  %v3961_v53 = vadd.f32 %v3960_v60, %v7683_v57  ;;  %v5662_v5 = vpack.c.bf16 %v6290_v59, %v6282_v45 }
 0x4fd   : > { %v3874_v3 = vadd.f32 %v3873_v0, %v7683_v57  ;;  %v3962_v4 = vpop.f32.mrb[137].mxu1  ;;  %v6294_v6 = vpop.eup %6293  ;;  %6311 = vtanh.f32 %v3872_v43  ;;  %v5652_v7 = vpack.c.bf16 %v6292_v62, %v6284_v49 }
 0x4fe   : > { %v3963_v56 = vadd.f32 %v3962_v4, %v7683_v57  ;;  %v6296_v10 = vpop.eup %6295  ;;  %6313 = vtanh.f32 %v3961_v53  ;;  %v3877_v11 = vpop.f32.mrb[138].mxu0  ;;  %v5660_v12 = vpack.c.bf16 %v6294_v6, %v6286_v52 }
 0x4ff   : > { %v6298_v13 = vpop.eup %6297  ;;  %6315 = vtanh.f32 %v3874_v3  ;;  %v3878_v63 = vadd.f32 %v3877_v11, %v7689_v33  ;;  %v3966_v15 = vpop.f32.mrb[138].mxu1  ;;  %5653 = vmatprep.subr.bf16.mxu0 %v5652_v7 }
 0x500   : > { %v3879_v16 = vpop.f32.mrb[139].mxu0  ;;  %v6300_v18 = vpop.eup %6299  ;;  %6317 = vtanh.f32 %v3963_v56  ;;  %v3967_v54 = vadd.f32 %v3966_v15, %v7689_v33  ;;  %5661 = vmatprep.subr.bf16.mxu1 %v5660_v12  ;;  %5655 = vmatpush1.bf16.msra.mxu0 %v5654_v61 }
 0x501   : > { %v3880_v19 = vadd.f32 %v3879_v16, %v7689_v33  ;;  %v3968_v23 = vpop.f32.mrb[139].mxu1  ;;  %v6302_v8 = vpop.eup %6301  ;;  %6319 = vtanh.f32 %v3878_v63  ;;  %5663 = vmatpush1.bf16.msra.mxu1 %v5662_v5 }
 0x502   : > { %v3969_v20 = vadd.f32 %v3968_v23, %v7689_v33  ;;  %v6304_v2 = vpop.eup %6303  ;;  %6321 = vtanh.f32 %v3967_v54  ;;  %v3883_v22 = vpop.f32.mrb[140].mxu0 }
 0x503   : > { %v6306_v24 = vpop.eup %6305  ;;  %6323 = vtanh.f32 %v3880_v19  ;;  %v3884_v14 = vadd.f32 %v3883_v22, %v7695_v30  ;;  %v3972_v25 = vpop.f32.mrb[140].mxu1  ;;  %v5658_v26 = vpack.c.bf16 %v6304_v2, %v6296_v10 }
 0x504   : > { %v3885_v21 = vpop.f32.mrb[141].mxu0  ;;  %v6308_v27 = vpop.eup %6307  ;;  %6325 = vtanh.f32 %v3969_v20  ;;  %v3973_v28 = vadd.f32 %v3972_v25, %v7695_v30  ;;  %v5666_v40 = vpack.c.bf16 %v6306_v24, %v6298_v13 }
 0x505   : > { %v3886_v29 = vadd.f32 %v3885_v21, %v7695_v30  ;;  %v3974_v9 = vpop.f32.mrb[141].mxu1  ;;  %v6310_v32 = vpop.eup %6309  ;;  %6327 = vtanh.f32 %v3884_v14  ;;  %v5656_v34 = vpack.c.bf16 %v6308_v27, %v6300_v18 }
 0x506   : > { %v3975_v37 = vadd.f32 %v3974_v9, %v7695_v30  ;;  %6329 = vtanh.f32 %v3973_v28  ;;  %v3889_v17 = vpop.f32.mrb[142].mxu0  ;;  %v5664_v35 = vpack.c.bf16 %v6310_v32, %v6302_v8 }
 0x507   : > { %v6312_v36 = vpop.eup %6311  ;;  %6331 = vtanh.f32 %v3886_v29  ;;  %v3890_v31 = vadd.f32 %v3889_v17, %v7701_v51  ;;  %v3978_v48 = vpop.f32.mrb[142].mxu1  ;;  %5657 = vmatprep.subr.bf16.mxu0 %v5656_v34 }
 0x508   : > { %v3891_v38 = vpop.f32.mrb[143].mxu0  ;;  %v6314_v39 = vpop.eup %6313  ;;  %6333 = vtanh.f32 %v3975_v37  ;;  %v3979_v41 = vadd.f32 %v3978_v48, %v7701_v51  ;;  %5665 = vmatprep.subr.bf16.mxu1 %v5664_v35  ;;  %5659 = vmatpush1.bf16.msra.mxu0 %v5658_v26 }
 0x509   : > { %v3892_v42 = vadd.f32 %v3891_v38, %v7701_v51  ;;  %v3980_v45 = vpop.f32.mrb[143].mxu1  ;;  %v6316_v44 = vpop.eup %6315  ;;  %6335 = vtanh.f32 %v3890_v31  ;;  %5667 = vmatpush1.bf16.msra.mxu1 %v5666_v40 }
 0x50a   : > { %v3981_v47 = vadd.f32 %v3980_v45, %v7701_v51  ;;  %v6318_v49 = vpop.eup %6317  ;;  %6337 = vtanh.f32 %v3979_v41 }
 0x50b   : > { %v6320_v50 = vpop.eup %6319  ;;  %6339 = vtanh.f32 %v3892_v42  ;;  %5381 = vmatmul.mubr.msk.f32.vlgmr.msra.gmra.mrb[160].mxu0 %vm1160_vm1, %v7725_v46 }
 0x50c   : > { %v4049_v52 = vpop.f32.mrb[144].mxu0  ;;  %v6322_v55 = vpop.eup %6321  ;;  %6341 = vtanh.f32 %v3981_v47  ;;  %5382 = vmatmul.mubr.msk.f32.vlgmr.msra.gmra.mrb[160].mxu1 %vm1160_vm1, %v7725_v46  ;;  %v5670_v60 = vpack.c.bf16 %v6320_v50, %v6312_v36  ;;  %4623 = vmatprep.mubr.f32.mxu0 %v6506_v1 }
 0x50d   : > { %v4050_v58 = vadd.f32 %v4049_v52, %v7683_v57  ;;  %v4138_v59 = vpop.f32.mrb[144].mxu1  ;;  %v4051_v43 = vpop.f32.mrb[145].mxu0  ;;  %v5678_v3 = vpack.c.bf16 %v6322_v55, %v6314_v39  ;;  %4694 = vmatprep.mubr.f32.mxu1 %v6506_v1 }
 0x50e   : > { %v6324_v0 = vpop.eup %6323  ;;  %v4139_v61 = vadd.f32 %v4138_v59, %v7683_v57  ;;  %v4052_v62 = vadd.f32 %v4051_v43, %v7683_v57  ;;  %v4140_v53 = vpop.f32.mrb[145].mxu1 }
 0x50f   : > { %v6326_v4 = vpop.eup %6325  ;;  %6343 = vtanh.f32 %v4050_v58  ;;  %v4141_v5 = vadd.f32 %v4140_v53, %v7683_v57  ;;  %v5668_v6 = vpack.c.bf16 %v6324_v0, %v6316_v44 }
 0x510   : > { %v6328_v56 = vpop.eup %6327  ;;  %6345 = vtanh.f32 %v4139_v61  ;;  %v4055_v7 = vpop.f32.mrb[146].mxu0  ;;  %v5676_v10 = vpack.c.bf16 %v6326_v4, %v6318_v49 }
 0x511   : > { %v6330_v11 = vpop.eup %6329  ;;  %6347 = vtanh.f32 %v4052_v62  ;;  %v4056_v12 = vadd.f32 %v4055_v7, %v7689_v33  ;;  %v4144_v13 = vpop.f32.mrb[146].mxu1  ;;  %5669 = vmatprep.subr.bf16.mxu0 %v5668_v6 }
 0x512   : > { %v4057_v63 = vpop.f32.mrb[147].mxu0  ;;  %v6332_v15 = vpop.eup %6331  ;;  %6349 = vtanh.f32 %v4141_v5  ;;  %v4145_v16 = vadd.f32 %v4144_v13, %v7689_v33  ;;  %5677 = vmatprep.subr.bf16.mxu1 %v5676_v10  ;;  %5671 = vmatpush1.bf16.msra.mxu0 %v5670_v60 }
 0x513   : > { %v4058_v18 = vadd.f32 %v4057_v63, %v7689_v33  ;;  %v4146_v54 = vpop.f32.mrb[147].mxu1  ;;  %v6334_v19 = vpop.eup %6333  ;;  %6351 = vtanh.f32 %v4056_v12  ;;  %5679 = vmatpush1.bf16.msra.mxu1 %v5678_v3 }
 0x514   : > { %v4147_v23 = vadd.f32 %v4146_v54, %v7689_v33  ;;  %v6336_v8 = vpop.eup %6335  ;;  %6353 = vtanh.f32 %v4145_v16  ;;  %v4061_v20 = vpop.f32.mrb[148].mxu0 }
 0x515   : > { %v6338_v2 = vpop.eup %6337  ;;  %6355 = vtanh.f32 %v4058_v18  ;;  %v4062_v22 = vadd.f32 %v4061_v20, %v7695_v30  ;;  %v4150_v24 = vpop.f32.mrb[148].mxu1  ;;  %v5674_v25 = vpack.c.bf16 %v6336_v8, %v6328_v56 }
 0x516   : > { %v4063_v14 = vpop.f32.mrb[149].mxu0  ;;  %v6340_v21 = vpop.eup %6339  ;;  %6357 = vtanh.f32 %v4147_v23  ;;  %v4151_v26 = vadd.f32 %v4150_v24, %v7695_v30  ;;  %v5682_v29 = vpack.c.bf16 %v6338_v2, %v6330_v11 }
 0x517   : > { %v4064_v27 = vadd.f32 %v4063_v14, %v7695_v30  ;;  %v4152_v28 = vpop.f32.mrb[149].mxu1  ;;  %v6342_v9 = vpop.eup %6341  ;;  %6359 = vtanh.f32 %v4062_v22  ;;  %v5672_v32 = vpack.c.bf16 %v6340_v21, %v6332_v15 }
 0x518   : > { %v4153_v40 = vadd.f32 %v4152_v28, %v7695_v30  ;;  %6361 = vtanh.f32 %v4151_v26  ;;  %v4067_v37 = vpop.f32.mrb[150].mxu0  ;;  %v5680_v34 = vpack.c.bf16 %v6342_v9, %v6334_v19 }
 0x519   : > { %v6344_v17 = vpop.eup %6343  ;;  %6363 = vtanh.f32 %v4064_v27  ;;  %v4068_v35 = vadd.f32 %v4067_v37, %v7701_v51  ;;  %v4156_v36 = vpop.f32.mrb[150].mxu1  ;;  %5673 = vmatprep.subr.bf16.mxu0 %v5672_v32 }
 0x51a   : > { %v4069_v31 = vpop.f32.mrb[151].mxu0  ;;  %v6346_v48 = vpop.eup %6345  ;;  %6365 = vtanh.f32 %v4153_v40  ;;  %v4157_v38 = vadd.f32 %v4156_v36, %v7701_v51  ;;  %5681 = vmatprep.subr.bf16.mxu1 %v5680_v34  ;;  %5675 = vmatpush1.bf16.msra.mxu0 %v5674_v25 }
 0x51b   : > { %v4070_v39 = vadd.f32 %v4069_v31, %v7701_v51  ;;  %v4158_v41 = vpop.f32.mrb[151].mxu1  ;;  %v6348_v42 = vpop.eup %6347  ;;  %6367 = vtanh.f32 %v4068_v35  ;;  %5683 = vmatpush1.bf16.msra.mxu1 %v5682_v29 }
 0x51c   : > { %v4159_v45 = vadd.f32 %v4158_v41, %v7701_v51  ;;  %v6350_v44 = vpop.eup %6349  ;;  %6369 = vtanh.f32 %v4157_v38 }
 0x51d   : > { %v6352_v47 = vpop.eup %6351  ;;  %6371 = vtanh.f32 %v4070_v39  ;;  %v4227_v49 = vpop.f32.mrb[152].mxu0  ;;  %5383 = vmatmul.mubr.msk.f32.vlgmr.msra.gmra.mrb[162].mxu0 %vm1160_vm1, %v7725_v46 }
 0x51e   : > { %v6354_v50 = vpop.eup %6353  ;;  %6373 = vtanh.f32 %v4159_v45  ;;  %v4228_v52 = vadd.f32 %v4227_v49, %v7683_v57  ;;  %v4316_v55 = vpop.f32.mrb[152].mxu1  ;;  %5384 = vmatmul.mubr.msk.f32.vlgmr.msra.gmra.mrb[162].mxu1 %vm1160_vm1, %v7725_v46  ;;  %v5686_v59 = vpack.c.bf16 %v6352_v47, %v6344_v17  ;;  %4765 = vmatprep.mubr.f32.mxu0 %v6506_v1 }
 0x51f   : > { %v4229_v58 = vpop.f32.mrb[153].mxu0  ;;  %v6356_v43 = vpop.eup %6355  ;;  %v4317_v60 = vadd.f32 %v4316_v55, %v7683_v57  ;;  %v5694_v62 = vpack.c.bf16 %v6354_v50, %v6346_v48  ;;  %4836 = vmatprep.mubr.f32.mxu1 %v6506_v1 }
 0x520   : > { %v4230_v0 = vadd.f32 %v4229_v58, %v7683_v57  ;;  %v4318_v61 = vpop.f32.mrb[153].mxu1  ;;  %v6358_v53 = vpop.eup %6357  ;;  %6375 = vtanh.f32 %v4228_v52  ;;  %v5684_v4 = vpack.c.bf16 %v6356_v43, %v6348_v42 }
 0x521   : > { %v4319_v3 = vadd.f32 %v4318_v61, %v7683_v57  ;;  %v6360_v5 = vpop.eup %6359  ;;  %6377 = vtanh.f32 %v4317_v60  ;;  %v4233_v6 = vpop.f32.mrb[154].mxu0  ;;  %v5692_v56 = vpack.c.bf16 %v6358_v53, %v6350_v44 }
 0x522   : > { %v6362_v7 = vpop.eup %6361  ;;  %6379 = vtanh.f32 %v4230_v0  ;;  %v4234_v10 = vadd.f32 %v4233_v6, %v7689_v33  ;;  %v4322_v11 = vpop.f32.mrb[154].mxu1  ;;  %5685 = vmatprep.subr.bf16.mxu0 %v5684_v4 }
 0x523   : > { %v4235_v12 = vpop.f32.mrb[155].mxu0  ;;  %v6364_v13 = vpop.eup %6363  ;;  %6381 = vtanh.f32 %v4319_v3  ;;  %v4323_v63 = vadd.f32 %v4322_v11, %v7689_v33  ;;  %5693 = vmatprep.subr.bf16.mxu1 %v5692_v56  ;;  %5687 = vmatpush1.bf16.msra.mxu0 %v5686_v59 }
 0x524   : > { %v4236_v15 = vadd.f32 %v4235_v12, %v7689_v33  ;;  %v4324_v16 = vpop.f32.mrb[155].mxu1  ;;  %v6366_v57 = vpop.eup %6365  ;;  %6383 = vtanh.f32 %v4234_v10  ;;  %5695 = vmatpush1.bf16.msra.mxu1 %v5694_v62 }
 0x525   : > { %v4325_v18 = vadd.f32 %v4324_v16, %v7689_v33  ;;  %v6368_v54 = vpop.eup %6367  ;;  %6385 = vtanh.f32 %v4323_v63  ;;  %v4239_v19 = vpop.f32.mrb[156].mxu0 }
 0x526   : > { %v6370_v23 = vpop.eup %6369  ;;  %6387 = vtanh.f32 %v4236_v15  ;;  %v4240_v8 = vadd.f32 %v4239_v19, %v7695_v30  ;;  %v4328_v20 = vpop.f32.mrb[156].mxu1  ;;  %v5690_v22 = vpack.c.bf16 %v6368_v54, %v6360_v5  ;;  %v6508_v5 = vmov 1966171168  }
 0x527   : > { %v4241_v2 = vpop.f32.mrb[157].mxu0  ;;  %v6372_v24 = vpop.eup %6371  ;;  %6389 = vtanh.f32 %v4325_v18  ;;  %v4329_v14 = vadd.f32 %v4328_v20, %v7695_v30  ;;  %v5698_v26 = vpack.c.bf16 %v6370_v23, %v6362_v7  ;;  %v5006_v6 = vunpack.c.l.s4 %v6508_v5 }
 0x528   : > { %v4242_v25 = vadd.f32 %v4241_v2, %v7695_v30  ;;  %v4330_v21 = vpop.f32.mrb[157].mxu1  ;;  %v6374_v33 = vpop.eup %6373  ;;  %6391 = vtanh.f32 %v4240_v8  ;;  %v5688_v28 = vpack.c.bf16 %v6372_v24, %v6364_v13 }
 0x529   : > { %v4331_v27 = vadd.f32 %v4330_v21, %v7695_v30  ;;  %6393 = vtanh.f32 %v4329_v14  ;;  %v4245_v29 = vpop.f32.mrb[158].mxu0  ;;  %v5696_v9 = vpack.c.bf16 %v6374_v33, %v6366_v57  ;;  %v4408_v7 = vpop.permute.xlu0 %4407  ;;  %v5007_v10 = vunpack.c.0.s8 %v5006_v6 }
 0x52a   : > { %v6376_v40 = vpop.eup %6375  ;;  %6395 = vtanh.f32 %v4242_v25  ;;  %v4246_v32 = vadd.f32 %v4245_v29, %v7701_v51  ;;  %v4334_v37 = vpop.f32.mrb[158].mxu1  ;;  %5689 = vmatprep.subr.bf16.mxu0 %v5688_v28 }
 0x52b   : > { %v4247_v34 = vpop.f32.mrb[159].mxu0  ;;  %v6378_v17 = vpop.eup %6377  ;;  %6397 = vtanh.f32 %v4331_v27  ;;  %v4335_v35 = vadd.f32 %v4334_v37, %v7701_v51  ;;  %5697 = vmatprep.subr.bf16.mxu1 %v5696_v9  ;;  %5691 = vmatpush1.bf16.msra.mxu0 %v5690_v22 }
 0x52c   : > { %v4248_v36 = vadd.f32 %v4247_v34, %v7701_v51  ;;  %v4336_v31 = vpop.f32.mrb[159].mxu1  ;;  %v6380_v30 = vpop.eup %6379  ;;  %6399 = vtanh.f32 %v4246_v32  ;;  %5699 = vmatpush1.bf16.msra.mxu1 %v5698_v26 }
 0x52d   : > { %v4337_v48 = vadd.f32 %v4336_v31, %v7701_v51  ;;  %v6382_v38 = vpop.eup %6381  ;;  %6401 = vtanh.f32 %v4335_v35 }
 0x52e   : > { %v6384_v39 = vpop.eup %6383  ;;  %6403 = vtanh.f32 %v4248_v36  ;;  %5385 = vmatmul.mubr.msk.f32.vlgmr.msra.gmra.mrb[164].mxu0 %vm1160_vm1, %v7725_v46 }
 0x52f   : > { %v6386_v41 = vpop.eup %6385  ;;  %6405 = vtanh.f32 %v4337_v48  ;;  %5386 = vmatmul.mubr.msk.f32.vlgmr.msra.gmra.mrb[164].mxu1 %vm1160_vm1, %v7725_v46  ;;  %v5702_v42 = vpack.c.bf16 %v6384_v39, %v6376_v40  ;;  %4907 = vmatprep.mubr.f32.mxu0 %v6506_v1 }
 0x530   : > { %v6388_v45 = vpop.eup %6387  ;;  %v5710_v44 = vpack.c.bf16 %v6386_v41, %v6378_v17  ;;  %4978 = vmatprep.mubr.f32.mxu1 %v6506_v1  ;;  %v4410_v1 = vlaneseq }
 0x531   : > { %v6390_v51 = vpop.eup %6389  ;;  %v5700_v47 = vpack.c.bf16 %v6388_v45, %v6380_v30 }
 0x532   : > { %v6392_v49 = vpop.eup %6391  ;;  %v5708_v50 = vpack.c.bf16 %v6390_v51, %v6382_v38  ;;  %v4411_v4 = vshrl.u32 %v4410_v1, 7 }
 0x533   : > { %v6394_v52 = vpop.eup %6393  ;;  %5701 = vmatprep.subr.bf16.mxu0 %v5700_v47 }
 0x534   : > { %v6396_v55 = vpop.eup %6395  ;;  %5709 = vmatprep.subr.bf16.mxu1 %v5708_v50  ;;  %5703 = vmatpush1.bf16.msra.mxu0 %v5702_v42  ;;  %v4412_v56 = vsub.s32 0, %v4411_v4  ;;  %v5010_v18 = vsub.s32 %v5007_v10, %v4411_v4 }
 0x535   : > { %v6398_v58 = vpop.eup %6397  ;;  %5711 = vmatpush1.bf16.msra.mxu1 %v5710_v44 }
 0x536   : > { %v6400_v59 = vpop.eup %6399  ;;  %v4413_v11 = vrot.slane %v4408_v7, %v4412_v56 }
 0x537   : > { %v6402_v43 = vpop.eup %6401  ;;  %v5706_v60 = vpack.c.bf16 %v6400_v59, %v6392_v49 }
 0x538   : > { %v6404_v0 = vpop.eup %6403  ;;  %v5714_v61 = vpack.c.bf16 %v6402_v43, %v6394_v52 }
 0x539   : > { %v6406_v62 = vpop.eup %6405  ;;  %v5704_v53 = vpack.c.bf16 %v6404_v0, %v6396_v55 }
 0x53a   : > { %v5712_v3 = vpack.c.bf16 %v6406_v62, %v6398_v58 }
 0x53b   : > { %5705 = vmatprep.subr.bf16.mxu0 %v5704_v53 }
 0x53c   : > { %5713 = vmatprep.subr.bf16.mxu1 %v5712_v3  ;;  %5707 = vmatpush1.bf16.msra.mxu0 %v5706_v60 }
 0x53d   : > { %5715 = vmatpush1.bf16.msra.mxu1 %v5714_v61 }
 0x53f   : > { %5387 = vmatmul.mubr.msk.f32.vlgmr.msra.gmra.mrb[166].mxu0 %vm1160_vm1, %v7725_v46 }
 0x540   : > { %5388 = vmatmul.mubr.msk.f32.vlgmr.msra.gmra.mrb[166].mxu1 %vm1160_vm1, %v7725_v46 }
 0x5de   : > { %v4483_v12 = vpop.f32.mrb[160].mxu0 }
 0x5df   : > { %v4484_v13 = vadd.f32 %v4483_v12, %v4413_v11  ;;  %v4554_v63 = vpop.f32.mrb[160].mxu1  ;;  %v4485_v15 = vpop.f32.mrb[161].mxu0 }
 0x5e0   : > { %v4555_v16 = vadd.f32 %v4554_v63, %v4413_v11  ;;  %v4486_v57 = vadd.f32 %v4485_v15, %v4413_v11  ;;  %v4556_v54 = vpop.f32.mrb[161].mxu1 }
 0x5e1   : > { %v4557_v19 = vadd.f32 %v4556_v54, %v4413_v11 }
 0x5e2   : > { %v5001_v23 = vcombine.low %v4484_v13, %v4486_v57 }
 0x5e3   : > { %v5002_v8 = vcombine.low %v4555_v16, %v4557_v19 }
 0x5e4   : > { %v5011_v46 = vrot.slane %v5001_v23, %v5010_v18 }
 0x5e5   : > { %v5018_v20 = vrot.slane %v5002_v8, %v5010_v18 }
 0x5e7   : > { %v5033_v2 = vcombine.low %v5011_v46, %v5018_v20 }
 0x5e9   : > { %v5041_v37 = vrot.slane %v5033_v2, %v5010_v18 }
 0x5f0   : > { %v4625_v22 = vpop.f32.mrb[162].mxu0 }
 0x5f1   : > { %v4626_v24 = vadd.f32 %v4625_v22, %v4413_v11  ;;  %v4696_v14 = vpop.f32.mrb[162].mxu1  ;;  %v4627_v25 = vpop.f32.mrb[163].mxu0 }
 0x5f2   : > { %v4697_v21 = vadd.f32 %v4696_v14, %v4413_v11  ;;  %v4628_v26 = vadd.f32 %v4627_v25, %v4413_v11  ;;  %v4698_v33 = vpop.f32.mrb[163].mxu1 }
 0x5f3   : > { %v4699_v27 = vadd.f32 %v4698_v33, %v4413_v11 }
 0x5f4   : > { %v5003_v28 = vcombine.low %v4626_v24, %v4628_v26 }
 0x5f5   : > { %v5004_v29 = vcombine.low %v4697_v21, %v4699_v27 }
 0x5f6   : > { %v5025_v9 = vrot.slane %v5003_v28, %v5010_v18 }
 0x5f7   : > { %v5032_v40 = vrot.slane %v5004_v29, %v5010_v18 }
 0x5f9   : > { %v5034_v32 = vcombine.low %v5025_v9, %v5032_v40 }
 0x5fb   : > { %v5048_v34 = vrot.slane %v5034_v32, %v5010_v18 }
 0x5fd   : > { %v5049_v17 = vcombine.low %v5041_v37, %v5048_v34 }
 0x5ff   : > { %5101 = vst [vmem:[%s7783_s21] sm:$0xff] %v5049_v17 }
 0x601   : > { %v4767_v35 = vpop.f32.mrb[164].mxu0 }
 0x602   : > { %v4768_v36 = vadd.f32 %v4767_v35, %v4413_v11  ;;  %v4838_v31 = vpop.f32.mrb[164].mxu1  ;;  %v4769_v30 = vpop.f32.mrb[165].mxu0 }
 0x603   : > { %v4839_v48 = vadd.f32 %v4838_v31, %v4413_v11  ;;  %v4770_v38 = vadd.f32 %v4769_v30, %v4413_v11  ;;  %v4840_v39 = vpop.f32.mrb[165].mxu1 }
 0x604   : > { %v4841_v41 = vadd.f32 %v4840_v39, %v4413_v11 }
 0x605   : > { %v5050_v42 = vcombine.low %v4768_v36, %v4770_v38 }
 0x606   : > { %v5051_v45 = vcombine.low %v4839_v48, %v4841_v41 }
 0x607   : > { %v5060_v44 = vrot.slane %v5050_v42, %v5010_v18 }
 0x608   : > { %v5067_v51 = vrot.slane %v5051_v45, %v5010_v18 }
 0x60a   : > { %v5082_v47 = vcombine.low %v5060_v44, %v5067_v51 }
 0x60c   : > { %v5090_v1 = vrot.slane %v5082_v47, %v5010_v18 }
 0x612   : > { %v4909_v49 = vpop.f32.mrb[166].mxu0 }
 0x613   : > { %v4910_v50 = vadd.f32 %v4909_v49, %v4413_v11  ;;  %v4980_v52 = vpop.f32.mrb[166].mxu1  ;;  %v4911_v55 = vpop.f32.mrb[167].mxu0 }
 0x614   : > { %v4981_v58 = vadd.f32 %v4980_v52, %v4413_v11  ;;  %v4912_v59 = vadd.f32 %v4911_v55, %v4413_v11  ;;  %v4982_v43 = vpop.f32.mrb[167].mxu1 }
 0x615   : > { %v4983_v60 = vadd.f32 %v4982_v43, %v4413_v11 }
 0x616   : > { %v5052_v0 = vcombine.low %v4910_v50, %v4912_v59 }
 0x617   : > { %v5053_v61 = vcombine.low %v4981_v58, %v4983_v60 }
 0x618   : > { %v5074_v62 = vrot.slane %v5052_v0, %v5010_v18 }
 0x619   : > { %v5081_v53 = vrot.slane %v5053_v61, %v5010_v18 }
 0x61b   : > { %v5083_v3 = vcombine.low %v5074_v62, %v5081_v53 }
 0x61d   : > { %v5097_v4 = vrot.slane %v5083_v3, %v5010_v18 }
 0x61f   : > { %v5098_v5 = vcombine.low %v5090_v1, %v5097_v4 }
 0x621   : > { %5102 = vst [vmem:[%s7783_s21 + $0x8] sm:$0xff] %v5098_v5 }
 0x622   : > { %6450 = shalt.err (!%p6447_p4)
}
 0x623   : > { %s6451_s30 = scalar_lea.hbm %s7791_s18, 256  ;;  %s6455_s10 = scalar_lea.hbm %s7843_s7, 512 }
 0x624   : > { %p6452_p5 = scmp.ne.s32.totalorder %s7791_s18, %s6451_s30  ;;  %p6456_p0 = scmp.lt.u32.totalorder %s7791_s18, %s7843_s7 }
 0x625   : > { %p6457_p1 = scmp.lt.u32.totalorder %s6455_s10, %s6451_s30  ;;  %p6459_p6 = scmp.lt.u32.totalorder %s6451_s30, %s7791_s18 }
 0x626   : > { %p6453_p8 = pnand %p6452_p5, %p7852_p11 }
 0x627   : > { %p6458_p3 = por %p6457_p1, %p6456_p0 }
 0x628   : > { %p6454_p9 = pneg %p6453_p8 }
 0x629   : > { %p6460_p12 = por %p6459_p6, %p6458_p3 }
 0x62b   : > { %p6461_p13 = pnand %p6460_p12, %p6454_p9 }
 0x62d   : > { %6464 = shalt.err (!%p6461_p13)
}
 0x62e   : > { %5718 = dma.vmem_to_hbm [thread:$0]  (%p7852_p11), %s7793_s24, 256, %s7791_s18, %s5104_s16  }
 0x62f PF: > { %s5130_s23 = sand.u32 1, %s6491_s26   ;;  %p7853_p7 = scmp.ne.s32.totalorder %s7848_s15, 0 }
 0x630   : > { %p7854_p10 = scmp.ge.s32.totalorder %s6503_s29, 2  ;;  %s5131_s25 = scalar_lea.sflag [#allocation5], %s5130_s23 }
 0x632   : > { %p5725_p2 = pnand %p7854_p10, %p7853_p7 }
 0x634   : > { %6486 = dma.done.wait (!%p5725_p2), %s5131_s25, 256  }
 0x635   : > { %6488 = vsyncadd (!%p5725_p2), %s5131_s25, 4294967040  ;;  %p22_p4 = scmp.ge.s32.totalorder %s6578_s8, 4   ;;  %s7855_s26 = smov %s6495_s27 }
 0x636   : > { %s7856_s27 = smov %s6499_s28  ;;  %s7857_s28 = smov %s6590_s11 }
 0x637   : > { %s7858_s29 = smov %s6578_s8  ;;  %24 = sbr.rel (!%p22_p4) target bundleno = 8 (0x8), region = 99 }
 0x63e   :  { %5136 = vsyncpa [#allocation4], 1 }
 0x63f   :  { %5138 = vsyncpa [#allocation4 + $0x1], 1 }
 0x640   :  { %5139 = vsyncpa [#allocation5], 1 }
 0x641   :  { %5141 = vsyncpa [#allocation5 + $0x1], 1 }

</bundles_post_ra>
